<compile_context>
chip_gen: v5e
topology: v5e:2x2
jax: 0.10.0
libtpu: 0.0.40
codegen_flags: <defaults>
</compile_context>

<pallas_src>
import jax
import jax.numpy as jnp
from jax import lax
from jax.experimental import pallas as pl
from jax.experimental.pallas import tpu as pltpu


# --------------------------------------------------------------------------
# Fused bidirectional LSTM kernel: one call per sequence, both directions.
# --------------------------------------------------------------------------
def _bilstm_kernel(gin_ref, whh_ref, hseq_ref, hf_sc, hb_sc):
    """Fused forward+backward LSTM recurrence over a full sequence.

    gin_ref : (T, B, 8H)  precomputed x @ [W_ih_f | W_ih_b] + [b_f | b_b]
    whh_ref : (2H, 8H)    block-diagonal [[W_hh_f, 0], [0, W_hh_b]]
    hseq_ref: (T, B, 2H)  output hidden sequence [h_fwd | h_bwd]
    hf_sc / hb_sc : (T, B, H) per-direction VMEM scratch.
    """
    T, B, H8 = gin_ref.shape
    H4 = H8 // 2
    H = H4 // 4
    whh = whh_ref[...]            # loaded once, stays resident

    def cell(g, c_prev):
        # PyTorch gate order: i, f, g, o
        i = jax.nn.sigmoid(g[:, 0 * H:1 * H])
        f = jax.nn.sigmoid(g[:, 1 * H:2 * H])
        gg = jnp.tanh(g[:, 2 * H:3 * H])
        o = jax.nn.sigmoid(g[:, 3 * H:4 * H])
        c = f * c_prev + i * gg
        return o * jnp.tanh(c), c

    def step(s, carry):
        h_cat, c_cat = carry                                   # (B, 2H): [fwd|bwd]
        # Single 256-wide recurrence matmul covering both directions.
        rec = jnp.dot(h_cat, whh, preferred_element_type=jnp.float32)  # (B, 8H)
        g_f = gin_ref[s][:, :H4] + rec[:, :H4]                 # forward: time s
        g_b = gin_ref[T - 1 - s][:, H4:] + rec[:, H4:]         # backward: time T-1-s
        h_f, c_f = cell(g_f, c_cat[:, :H])
        h_b, c_b = cell(g_b, c_cat[:, H:])
        hf_sc[s] = h_f
        hb_sc[T - 1 - s] = h_b
        return (jnp.concatenate([h_f, h_b], axis=-1),
                jnp.concatenate([c_f, c_b], axis=-1))

    zero = jnp.zeros((B, 2 * H), jnp.float32)
    lax.fori_loop(0, T, step, (zero, zero), unroll=True)
    # One lane-dense writeback of the whole hidden sequence.
    hseq_ref[...] = jnp.concatenate([hf_sc[...], hb_sc[...]], axis=-1)


def bilstm_seq(gates_in, w_hh_fused):
    """gates_in: (T, B, 8H); w_hh_fused: (2H, 8H). Returns (T, B, 2H)."""
    T, B, H8 = gates_in.shape
    H = H8 // 8
    return pl.pallas_call(
        _bilstm_kernel,
        out_shape=jax.ShapeDtypeStruct((T, B, 2 * H), jnp.float32),
        scratch_shapes=[pltpu.VMEM((T, B, H), jnp.float32),
                        pltpu.VMEM((T, B, H), jnp.float32)],
    )(gates_in, w_hh_fused)


# --------------------------------------------------------------------------
# Fused epilogue: attention(sentence) + attention(aspect) + concat + FC.
# --------------------------------------------------------------------------
def _attn_fc_kernel(hs_sent_ref, hs_asp_ref, watt_ref, batt_ref, va_ref,
                    wfc_ref, bfc_ref, out_ref):
    watt = watt_ref[...]          # (D, D) = Wa + Ua (pre-added in wrapper)
    batt = batt_ref[...]          # (1, D) = ba + bu
    va = va_ref[...]              # (D, 1)

    def context(hs_ref):          # hs_ref: (B, T, D) -> (B, D)
        B = hs_ref.shape[0]
        rows = []
        for b in range(B):        # B is static and tiny; unrolled at trace time
            xb = hs_ref[b]        # (T, D)
            sb = jnp.tanh(jnp.dot(xb, watt,
                                  preferred_element_type=jnp.float32) + batt)
            sv = jnp.dot(sb, va, preferred_element_type=jnp.float32)   # (T, 1)
            e = jnp.exp(sv - jnp.max(sv, axis=0, keepdims=True))
            w = e / jnp.sum(e, axis=0, keepdims=True)                  # softmax over T
            rows.append(jnp.sum(w * xb, axis=0, keepdims=True))        # (1, D)
        return jnp.concatenate(rows, axis=0)                           # (B, D)

    ctx = jnp.concatenate([context(hs_sent_ref), context(hs_asp_ref)],
                          axis=-1)                                     # (B, 2D=128)
    # Dropout in eval/inference mode is the identity.
    out_ref[...] = (jnp.dot(ctx, wfc_ref[...],
                            preferred_element_type=jnp.float32) + bfc_ref[...])


def attention_fc(hs_sent, hs_asp, w_att, b_att, va, w_fc, b_fc):
    B = hs_sent.shape[0]
    O = w_fc.shape[1]
    return pl.pallas_call(
        _attn_fc_kernel,
        out_shape=jax.ShapeDtypeStruct((B, O), jnp.float32),
    )(hs_sent, hs_asp, w_att, b_att, va, w_fc, b_fc)


# --------------------------------------------------------------------------
# Full model forward.
# --------------------------------------------------------------------------
def bilstm_attention_forward(params, sentence_indices, aspect_indices):
    emb = params["embedding"]
    H = params["w_hh_f"].shape[0]

    # Fused / pre-combined weights (constant-foldable under jit).
    w_ih = jnp.concatenate([params["w_ih_f"], params["w_ih_b"]], axis=1)   # (E, 8H)
    b_ih = jnp.concatenate([params["b_f"], params["b_b"]], axis=1)         # (1, 8H)
    w_hh = jnp.zeros((2 * H, 8 * H), jnp.float32)
    w_hh = w_hh.at[:H, :4 * H].set(params["w_hh_f"])
    w_hh = w_hh.at[H:, 4 * H:].set(params["w_hh_b"])
    w_att = params["wa"] + params["ua"]      # x@Wa + x@Ua == x@(Wa+Ua)
    b_att = params["ba"] + params["bu"]

    def bilstm(indices):
        x_tm = jnp.take(emb, indices.T, axis=0)                  # (T, B, E) time-major
        T, B, E = x_tm.shape
        # Hoisted input projection: one big MXU matmul instead of T tiny ones.
        gin = (x_tm.reshape(T * B, E) @ w_ih + b_ih).reshape(T, B, 8 * H)
        hs_tm = bilstm_seq(gin, w_hh)                            # (T, B, 2H)
        return jnp.transpose(hs_tm, (1, 0, 2))                   # (B, T, 2H)

    hs_sent = bilstm(sentence_indices)
    hs_asp = bilstm(aspect_indices)

    return attention_fc(hs_sent, hs_asp, w_att, b_att, params["va"],
                        params["w_fc"], params["b_fc"])


# --------------------------------------------------------------------------
# Pure-JAX reference (same math) for correctness checking.
# --------------------------------------------------------------------------
def reference_forward(params, sentence_indices, aspect_indices):
    emb = params["embedding"]

    def lstm_dir(x_tm, w_ih, w_hh, b):
        T, B, E = x_tm.shape
        H = w_hh.shape[0]

        def step(carry, x_t):
            h, c = carry
            g = x_t @ w_ih + h @ w_hh + b
            i = jax.nn.sigmoid(g[:, :H])
            f = jax.nn.sigmoid(g[:, H:2 * H])
            gg = jnp.tanh(g[:, 2 * H:3 * H])
            o = jax.nn.sigmoid(g[:, 3 * H:])
            c = f * c + i * gg
            h = o * jnp.tanh(c)
            return (h, c), h

        _, hs = lax.scan(step, (jnp.zeros((B, H), jnp.float32),
                                jnp.zeros((B, H), jnp.float32)), x_tm)
        return hs

    def bilstm(x):
        x_tm = jnp.transpose(x, (1, 0, 2))
        h_f = lstm_dir(x_tm, params["w_ih_f"], params["w_hh_f"], params["b_f"])
        h_b = lstm_dir(x_tm[::-1], params["w_ih_b"], params["w_hh_b"],
                       params["b_b"])[::-1]
        return jnp.transpose(jnp.concatenate([h_f, h_b], axis=-1), (1, 0, 2))

    def attn(lo):
        s = jnp.tanh(lo @ params["wa"] + params["ba"]
                     + lo @ params["ua"] + params["bu"])
        sv = (s @ params["va"])[..., 0]                   # (B, T)
        w = jax.nn.softmax(sv, axis=1)
        return jnp.sum(w[:, :, None] * lo, axis=1)

    sent_out = bilstm(jnp.take(emb, sentence_indices, axis=0))
    asp_out = bilstm(jnp.take(emb, aspect_indices, axis=0))
    ctx = jnp.concatenate([attn(sent_out), attn(asp_out)], axis=1)
    return ctx @ params["w_fc"] + params["b_fc"]


# --------------------------------------------------------------------------
# Deterministic parameter init (linear weights stored as (in, out)).
# --------------------------------------------------------------------------
def init_params(key, vocab, embed_dim, hidden_dim, output_dim):
    D = 2 * hidden_dim  # bidirectional output width
    ks = jax.random.split(key, 14)

    def n(k, shape, scale=0.1):
        return (scale * jax.random.normal(k, shape)).astype(jnp.float32)

    return dict(
        embedding=n(ks[0], (vocab, embed_dim), 1.0),
        w_ih_f=n(ks[1], (embed_dim, 4 * hidden_dim)),
        w_hh_f=n(ks[2], (hidden_dim, 4 * hidden_dim)),
        b_f=n(ks[3], (1, 4 * hidden_dim)),
        w_ih_b=n(ks[4], (embed_dim, 4 * hidden_dim)),
        w_hh_b=n(ks[5], (hidden_dim, 4 * hidden_dim)),
        b_b=n(ks[6], (1, 4 * hidden_dim)),
        wa=n(ks[7], (D, D)), ba=n(ks[8], (1, D)),
        ua=n(ks[9], (D, D)), bu=n(ks[10], (1, D)),
        va=n(ks[11], (D, 1)),
        w_fc=n(ks[12], (2 * D, output_dim)),
        b_fc=n(ks[13], (1, output_dim)),
    )


if __name__ == "__main__":
    # TODO(synk): num_layers=1 / no inter-layer dropout; dropout runs in eval mode (identity).
    VOCAB, EMBED, HIDDEN, OUT = 50, 32, 32, 3
    B, T_SENT, T_ASP = 2, 8, 4

    key = jax.random.PRNGKey(0)
    kp, ks, ka = jax.random.split(key, 3)
    params = init_params(kp, VOCAB, EMBED, HIDDEN, OUT)
    sentence_idx = jax.random.randint(ks, (B, T_SENT), 0, VOCAB, dtype=jnp.int32)
    aspect_idx = jax.random.randint(ka, (B, T_ASP), 0, VOCAB, dtype=jnp.int32)

    out = jax.jit(bilstm_attention_forward)(params, sentence_idx, aspect_idx)
    out = jax.block_until_ready(out)

    ref = reference_forward(params, sentence_idx, aspect_idx)
    assert out.shape == (B, OUT), out.shape
    assert jnp.allclose(out, ref, atol=5e-3, rtol=5e-3), (out, ref)

    print("KERNEL_OK")
</pallas_src>

<mosaic_0001>
module attributes {stable_mosaic.version = 11 : i64} {
  func.func @_bilstm_kernel(%arg0: memref<8x2x256xf32, #tpu.memory_space<vmem>>, %arg1: memref<64x256xf32, #tpu.memory_space<vmem>>, %arg2: memref<8x2x64xf32, #tpu.memory_space<vmem>>, %arg3: memref<8x2x32xf32, #tpu.memory_space<vmem>>, %arg4: memref<8x2x32xf32, #tpu.memory_space<vmem>>) attributes {dimension_semantics = [], scalar_prefetch = 0 : i64, scratch_operands = 2 : i64, tpu.core_type = #tpu.core_type<tc>} {
    %c0 = arith.constant 0 : index
    %c0_0 = arith.constant 0 : index
    %0 = vector.load %arg1[%c0, %c0_0] : memref<64x256xf32, #tpu.memory_space<vmem>>, vector<64x256xf32>
    %cst = arith.constant 0.000000e+00 : f32
    %1 = vector.broadcast %cst : f32 to vector<2x64xf32>
    %c0_i32 = arith.constant 0 : i32
    %cst_1 = arith.constant dense<0.000000e+00> : vector<2x256xf32>
    %2 = tpu.matmul %1, %0, %cst_1 {dimension_numbers = #tpu.dot_dimension_numbers<[1], [0], [0], [1], [0, 0, 1, 1], [], []>} : vector<2x64xf32>, vector<64x256xf32>, vector<2x256xf32> -> vector<2x256xf32>
    %3 = arith.index_cast %c0_i32 : i32 to index
    %c0_2 = arith.constant 0 : index
    %c0_3 = arith.constant 0 : index
    %4 = vector.load %arg0[%3, %c0_2, %c0_3] : memref<8x2x256xf32, #tpu.memory_space<vmem>>, vector<1x2x256xf32>
    %5 = vector.shape_cast %4 : vector<1x2x256xf32> to vector<2x256xf32>
    %6 = vector.extract_strided_slice %5 {offsets = [0, 0], sizes = [2, 128], strides = [1, 1]} : vector<2x256xf32> to vector<2x128xf32>
    %7 = vector.extract_strided_slice %2 {offsets = [0, 0], sizes = [2, 128], strides = [1, 1]} : vector<2x256xf32> to vector<2x128xf32>
    %8 = arith.addf %6, %7 : vector<2x128xf32>
    %c7_i32 = arith.constant 7 : i32
    %9 = arith.subi %c7_i32, %c0_i32 : i32
    %10 = arith.index_cast %9 : i32 to index
    %c0_4 = arith.constant 0 : index
    %c0_5 = arith.constant 0 : index
    %11 = vector.load %arg0[%10, %c0_4, %c0_5] : memref<8x2x256xf32, #tpu.memory_space<vmem>>, vector<1x2x256xf32>
    %12 = vector.shape_cast %11 : vector<1x2x256xf32> to vector<2x256xf32>
    %13 = vector.extract_strided_slice %12 {offsets = [0, 128], sizes = [2, 128], strides = [1, 1]} : vector<2x256xf32> to vector<2x128xf32>
    %14 = vector.extract_strided_slice %2 {offsets = [0, 128], sizes = [2, 128], strides = [1, 1]} : vector<2x256xf32> to vector<2x128xf32>
    %15 = arith.addf %13, %14 : vector<2x128xf32>
    %16 = vector.extract_strided_slice %1 {offsets = [0, 0], sizes = [2, 32], strides = [1, 1]} : vector<2x64xf32> to vector<2x32xf32>
    %17 = vector.extract_strided_slice %8 {offsets = [0, 0], sizes = [2, 32], strides = [1, 1]} : vector<2x128xf32> to vector<2x32xf32>
    %18 = arith.negf %17 : vector<2x32xf32>
    %19 = math.exp %18 : vector<2x32xf32>
    %cst_6 = arith.constant 1.000000e+00 : f32
    %20 = vector.broadcast %cst_6 : f32 to vector<2x32xf32>
    %21 = arith.addf %20, %19 : vector<2x32xf32>
    %22 = arith.divf %20, %21 : vector<2x32xf32>
    %23 = vector.extract_strided_slice %8 {offsets = [0, 32], sizes = [2, 32], strides = [1, 1]} : vector<2x128xf32> to vector<2x32xf32>
    %24 = arith.negf %23 : vector<2x32xf32>
    %25 = math.exp %24 : vector<2x32xf32>
    %cst_7 = arith.constant 1.000000e+00 : f32
    %26 = vector.broadcast %cst_7 : f32 to vector<2x32xf32>
    %27 = arith.addf %26, %25 : vector<2x32xf32>
    %28 = arith.divf %26, %27 : vector<2x32xf32>
    %29 = vector.extract_strided_slice %8 {offsets = [0, 64], sizes = [2, 32], strides = [1, 1]} : vector<2x128xf32> to vector<2x32xf32>
    %30 = math.tanh %29 : vector<2x32xf32>
    %31 = vector.extract_strided_slice %8 {offsets = [0, 96], sizes = [2, 32], strides = [1, 1]} : vector<2x128xf32> to vector<2x32xf32>
    %32 = arith.negf %31 : vector<2x32xf32>
    %33 = math.exp %32 : vector<2x32xf32>
    %cst_8 = arith.constant 1.000000e+00 : f32
    %34 = vector.broadcast %cst_8 : f32 to vector<2x32xf32>
    %35 = arith.addf %34, %33 : vector<2x32xf32>
    %36 = arith.divf %34, %35 : vector<2x32xf32>
    %37 = arith.mulf %28, %16 : vector<2x32xf32>
    %38 = arith.mulf %22, %30 : vector<2x32xf32>
    %39 = arith.addf %37, %38 : vector<2x32xf32>
    %40 = math.tanh %39 : vector<2x32xf32>
    %41 = arith.mulf %36, %40 : vector<2x32xf32>
    %42 = vector.extract_strided_slice %1 {offsets = [0, 32], sizes = [2, 32], strides = [1, 1]} : vector<2x64xf32> to vector<2x32xf32>
    %43 = vector.extract_strided_slice %15 {offsets = [0, 0], sizes = [2, 32], strides = [1, 1]} : vector<2x128xf32> to vector<2x32xf32>
    %44 = arith.negf %43 : vector<2x32xf32>
    %45 = math.exp %44 : vector<2x32xf32>
    %cst_9 = arith.constant 1.000000e+00 : f32
    %46 = vector.broadcast %cst_9 : f32 to vector<2x32xf32>
    %47 = arith.addf %46, %45 : vector<2x32xf32>
    %48 = arith.divf %46, %47 : vector<2x32xf32>
    %49 = vector.extract_strided_slice %15 {offsets = [0, 32], sizes = [2, 32], strides = [1, 1]} : vector<2x128xf32> to vector<2x32xf32>
    %50 = arith.negf %49 : vector<2x32xf32>
    %51 = math.exp %50 : vector<2x32xf32>
    %cst_10 = arith.constant 1.000000e+00 : f32
    %52 = vector.broadcast %cst_10 : f32 to vector<2x32xf32>
    %53 = arith.addf %52, %51 : vector<2x32xf32>
    %54 = arith.divf %52, %53 : vector<2x32xf32>
    %55 = vector.extract_strided_slice %15 {offsets = [0, 64], sizes = [2, 32], strides = [1, 1]} : vector<2x128xf32> to vector<2x32xf32>
    %56 = math.tanh %55 : vector<2x32xf32>
    %57 = vector.extract_strided_slice %15 {offsets = [0, 96], sizes = [2, 32], strides = [1, 1]} : vector<2x128xf32> to vector<2x32xf32>
    %58 = arith.negf %57 : vector<2x32xf32>
    %59 = math.exp %58 : vector<2x32xf32>
    %cst_11 = arith.constant 1.000000e+00 : f32
    %60 = vector.broadcast %cst_11 : f32 to vector<2x32xf32>
    %61 = arith.addf %60, %59 : vector<2x32xf32>
    %62 = arith.divf %60, %61 : vector<2x32xf32>
    %63 = arith.mulf %54, %42 : vector<2x32xf32>
    %64 = arith.mulf %48, %56 : vector<2x32xf32>
    %65 = arith.addf %63, %64 : vector<2x32xf32>
    %66 = math.tanh %65 : vector<2x32xf32>
    %67 = arith.mulf %62, %66 : vector<2x32xf32>
    %68 = arith.index_cast %c0_i32 : i32 to index
    %c0_12 = arith.constant 0 : index
    %c0_13 = arith.constant 0 : index
    %69 = vector.load %arg3[%68, %c0_12, %c0_13] : memref<8x2x32xf32, #tpu.memory_space<vmem>>, vector<1x2x32xf32>
    %70 = vector.shape_cast %69 : vector<1x2x32xf32> to vector<2x32xf32>
    %71 = vector.shape_cast %41 : vector<2x32xf32> to vector<1x2x32xf32>
    tpu.vector_store %arg3[%68, %c0_12, %c0_13], %71 {strides = array<i32>} : memref<8x2x32xf32, #tpu.memory_space<vmem>>, vector<1x2x32xf32>,
    %c7_i32_14 = arith.constant 7 : i32
    %72 = arith.subi %c7_i32_14, %c0_i32 : i32
    %73 = arith.index_cast %72 : i32 to index
    %c0_15 = arith.constant 0 : index
    %c0_16 = arith.constant 0 : index
    %74 = vector.load %arg4[%73, %c0_15, %c0_16] : memref<8x2x32xf32, #tpu.memory_space<vmem>>, vector<1x2x32xf32>
    %75 = vector.shape_cast %74 : vector<1x2x32xf32> to vector<2x32xf32>
    %76 = vector.shape_cast %67 : vector<2x32xf32> to vector<1x2x32xf32>
    tpu.vector_store %arg4[%73, %c0_15, %c0_16], %76 {strides = array<i32>} : memref<8x2x32xf32, #tpu.memory_space<vmem>>, vector<1x2x32xf32>,
    %77 = tpu.concatenate %41, %67 in 1 : vector<2x32xf32>, vector<2x32xf32> -> vector<2x64xf32>
    %78 = tpu.concatenate %39, %65 in 1 : vector<2x32xf32>, vector<2x32xf32> -> vector<2x64xf32>
    %c1_i32 = arith.constant 1 : i32
    %cst_17 = arith.constant dense<0.000000e+00> : vector<2x256xf32>
    %79 = tpu.matmul %77, %0, %cst_17 {dimension_numbers = #tpu.dot_dimension_numbers<[1], [0], [0], [1], [0, 0, 1, 1], [], []>} : vector<2x64xf32>, vector<64x256xf32>, vector<2x256xf32> -> vector<2x256xf32>
    %80 = arith.index_cast %c1_i32 : i32 to index
    %c0_18 = arith.constant 0 : index
    %c0_19 = arith.constant 0 : index
    %81 = vector.load %arg0[%80, %c0_18, %c0_19] : memref<8x2x256xf32, #tpu.memory_space<vmem>>, vector<1x2x256xf32>
    %82 = vector.shape_cast %81 : vector<1x2x256xf32> to vector<2x256xf32>
    %83 = vector.extract_strided_slice %82 {offsets = [0, 0], sizes = [2, 128], strides = [1, 1]} : vector<2x256xf32> to vector<2x128xf32>
    %84 = vector.extract_strided_slice %79 {offsets = [0, 0], sizes = [2, 128], strides = [1, 1]} : vector<2x256xf32> to vector<2x128xf32>
    %85 = arith.addf %83, %84 : vector<2x128xf32>
    %c7_i32_20 = arith.constant 7 : i32
    %86 = arith.subi %c7_i32_20, %c1_i32 : i32
    %87 = arith.index_cast %86 : i32 to index
    %c0_21 = arith.constant 0 : index
    %c0_22 = arith.constant 0 : index
    %88 = vector.load %arg0[%87, %c0_21, %c0_22] : memref<8x2x256xf32, #tpu.memory_space<vmem>>, vector<1x2x256xf32>
    %89 = vector.shape_cast %88 : vector<1x2x256xf32> to vector<2x256xf32>
    %90 = vector.extract_strided_slice %89 {offsets = [0, 128], sizes = [2, 128], strides = [1, 1]} : vector<2x256xf32> to vector<2x128xf32>
    %91 = vector.extract_strided_slice %79 {offsets = [0, 128], sizes = [2, 128], strides = [1, 1]} : vector<2x256xf32> to vector<2x128xf32>
    %92 = arith.addf %90, %91 : vector<2x128xf32>
    %93 = vector.extract_strided_slice %78 {offsets = [0, 0], sizes = [2, 32], strides = [1, 1]} : vector<2x64xf32> to vector<2x32xf32>
    %94 = vector.extract_strided_slice %85 {offsets = [0, 0], sizes = [2, 32], strides = [1, 1]} : vector<2x128xf32> to vector<2x32xf32>
    %95 = arith.negf %94 : vector<2x32xf32>
    %96 = math.exp %95 : vector<2x32xf32>
    %cst_23 = arith.constant 1.000000e+00 : f32
    %97 = vector.broadcast %cst_23 : f32 to vector<2x32xf32>
    %98 = arith.addf %97, %96 : vector<2x32xf32>
    %99 = arith.divf %97, %98 : vector<2x32xf32>
    %100 = vector.extract_strided_slice %85 {offsets = [0, 32], sizes = [2, 32], strides = [1, 1]} : vector<2x128xf32> to vector<2x32xf32>
    %101 = arith.negf %100 : vector<2x32xf32>
    %102 = math.exp %101 : vector<2x32xf32>
    %cst_24 = arith.constant 1.000000e+00 : f32
    %103 = vector.broadcast %cst_24 : f32 to vector<2x32xf32>
    %104 = arith.addf %103, %102 : vector<2x32xf32>
    %105 = arith.divf %103, %104 : vector<2x32xf32>
    %106 = vector.extract_strided_slice %85 {offsets = [0, 64], sizes = [2, 32], strides = [1, 1]} : vector<2x128xf32> to vector<2x32xf32>
    %107 = math.tanh %106 : vector<2x32xf32>
    %108 = vector.extract_strided_slice %85 {offsets = [0, 96], sizes = [2, 32], strides = [1, 1]} : vector<2x128xf32> to vector<2x32xf32>
    %109 = arith.negf %108 : vector<2x32xf32>
    %110 = math.exp %109 : vector<2x32xf32>
    %cst_25 = arith.constant 1.000000e+00 : f32
    %111 = vector.broadcast %cst_25 : f32 to vector<2x32xf32>
    %112 = arith.addf %111, %110 : vector<2x32xf32>
    %113 = arith.divf %111, %112 : vector<2x32xf32>
    %114 = arith.mulf %105, %93 : vector<2x32xf32>
    %115 = arith.mulf %99, %107 : vector<2x32xf32>
    %116 = arith.addf %114, %115 : vector<2x32xf32>
    %117 = math.tanh %116 : vector<2x32xf32>
    %118 = arith.mulf %113, %117 : vector<2x32xf32>
    %119 = vector.extract_strided_slice %78 {offsets = [0, 32], sizes = [2, 32], strides = [1, 1]} : vector<2x64xf32> to vector<2x32xf32>
    %120 = vector.extract_strided_slice %92 {offsets = [0, 0], sizes = [2, 32], strides = [1, 1]} : vector<2x128xf32> to vector<2x32xf32>
    %121 = arith.negf %120 : vector<2x32xf32>
    %122 = math.exp %121 : vector<2x32xf32>
    %cst_26 = arith.constant 1.000000e+00 : f32
    %123 = vector.broadcast %cst_26 : f32 to vector<2x32xf32>
    %124 = arith.addf %123, %122 : vector<2x32xf32>
    %125 = arith.divf %123, %124 : vector<2x32xf32>
    %126 = vector.extract_strided_slice %92 {offsets = [0, 32], sizes = [2, 32], strides = [1, 1]} : vector<2x128xf32> to vector<2x32xf32>
    %127 = arith.negf %126 : vector<2x32xf32>
    %128 = math.exp %127 : vector<2x32xf32>
    %cst_27 = arith.constant 1.000000e+00 : f32
    %129 = vector.broadcast %cst_27 : f32 to vector<2x32xf32>
    %130 = arith.addf %129, %128 : vector<2x32xf32>
    %131 = arith.divf %129, %130 : vector<2x32xf32>
    %132 = vector.extract_strided_slice %92 {offsets = [0, 64], sizes = [2, 32], strides = [1, 1]} : vector<2x128xf32> to vector<2x32xf32>
    %133 = math.tanh %132 : vector<2x32xf32>
    %134 = vector.extract_strided_slice %92 {offsets = [0, 96], sizes = [2, 32], strides = [1, 1]} : vector<2x128xf32> to vector<2x32xf32>
    %135 = arith.negf %134 : vector<2x32xf32>
    %136 = math.exp %135 : vector<2x32xf32>
    %cst_28 = arith.constant 1.000000e+00 : f32
    %137 = vector.broadcast %cst_28 : f32 to vector<2x32xf32>
    %138 = arith.addf %137, %136 : vector<2x32xf32>
    %139 = arith.divf %137, %138 : vector<2x32xf32>
    %140 = arith.mulf %131, %119 : vector<2x32xf32>
    %141 = arith.mulf %125, %133 : vector<2x32xf32>
    %142 = arith.addf %140, %141 : vector<2x32xf32>
    %143 = math.tanh %142 : vector<2x32xf32>
    %144 = arith.mulf %139, %143 : vector<2x32xf32>
    %145 = arith.index_cast %c1_i32 : i32 to index
    %c0_29 = arith.constant 0 : index
    %c0_30 = arith.constant 0 : index
    %146 = vector.load %arg3[%145, %c0_29, %c0_30] : memref<8x2x32xf32, #tpu.memory_space<vmem>>, vector<1x2x32xf32>
    %147 = vector.shape_cast %146 : vector<1x2x32xf32> to vector<2x32xf32>
    %148 = vector.shape_cast %118 : vector<2x32xf32> to vector<1x2x32xf32>
    tpu.vector_store %arg3[%145, %c0_29, %c0_30], %148 {strides = array<i32>} : memref<8x2x32xf32, #tpu.memory_space<vmem>>, vector<1x2x32xf32>,
    %c7_i32_31 = arith.constant 7 : i32
    %149 = arith.subi %c7_i32_31, %c1_i32 : i32
    %150 = arith.index_cast %149 : i32 to index
    %c0_32 = arith.constant 0 : index
    %c0_33 = arith.constant 0 : index
    %151 = vector.load %arg4[%150, %c0_32, %c0_33] : memref<8x2x32xf32, #tpu.memory_space<vmem>>, vector<1x2x32xf32>
    %152 = vector.shape_cast %151 : vector<1x2x32xf32> to vector<2x32xf32>
    %153 = vector.shape_cast %144 : vector<2x32xf32> to vector<1x2x32xf32>
    tpu.vector_store %arg4[%150, %c0_32, %c0_33], %153 {strides = array<i32>} : memref<8x2x32xf32, #tpu.memory_space<vmem>>, vector<1x2x32xf32>,
    %154 = tpu.concatenate %118, %144 in 1 : vector<2x32xf32>, vector<2x32xf32> -> vector<2x64xf32>
    %155 = tpu.concatenate %116, %142 in 1 : vector<2x32xf32>, vector<2x32xf32> -> vector<2x64xf32>
    %c2_i32 = arith.constant 2 : i32
    %cst_34 = arith.constant dense<0.000000e+00> : vector<2x256xf32>
    %156 = tpu.matmul %154, %0, %cst_34 {dimension_numbers = #tpu.dot_dimension_numbers<[1], [0], [0], [1], [0, 0, 1, 1], [], []>} : vector<2x64xf32>, vector<64x256xf32>, vector<2x256xf32> -> vector<2x256xf32>
    %157 = arith.index_cast %c2_i32 : i32 to index
    %c0_35 = arith.constant 0 : index
    %c0_36 = arith.constant 0 : index
    %158 = vector.load %arg0[%157, %c0_35, %c0_36] : memref<8x2x256xf32, #tpu.memory_space<vmem>>, vector<1x2x256xf32>
    %159 = vector.shape_cast %158 : vector<1x2x256xf32> to vector<2x256xf32>
    %160 = vector.extract_strided_slice %159 {offsets = [0, 0], sizes = [2, 128], strides = [1, 1]} : vector<2x256xf32> to vector<2x128xf32>
    %161 = vector.extract_strided_slice %156 {offsets = [0, 0], sizes = [2, 128], strides = [1, 1]} : vector<2x256xf32> to vector<2x128xf32>
    %162 = arith.addf %160, %161 : vector<2x128xf32>
    %c7_i32_37 = arith.constant 7 : i32
    %163 = arith.subi %c7_i32_37, %c2_i32 : i32
    %164 = arith.index_cast %163 : i32 to index
    %c0_38 = arith.constant 0 : index
    %c0_39 = arith.constant 0 : index
    %165 = vector.load %arg0[%164, %c0_38, %c0_39] : memref<8x2x256xf32, #tpu.memory_space<vmem>>, vector<1x2x256xf32>
    %166 = vector.shape_cast %165 : vector<1x2x256xf32> to vector<2x256xf32>
    %167 = vector.extract_strided_slice %166 {offsets = [0, 128], sizes = [2, 128], strides = [1, 1]} : vector<2x256xf32> to vector<2x128xf32>
    %168 = vector.extract_strided_slice %156 {offsets = [0, 128], sizes = [2, 128], strides = [1, 1]} : vector<2x256xf32> to vector<2x128xf32>
    %169 = arith.addf %167, %168 : vector<2x128xf32>
    %170 = vector.extract_strided_slice %155 {offsets = [0, 0], sizes = [2, 32], strides = [1, 1]} : vector<2x64xf32> to vector<2x32xf32>
    %171 = vector.extract_strided_slice %162 {offsets = [0, 0], sizes = [2, 32], strides = [1, 1]} : vector<2x128xf32> to vector<2x32xf32>
    %172 = arith.negf %171 : vector<2x32xf32>
    %173 = math.exp %172 : vector<2x32xf32>
    %cst_40 = arith.constant 1.000000e+00 : f32
    %174 = vector.broadcast %cst_40 : f32 to vector<2x32xf32>
    %175 = arith.addf %174, %173 : vector<2x32xf32>
    %176 = arith.divf %174, %175 : vector<2x32xf32>
    %177 = vector.extract_strided_slice %162 {offsets = [0, 32], sizes = [2, 32], strides = [1, 1]} : vector<2x128xf32> to vector<2x32xf32>
    %178 = arith.negf %177 : vector<2x32xf32>
    %179 = math.exp %178 : vector<2x32xf32>
    %cst_41 = arith.constant 1.000000e+00 : f32
    %180 = vector.broadcast %cst_41 : f32 to vector<2x32xf32>
    %181 = arith.addf %180, %179 : vector<2x32xf32>
    %182 = arith.divf %180, %181 : vector<2x32xf32>
    %183 = vector.extract_strided_slice %162 {offsets = [0, 64], sizes = [2, 32], strides = [1, 1]} : vector<2x128xf32> to vector<2x32xf32>
    %184 = math.tanh %183 : vector<2x32xf32>
    %185 = vector.extract_strided_slice %162 {offsets = [0, 96], sizes = [2, 32], strides = [1, 1]} : vector<2x128xf32> to vector<2x32xf32>
    %186 = arith.negf %185 : vector<2x32xf32>
    %187 = math.exp %186 : vector<2x32xf32>
    %cst_42 = arith.constant 1.000000e+00 : f32
    %188 = vector.broadcast %cst_42 : f32 to vector<2x32xf32>
    %189 = arith.addf %188, %187 : vector<2x32xf32>
    %190 = arith.divf %188, %189 : vector<2x32xf32>
    %191 = arith.mulf %182, %170 : vector<2x32xf32>
    %192 = arith.mulf %176, %184 : vector<2x32xf32>
    %193 = arith.addf %191, %192 : vector<2x32xf32>
    %194 = math.tanh %193 : vector<2x32xf32>
    %195 = arith.mulf %190, %194 : vector<2x32xf32>
    %196 = vector.extract_strided_slice %155 {offsets = [0, 32], sizes = [2, 32], strides = [1, 1]} : vector<2x64xf32> to vector<2x32xf32>
    %197 = vector.extract_strided_slice %169 {offsets = [0, 0], sizes = [2, 32], strides = [1, 1]} : vector<2x128xf32> to vector<2x32xf32>
    %198 = arith.negf %197 : vector<2x32xf32>
    %199 = math.exp %198 : vector<2x32xf32>
    %cst_43 = arith.constant 1.000000e+00 : f32
    %200 = vector.broadcast %cst_43 : f32 to vector<2x32xf32>
    %201 = arith.addf %200, %199 : vector<2x32xf32>
    %202 = arith.divf %200, %201 : vector<2x32xf32>
    %203 = vector.extract_strided_slice %169 {offsets = [0, 32], sizes = [2, 32], strides = [1, 1]} : vector<2x128xf32> to vector<2x32xf32>
    %204 = arith.negf %203 : vector<2x32xf32>
    %205 = math.exp %204 : vector<2x32xf32>
    %cst_44 = arith.constant 1.000000e+00 : f32
    %206 = vector.broadcast %cst_44 : f32 to vector<2x32xf32>
    %207 = arith.addf %206, %205 : vector<2x32xf32>
    %208 = arith.divf %206, %207 : vector<2x32xf32>
    %209 = vector.extract_strided_slice %169 {offsets = [0, 64], sizes = [2, 32], strides = [1, 1]} : vector<2x128xf32> to vector<2x32xf32>
    %210 = math.tanh %209 : vector<2x32xf32>
    %211 = vector.extract_strided_slice %169 {offsets = [0, 96], sizes = [2, 32], strides = [1, 1]} : vector<2x128xf32> to vector<2x32xf32>
    %212 = arith.negf %211 : vector<2x32xf32>
    %213 = math.exp %212 : vector<2x32xf32>
    %cst_45 = arith.constant 1.000000e+00 : f32
    %214 = vector.broadcast %cst_45 : f32 to vector<2x32xf32>
    %215 = arith.addf %214, %213 : vector<2x32xf32>
    %216 = arith.divf %214, %215 : vector<2x32xf32>
    %217 = arith.mulf %208, %196 : vector<2x32xf32>
    %218 = arith.mulf %202, %210 : vector<2x32xf32>
    %219 = arith.addf %217, %218 : vector<2x32xf32>
    %220 = math.tanh %219 : vector<2x32xf32>
    %221 = arith.mulf %216, %220 : vector<2x32xf32>
    %222 = arith.index_cast %c2_i32 : i32 to index
    %c0_46 = arith.constant 0 : index
    %c0_47 = arith.constant 0 : index
    %223 = vector.load %arg3[%222, %c0_46, %c0_47] : memref<8x2x32xf32, #tpu.memory_space<vmem>>, vector<1x2x32xf32>
    %224 = vector.shape_cast %223 : vector<1x2x32xf32> to vector<2x32xf32>
    %225 = vector.shape_cast %195 : vector<2x32xf32> to vector<1x2x32xf32>
    tpu.vector_store %arg3[%222, %c0_46, %c0_47], %225 {strides = array<i32>} : memref<8x2x32xf32, #tpu.memory_space<vmem>>, vector<1x2x32xf32>,
    %c7_i32_48 = arith.constant 7 : i32
    %226 = arith.subi %c7_i32_48, %c2_i32 : i32
    %227 = arith.index_cast %226 : i32 to index
    %c0_49 = arith.constant 0 : index
    %c0_50 = arith.constant 0 : index
    %228 = vector.load %arg4[%227, %c0_49, %c0_50] : memref<8x2x32xf32, #tpu.memory_space<vmem>>, vector<1x2x32xf32>
    %229 = vector.shape_cast %228 : vector<1x2x32xf32> to vector<2x32xf32>
    %230 = vector.shape_cast %221 : vector<2x32xf32> to vector<1x2x32xf32>
    tpu.vector_store %arg4[%227, %c0_49, %c0_50], %230 {strides = array<i32>} : memref<8x2x32xf32, #tpu.memory_space<vmem>>, vector<1x2x32xf32>,
    %231 = tpu.concatenate %195, %221 in 1 : vector<2x32xf32>, vector<2x32xf32> -> vector<2x64xf32>
    %232 = tpu.concatenate %193, %219 in 1 : vector<2x32xf32>, vector<2x32xf32> -> vector<2x64xf32>
    %c3_i32 = arith.constant 3 : i32
    %cst_51 = arith.constant dense<0.000000e+00> : vector<2x256xf32>
    %233 = tpu.matmul %231, %0, %cst_51 {dimension_numbers = #tpu.dot_dimension_numbers<[1], [0], [0], [1], [0, 0, 1, 1], [], []>} : vector<2x64xf32>, vector<64x256xf32>, vector<2x256xf32> -> vector<2x256xf32>
    %234 = arith.index_cast %c3_i32 : i32 to index
    %c0_52 = arith.constant 0 : index
    %c0_53 = arith.constant 0 : index
    %235 = vector.load %arg0[%234, %c0_52, %c0_53] : memref<8x2x256xf32, #tpu.memory_space<vmem>>, vector<1x2x256xf32>
    %236 = vector.shape_cast %235 : vector<1x2x256xf32> to vector<2x256xf32>
    %237 = vector.extract_strided_slice %236 {offsets = [0, 0], sizes = [2, 128], strides = [1, 1]} : vector<2x256xf32> to vector<2x128xf32>
    %238 = vector.extract_strided_slice %233 {offsets = [0, 0], sizes = [2, 128], strides = [1, 1]} : vector<2x256xf32> to vector<2x128xf32>
    %239 = arith.addf %237, %238 : vector<2x128xf32>
    %c7_i32_54 = arith.constant 7 : i32
    %240 = arith.subi %c7_i32_54, %c3_i32 : i32
    %241 = arith.index_cast %240 : i32 to index
    %c0_55 = arith.constant 0 : index
    %c0_56 = arith.constant 0 : index
    %242 = vector.load %arg0[%241, %c0_55, %c0_56] : memref<8x2x256xf32, #tpu.memory_space<vmem>>, vector<1x2x256xf32>
    %243 = vector.shape_cast %242 : vector<1x2x256xf32> to vector<2x256xf32>
    %244 = vector.extract_strided_slice %243 {offsets = [0, 128], sizes = [2, 128], strides = [1, 1]} : vector<2x256xf32> to vector<2x128xf32>
    %245 = vector.extract_strided_slice %233 {offsets = [0, 128], sizes = [2, 128], strides = [1, 1]} : vector<2x256xf32> to vector<2x128xf32>
    %246 = arith.addf %244, %245 : vector<2x128xf32>
    %247 = vector.extract_strided_slice %232 {offsets = [0, 0], sizes = [2, 32], strides = [1, 1]} : vector<2x64xf32> to vector<2x32xf32>
    %248 = vector.extract_strided_slice %239 {offsets = [0, 0], sizes = [2, 32], strides = [1, 1]} : vector<2x128xf32> to vector<2x32xf32>
    %249 = arith.negf %248 : vector<2x32xf32>
    %250 = math.exp %249 : vector<2x32xf32>
    %cst_57 = arith.constant 1.000000e+00 : f32
    %251 = vector.broadcast %cst_57 : f32 to vector<2x32xf32>
    %252 = arith.addf %251, %250 : vector<2x32xf32>
    %253 = arith.divf %251, %252 : vector<2x32xf32>
    %254 = vector.extract_strided_slice %239 {offsets = [0, 32], sizes = [2, 32], strides = [1, 1]} : vector<2x128xf32> to vector<2x32xf32>
    %255 = arith.negf %254 : vector<2x32xf32>
    %256 = math.exp %255 : vector<2x32xf32>
    %cst_58 = arith.constant 1.000000e+00 : f32
    %257 = vector.broadcast %cst_58 : f32 to vector<2x32xf32>
    %258 = arith.addf %257, %256 : vector<2x32xf32>
    %259 = arith.divf %257, %258 : vector<2x32xf32>
    %260 = vector.extract_strided_slice %239 {offsets = [0, 64], sizes = [2, 32], strides = [1, 1]} : vector<2x128xf32> to vector<2x32xf32>
    %261 = math.tanh %260 : vector<2x32xf32>
    %262 = vector.extract_strided_slice %239 {offsets = [0, 96], sizes = [2, 32], strides = [1, 1]} : vector<2x128xf32> to vector<2x32xf32>
    %263 = arith.negf %262 : vector<2x32xf32>
    %264 = math.exp %263 : vector<2x32xf32>
    %cst_59 = arith.constant 1.000000e+00 : f32
    %265 = vector.broadcast %cst_59 : f32 to vector<2x32xf32>
    %266 = arith.addf %265, %264 : vector<2x32xf32>
    %267 = arith.divf %265, %266 : vector<2x32xf32>
    %268 = arith.mulf %259, %247 : vector<2x32xf32>
    %269 = arith.mulf %253, %261 : vector<2x32xf32>
    %270 = arith.addf %268, %269 : vector<2x32xf32>
    %271 = math.tanh %270 : vector<2x32xf32>
    %272 = arith.mulf %267, %271 : vector<2x32xf32>
    %273 = vector.extract_strided_slice %232 {offsets = [0, 32], sizes = [2, 32], strides = [1, 1]} : vector<2x64xf32> to vector<2x32xf32>
    %274 = vector.extract_strided_slice %246 {offsets = [0, 0], sizes = [2, 32], strides = [1, 1]} : vector<2x128xf32> to vector<2x32xf32>
    %275 = arith.negf %274 : vector<2x32xf32>
    %276 = math.exp %275 : vector<2x32xf32>
    %cst_60 = arith.constant 1.000000e+00 : f32
    %277 = vector.broadcast %cst_60 : f32 to vector<2x32xf32>
    %278 = arith.addf %277, %276 : vector<2x32xf32>
    %279 = arith.divf %277, %278 : vector<2x32xf32>
    %280 = vector.extract_strided_slice %246 {offsets = [0, 32], sizes = [2, 32], strides = [1, 1]} : vector<2x128xf32> to vector<2x32xf32>
    %281 = arith.negf %280 : vector<2x32xf32>
    %282 = math.exp %281 : vector<2x32xf32>
    %cst_61 = arith.constant 1.000000e+00 : f32
    %283 = vector.broadcast %cst_61 : f32 to vector<2x32xf32>
    %284 = arith.addf %283, %282 : vector<2x32xf32>
    %285 = arith.divf %283, %284 : vector<2x32xf32>
    %286 = vector.extract_strided_slice %246 {offsets = [0, 64], sizes = [2, 32], strides = [1, 1]} : vector<2x128xf32> to vector<2x32xf32>
    %287 = math.tanh %286 : vector<2x32xf32>
    %288 = vector.extract_strided_slice %246 {offsets = [0, 96], sizes = [2, 32], strides = [1, 1]} : vector<2x128xf32> to vector<2x32xf32>
    %289 = arith.negf %288 : vector<2x32xf32>
    %290 = math.exp %289 : vector<2x32xf32>
    %cst_62 = arith.constant 1.000000e+00 : f32
    %291 = vector.broadcast %cst_62 : f32 to vector<2x32xf32>
    %292 = arith.addf %291, %290 : vector<2x32xf32>
    %293 = arith.divf %291, %292 : vector<2x32xf32>
    %294 = arith.mulf %285, %273 : vector<2x32xf32>
    %295 = arith.mulf %279, %287 : vector<2x32xf32>
    %296 = arith.addf %294, %295 : vector<2x32xf32>
    %297 = math.tanh %296 : vector<2x32xf32>
    %298 = arith.mulf %293, %297 : vector<2x32xf32>
    %299 = arith.index_cast %c3_i32 : i32 to index
    %c0_63 = arith.constant 0 : index
    %c0_64 = arith.constant 0 : index
    %300 = vector.load %arg3[%299, %c0_63, %c0_64] : memref<8x2x32xf32, #tpu.memory_space<vmem>>, vector<1x2x32xf32>
    %301 = vector.shape_cast %300 : vector<1x2x32xf32> to vector<2x32xf32>
    %302 = vector.shape_cast %272 : vector<2x32xf32> to vector<1x2x32xf32>
    tpu.vector_store %arg3[%299, %c0_63, %c0_64], %302 {strides = array<i32>} : memref<8x2x32xf32, #tpu.memory_space<vmem>>, vector<1x2x32xf32>,
    %c7_i32_65 = arith.constant 7 : i32
    %303 = arith.subi %c7_i32_65, %c3_i32 : i32
    %304 = arith.index_cast %303 : i32 to index
    %c0_66 = arith.constant 0 : index
    %c0_67 = arith.constant 0 : index
    %305 = vector.load %arg4[%304, %c0_66, %c0_67] : memref<8x2x32xf32, #tpu.memory_space<vmem>>, vector<1x2x32xf32>
    %306 = vector.shape_cast %305 : vector<1x2x32xf32> to vector<2x32xf32>
    %307 = vector.shape_cast %298 : vector<2x32xf32> to vector<1x2x32xf32>
    tpu.vector_store %arg4[%304, %c0_66, %c0_67], %307 {strides = array<i32>} : memref<8x2x32xf32, #tpu.memory_space<vmem>>, vector<1x2x32xf32>,
    %308 = tpu.concatenate %272, %298 in 1 : vector<2x32xf32>, vector<2x32xf32> -> vector<2x64xf32>
    %309 = tpu.concatenate %270, %296 in 1 : vector<2x32xf32>, vector<2x32xf32> -> vector<2x64xf32>
    %c4_i32 = arith.constant 4 : i32
    %cst_68 = arith.constant dense<0.000000e+00> : vector<2x256xf32>
    %310 = tpu.matmul %308, %0, %cst_68 {dimension_numbers = #tpu.dot_dimension_numbers<[1], [0], [0], [1], [0, 0, 1, 1], [], []>} : vector<2x64xf32>, vector<64x256xf32>, vector<2x256xf32> -> vector<2x256xf32>
    %311 = arith.index_cast %c4_i32 : i32 to index
    %c0_69 = arith.constant 0 : index
    %c0_70 = arith.constant 0 : index
    %312 = vector.load %arg0[%311, %c0_69, %c0_70] : memref<8x2x256xf32, #tpu.memory_space<vmem>>, vector<1x2x256xf32>
    %313 = vector.shape_cast %312 : vector<1x2x256xf32> to vector<2x256xf32>
    %314 = vector.extract_strided_slice %313 {offsets = [0, 0], sizes = [2, 128], strides = [1, 1]} : vector<2x256xf32> to vector<2x128xf32>
    %315 = vector.extract_strided_slice %310 {offsets = [0, 0], sizes = [2, 128], strides = [1, 1]} : vector<2x256xf32> to vector<2x128xf32>
    %316 = arith.addf %314, %315 : vector<2x128xf32>
    %c7_i32_71 = arith.constant 7 : i32
    %317 = arith.subi %c7_i32_71, %c4_i32 : i32
    %318 = arith.index_cast %317 : i32 to index
    %c0_72 = arith.constant 0 : index
    %c0_73 = arith.constant 0 : index
    %319 = vector.load %arg0[%318, %c0_72, %c0_73] : memref<8x2x256xf32, #tpu.memory_space<vmem>>, vector<1x2x256xf32>
    %320 = vector.shape_cast %319 : vector<1x2x256xf32> to vector<2x256xf32>
    %321 = vector.extract_strided_slice %320 {offsets = [0, 128], sizes = [2, 128], strides = [1, 1]} : vector<2x256xf32> to vector<2x128xf32>
    %322 = vector.extract_strided_slice %310 {offsets = [0, 128], sizes = [2, 128], strides = [1, 1]} : vector<2x256xf32> to vector<2x128xf32>
    %323 = arith.addf %321, %322 : vector<2x128xf32>
    %324 = vector.extract_strided_slice %309 {offsets = [0, 0], sizes = [2, 32], strides = [1, 1]} : vector<2x64xf32> to vector<2x32xf32>
    %325 = vector.extract_strided_slice %316 {offsets = [0, 0], sizes = [2, 32], strides = [1, 1]} : vector<2x128xf32> to vector<2x32xf32>
    %326 = arith.negf %325 : vector<2x32xf32>
    %327 = math.exp %326 : vector<2x32xf32>
    %cst_74 = arith.constant 1.000000e+00 : f32
    %328 = vector.broadcast %cst_74 : f32 to vector<2x32xf32>
    %329 = arith.addf %328, %327 : vector<2x32xf32>
    %330 = arith.divf %328, %329 : vector<2x32xf32>
    %331 = vector.extract_strided_slice %316 {offsets = [0, 32], sizes = [2, 32], strides = [1, 1]} : vector<2x128xf32> to vector<2x32xf32>
    %332 = arith.negf %331 : vector<2x32xf32>
    %333 = math.exp %332 : vector<2x32xf32>
    %cst_75 = arith.constant 1.000000e+00 : f32
    %334 = vector.broadcast %cst_75 : f32 to vector<2x32xf32>
    %335 = arith.addf %334, %333 : vector<2x32xf32>
    %336 = arith.divf %334, %335 : vector<2x32xf32>
    %337 = vector.extract_strided_slice %316 {offsets = [0, 64], sizes = [2, 32], strides = [1, 1]} : vector<2x128xf32> to vector<2x32xf32>
    %338 = math.tanh %337 : vector<2x32xf32>
    %339 = vector.extract_strided_slice %316 {offsets = [0, 96], sizes = [2, 32], strides = [1, 1]} : vector<2x128xf32> to vector<2x32xf32>
    %340 = arith.negf %339 : vector<2x32xf32>
    %341 = math.exp %340 : vector<2x32xf32>
    %cst_76 = arith.constant 1.000000e+00 : f32
    %342 = vector.broadcast %cst_76 : f32 to vector<2x32xf32>
    %343 = arith.addf %342, %341 : vector<2x32xf32>
    %344 = arith.divf %342, %343 : vector<2x32xf32>
    %345 = arith.mulf %336, %324 : vector<2x32xf32>
    %346 = arith.mulf %330, %338 : vector<2x32xf32>
    %347 = arith.addf %345, %346 : vector<2x32xf32>
    %348 = math.tanh %347 : vector<2x32xf32>
    %349 = arith.mulf %344, %348 : vector<2x32xf32>
    %350 = vector.extract_strided_slice %309 {offsets = [0, 32], sizes = [2, 32], strides = [1, 1]} : vector<2x64xf32> to vector<2x32xf32>
    %351 = vector.extract_strided_slice %323 {offsets = [0, 0], sizes = [2, 32], strides = [1, 1]} : vector<2x128xf32> to vector<2x32xf32>
    %352 = arith.negf %351 : vector<2x32xf32>
    %353 = math.exp %352 : vector<2x32xf32>
    %cst_77 = arith.constant 1.000000e+00 : f32
    %354 = vector.broadcast %cst_77 : f32 to vector<2x32xf32>
    %355 = arith.addf %354, %353 : vector<2x32xf32>
    %356 = arith.divf %354, %355 : vector<2x32xf32>
    %357 = vector.extract_strided_slice %323 {offsets = [0, 32], sizes = [2, 32], strides = [1, 1]} : vector<2x128xf32> to vector<2x32xf32>
    %358 = arith.negf %357 : vector<2x32xf32>
    %359 = math.exp %358 : vector<2x32xf32>
    %cst_78 = arith.constant 1.000000e+00 : f32
    %360 = vector.broadcast %cst_78 : f32 to vector<2x32xf32>
    %361 = arith.addf %360, %359 : vector<2x32xf32>
    %362 = arith.divf %360, %361 : vector<2x32xf32>
    %363 = vector.extract_strided_slice %323 {offsets = [0, 64], sizes = [2, 32], strides = [1, 1]} : vector<2x128xf32> to vector<2x32xf32>
    %364 = math.tanh %363 : vector<2x32xf32>
    %365 = vector.extract_strided_slice %323 {offsets = [0, 96], sizes = [2, 32], strides = [1, 1]} : vector<2x128xf32> to vector<2x32xf32>
    %366 = arith.negf %365 : vector<2x32xf32>
    %367 = math.exp %366 : vector<2x32xf32>
    %cst_79 = arith.constant 1.000000e+00 : f32
    %368 = vector.broadcast %cst_79 : f32 to vector<2x32xf32>
    %369 = arith.addf %368, %367 : vector<2x32xf32>
    %370 = arith.divf %368, %369 : vector<2x32xf32>
    %371 = arith.mulf %362, %350 : vector<2x32xf32>
    %372 = arith.mulf %356, %364 : vector<2x32xf32>
    %373 = arith.addf %371, %372 : vector<2x32xf32>
    %374 = math.tanh %373 : vector<2x32xf32>
    %375 = arith.mulf %370, %374 : vector<2x32xf32>
    %376 = arith.index_cast %c4_i32 : i32 to index
    %c0_80 = arith.constant 0 : index
    %c0_81 = arith.constant 0 : index
    %377 = vector.load %arg3[%376, %c0_80, %c0_81] : memref<8x2x32xf32, #tpu.memory_space<vmem>>, vector<1x2x32xf32>
    %378 = vector.shape_cast %377 : vector<1x2x32xf32> to vector<2x32xf32>
    %379 = vector.shape_cast %349 : vector<2x32xf32> to vector<1x2x32xf32>
    tpu.vector_store %arg3[%376, %c0_80, %c0_81], %379 {strides = array<i32>} : memref<8x2x32xf32, #tpu.memory_space<vmem>>, vector<1x2x32xf32>,
    %c7_i32_82 = arith.constant 7 : i32
    %380 = arith.subi %c7_i32_82, %c4_i32 : i32
    %381 = arith.index_cast %380 : i32 to index
    %c0_83 = arith.constant 0 : index
    %c0_84 = arith.constant 0 : index
    %382 = vector.load %arg4[%381, %c0_83, %c0_84] : memref<8x2x32xf32, #tpu.memory_space<vmem>>, vector<1x2x32xf32>
    %383 = vector.shape_cast %382 : vector<1x2x32xf32> to vector<2x32xf32>
    %384 = vector.shape_cast %375 : vector<2x32xf32> to vector<1x2x32xf32>
    tpu.vector_store %arg4[%381, %c0_83, %c0_84], %384 {strides = array<i32>} : memref<8x2x32xf32, #tpu.memory_space<vmem>>, vector<1x2x32xf32>,
    %385 = tpu.concatenate %349, %375 in 1 : vector<2x32xf32>, vector<2x32xf32> -> vector<2x64xf32>
    %386 = tpu.concatenate %347, %373 in 1 : vector<2x32xf32>, vector<2x32xf32> -> vector<2x64xf32>
    %c5_i32 = arith.constant 5 : i32
    %cst_85 = arith.constant dense<0.000000e+00> : vector<2x256xf32>
    %387 = tpu.matmul %385, %0, %cst_85 {dimension_numbers = #tpu.dot_dimension_numbers<[1], [0], [0], [1], [0, 0, 1, 1], [], []>} : vector<2x64xf32>, vector<64x256xf32>, vector<2x256xf32> -> vector<2x256xf32>
    %388 = arith.index_cast %c5_i32 : i32 to index
    %c0_86 = arith.constant 0 : index
    %c0_87 = arith.constant 0 : index
    %389 = vector.load %arg0[%388, %c0_86, %c0_87] : memref<8x2x256xf32, #tpu.memory_space<vmem>>, vector<1x2x256xf32>
    %390 = vector.shape_cast %389 : vector<1x2x256xf32> to vector<2x256xf32>
    %391 = vector.extract_strided_slice %390 {offsets = [0, 0], sizes = [2, 128], strides = [1, 1]} : vector<2x256xf32> to vector<2x128xf32>
    %392 = vector.extract_strided_slice %387 {offsets = [0, 0], sizes = [2, 128], strides = [1, 1]} : vector<2x256xf32> to vector<2x128xf32>
    %393 = arith.addf %391, %392 : vector<2x128xf32>
    %c7_i32_88 = arith.constant 7 : i32
    %394 = arith.subi %c7_i32_88, %c5_i32 : i32
    %395 = arith.index_cast %394 : i32 to index
    %c0_89 = arith.constant 0 : index
    %c0_90 = arith.constant 0 : index
    %396 = vector.load %arg0[%395, %c0_89, %c0_90] : memref<8x2x256xf32, #tpu.memory_space<vmem>>, vector<1x2x256xf32>
    %397 = vector.shape_cast %396 : vector<1x2x256xf32> to vector<2x256xf32>
    %398 = vector.extract_strided_slice %397 {offsets = [0, 128], sizes = [2, 128], strides = [1, 1]} : vector<2x256xf32> to vector<2x128xf32>
    %399 = vector.extract_strided_slice %387 {offsets = [0, 128], sizes = [2, 128], strides = [1, 1]} : vector<2x256xf32> to vector<2x128xf32>
    %400 = arith.addf %398, %399 : vector<2x128xf32>
    %401 = vector.extract_strided_slice %386 {offsets = [0, 0], sizes = [2, 32], strides = [1, 1]} : vector<2x64xf32> to vector<2x32xf32>
    %402 = vector.extract_strided_slice %393 {offsets = [0, 0], sizes = [2, 32], strides = [1, 1]} : vector<2x128xf32> to vector<2x32xf32>
    %403 = arith.negf %402 : vector<2x32xf32>
    %404 = math.exp %403 : vector<2x32xf32>
    %cst_91 = arith.constant 1.000000e+00 : f32
    %405 = vector.broadcast %cst_91 : f32 to vector<2x32xf32>
    %406 = arith.addf %405, %404 : vector<2x32xf32>
    %407 = arith.divf %405, %406 : vector<2x32xf32>
    %408 = vector.extract_strided_slice %393 {offsets = [0, 32], sizes = [2, 32], strides = [1, 1]} : vector<2x128xf32> to vector<2x32xf32>
    %409 = arith.negf %408 : vector<2x32xf32>
    %410 = math.exp %409 : vector<2x32xf32>
    %cst_92 = arith.constant 1.000000e+00 : f32
    %411 = vector.broadcast %cst_92 : f32 to vector<2x32xf32>
    %412 = arith.addf %411, %410 : vector<2x32xf32>
    %413 = arith.divf %411, %412 : vector<2x32xf32>
    %414 = vector.extract_strided_slice %393 {offsets = [0, 64], sizes = [2, 32], strides = [1, 1]} : vector<2x128xf32> to vector<2x32xf32>
    %415 = math.tanh %414 : vector<2x32xf32>
    %416 = vector.extract_strided_slice %393 {offsets = [0, 96], sizes = [2, 32], strides = [1, 1]} : vector<2x128xf32> to vector<2x32xf32>
    %417 = arith.negf %416 : vector<2x32xf32>
    %418 = math.exp %417 : vector<2x32xf32>
    %cst_93 = arith.constant 1.000000e+00 : f32
    %419 = vector.broadcast %cst_93 : f32 to vector<2x32xf32>
    %420 = arith.addf %419, %418 : vector<2x32xf32>
    %421 = arith.divf %419, %420 : vector<2x32xf32>
    %422 = arith.mulf %413, %401 : vector<2x32xf32>
    %423 = arith.mulf %407, %415 : vector<2x32xf32>
    %424 = arith.addf %422, %423 : vector<2x32xf32>
    %425 = math.tanh %424 : vector<2x32xf32>
    %426 = arith.mulf %421, %425 : vector<2x32xf32>
    %427 = vector.extract_strided_slice %386 {offsets = [0, 32], sizes = [2, 32], strides = [1, 1]} : vector<2x64xf32> to vector<2x32xf32>
    %428 = vector.extract_strided_slice %400 {offsets = [0, 0], sizes = [2, 32], strides = [1, 1]} : vector<2x128xf32> to vector<2x32xf32>
    %429 = arith.negf %428 : vector<2x32xf32>
    %430 = math.exp %429 : vector<2x32xf32>
    %cst_94 = arith.constant 1.000000e+00 : f32
    %431 = vector.broadcast %cst_94 : f32 to vector<2x32xf32>
    %432 = arith.addf %431, %430 : vector<2x32xf32>
    %433 = arith.divf %431, %432 : vector<2x32xf32>
    %434 = vector.extract_strided_slice %400 {offsets = [0, 32], sizes = [2, 32], strides = [1, 1]} : vector<2x128xf32> to vector<2x32xf32>
    %435 = arith.negf %434 : vector<2x32xf32>
    %436 = math.exp %435 : vector<2x32xf32>
    %cst_95 = arith.constant 1.000000e+00 : f32
    %437 = vector.broadcast %cst_95 : f32 to vector<2x32xf32>
    %438 = arith.addf %437, %436 : vector<2x32xf32>
    %439 = arith.divf %437, %438 : vector<2x32xf32>
    %440 = vector.extract_strided_slice %400 {offsets = [0, 64], sizes = [2, 32], strides = [1, 1]} : vector<2x128xf32> to vector<2x32xf32>
    %441 = math.tanh %440 : vector<2x32xf32>
    %442 = vector.extract_strided_slice %400 {offsets = [0, 96], sizes = [2, 32], strides = [1, 1]} : vector<2x128xf32> to vector<2x32xf32>
    %443 = arith.negf %442 : vector<2x32xf32>
    %444 = math.exp %443 : vector<2x32xf32>
    %cst_96 = arith.constant 1.000000e+00 : f32
    %445 = vector.broadcast %cst_96 : f32 to vector<2x32xf32>
    %446 = arith.addf %445, %444 : vector<2x32xf32>
    %447 = arith.divf %445, %446 : vector<2x32xf32>
    %448 = arith.mulf %439, %427 : vector<2x32xf32>
    %449 = arith.mulf %433, %441 : vector<2x32xf32>
    %450 = arith.addf %448, %449 : vector<2x32xf32>
    %451 = math.tanh %450 : vector<2x32xf32>
    %452 = arith.mulf %447, %451 : vector<2x32xf32>
    %453 = arith.index_cast %c5_i32 : i32 to index
    %c0_97 = arith.constant 0 : index
    %c0_98 = arith.constant 0 : index
    %454 = vector.load %arg3[%453, %c0_97, %c0_98] : memref<8x2x32xf32, #tpu.memory_space<vmem>>, vector<1x2x32xf32>
    %455 = vector.shape_cast %454 : vector<1x2x32xf32> to vector<2x32xf32>
    %456 = vector.shape_cast %426 : vector<2x32xf32> to vector<1x2x32xf32>
    tpu.vector_store %arg3[%453, %c0_97, %c0_98], %456 {strides = array<i32>} : memref<8x2x32xf32, #tpu.memory_space<vmem>>, vector<1x2x32xf32>,
    %c7_i32_99 = arith.constant 7 : i32
    %457 = arith.subi %c7_i32_99, %c5_i32 : i32
    %458 = arith.index_cast %457 : i32 to index
    %c0_100 = arith.constant 0 : index
    %c0_101 = arith.constant 0 : index
    %459 = vector.load %arg4[%458, %c0_100, %c0_101] : memref<8x2x32xf32, #tpu.memory_space<vmem>>, vector<1x2x32xf32>
    %460 = vector.shape_cast %459 : vector<1x2x32xf32> to vector<2x32xf32>
    %461 = vector.shape_cast %452 : vector<2x32xf32> to vector<1x2x32xf32>
    tpu.vector_store %arg4[%458, %c0_100, %c0_101], %461 {strides = array<i32>} : memref<8x2x32xf32, #tpu.memory_space<vmem>>, vector<1x2x32xf32>,
    %462 = tpu.concatenate %426, %452 in 1 : vector<2x32xf32>, vector<2x32xf32> -> vector<2x64xf32>
    %463 = tpu.concatenate %424, %450 in 1 : vector<2x32xf32>, vector<2x32xf32> -> vector<2x64xf32>
    %c6_i32 = arith.constant 6 : i32
    %cst_102 = arith.constant dense<0.000000e+00> : vector<2x256xf32>
    %464 = tpu.matmul %462, %0, %cst_102 {dimension_numbers = #tpu.dot_dimension_numbers<[1], [0], [0], [1], [0, 0, 1, 1], [], []>} : vector<2x64xf32>, vector<64x256xf32>, vector<2x256xf32> -> vector<2x256xf32>
    %465 = arith.index_cast %c6_i32 : i32 to index
    %c0_103 = arith.constant 0 : index
    %c0_104 = arith.constant 0 : index
    %466 = vector.load %arg0[%465, %c0_103, %c0_104] : memref<8x2x256xf32, #tpu.memory_space<vmem>>, vector<1x2x256xf32>
    %467 = vector.shape_cast %466 : vector<1x2x256xf32> to vector<2x256xf32>
    %468 = vector.extract_strided_slice %467 {offsets = [0, 0], sizes = [2, 128], strides = [1, 1]} : vector<2x256xf32> to vector<2x128xf32>
    %469 = vector.extract_strided_slice %464 {offsets = [0, 0], sizes = [2, 128], strides = [1, 1]} : vector<2x256xf32> to vector<2x128xf32>
    %470 = arith.addf %468, %469 : vector<2x128xf32>
    %c7_i32_105 = arith.constant 7 : i32
    %471 = arith.subi %c7_i32_105, %c6_i32 : i32
    %472 = arith.index_cast %471 : i32 to index
    %c0_106 = arith.constant 0 : index
    %c0_107 = arith.constant 0 : index
    %473 = vector.load %arg0[%472, %c0_106, %c0_107] : memref<8x2x256xf32, #tpu.memory_space<vmem>>, vector<1x2x256xf32>
    %474 = vector.shape_cast %473 : vector<1x2x256xf32> to vector<2x256xf32>
    %475 = vector.extract_strided_slice %474 {offsets = [0, 128], sizes = [2, 128], strides = [1, 1]} : vector<2x256xf32> to vector<2x128xf32>
    %476 = vector.extract_strided_slice %464 {offsets = [0, 128], sizes = [2, 128], strides = [1, 1]} : vector<2x256xf32> to vector<2x128xf32>
    %477 = arith.addf %475, %476 : vector<2x128xf32>
    %478 = vector.extract_strided_slice %463 {offsets = [0, 0], sizes = [2, 32], strides = [1, 1]} : vector<2x64xf32> to vector<2x32xf32>
    %479 = vector.extract_strided_slice %470 {offsets = [0, 0], sizes = [2, 32], strides = [1, 1]} : vector<2x128xf32> to vector<2x32xf32>
    %480 = arith.negf %479 : vector<2x32xf32>
    %481 = math.exp %480 : vector<2x32xf32>
    %cst_108 = arith.constant 1.000000e+00 : f32
    %482 = vector.broadcast %cst_108 : f32 to vector<2x32xf32>
    %483 = arith.addf %482, %481 : vector<2x32xf32>
    %484 = arith.divf %482, %483 : vector<2x32xf32>
    %485 = vector.extract_strided_slice %470 {offsets = [0, 32], sizes = [2, 32], strides = [1, 1]} : vector<2x128xf32> to vector<2x32xf32>
    %486 = arith.negf %485 : vector<2x32xf32>
    %487 = math.exp %486 : vector<2x32xf32>
    %cst_109 = arith.constant 1.000000e+00 : f32
    %488 = vector.broadcast %cst_109 : f32 to vector<2x32xf32>
    %489 = arith.addf %488, %487 : vector<2x32xf32>
    %490 = arith.divf %488, %489 : vector<2x32xf32>
    %491 = vector.extract_strided_slice %470 {offsets = [0, 64], sizes = [2, 32], strides = [1, 1]} : vector<2x128xf32> to vector<2x32xf32>
    %492 = math.tanh %491 : vector<2x32xf32>
    %493 = vector.extract_strided_slice %470 {offsets = [0, 96], sizes = [2, 32], strides = [1, 1]} : vector<2x128xf32> to vector<2x32xf32>
    %494 = arith.negf %493 : vector<2x32xf32>
    %495 = math.exp %494 : vector<2x32xf32>
    %cst_110 = arith.constant 1.000000e+00 : f32
    %496 = vector.broadcast %cst_110 : f32 to vector<2x32xf32>
    %497 = arith.addf %496, %495 : vector<2x32xf32>
    %498 = arith.divf %496, %497 : vector<2x32xf32>
    %499 = arith.mulf %490, %478 : vector<2x32xf32>
    %500 = arith.mulf %484, %492 : vector<2x32xf32>
    %501 = arith.addf %499, %500 : vector<2x32xf32>
    %502 = math.tanh %501 : vector<2x32xf32>
    %503 = arith.mulf %498, %502 : vector<2x32xf32>
    %504 = vector.extract_strided_slice %463 {offsets = [0, 32], sizes = [2, 32], strides = [1, 1]} : vector<2x64xf32> to vector<2x32xf32>
    %505 = vector.extract_strided_slice %477 {offsets = [0, 0], sizes = [2, 32], strides = [1, 1]} : vector<2x128xf32> to vector<2x32xf32>
    %506 = arith.negf %505 : vector<2x32xf32>
    %507 = math.exp %506 : vector<2x32xf32>
    %cst_111 = arith.constant 1.000000e+00 : f32
    %508 = vector.broadcast %cst_111 : f32 to vector<2x32xf32>
    %509 = arith.addf %508, %507 : vector<2x32xf32>
    %510 = arith.divf %508, %509 : vector<2x32xf32>
    %511 = vector.extract_strided_slice %477 {offsets = [0, 32], sizes = [2, 32], strides = [1, 1]} : vector<2x128xf32> to vector<2x32xf32>
    %512 = arith.negf %511 : vector<2x32xf32>
    %513 = math.exp %512 : vector<2x32xf32>
    %cst_112 = arith.constant 1.000000e+00 : f32
    %514 = vector.broadcast %cst_112 : f32 to vector<2x32xf32>
    %515 = arith.addf %514, %513 : vector<2x32xf32>
    %516 = arith.divf %514, %515 : vector<2x32xf32>
    %517 = vector.extract_strided_slice %477 {offsets = [0, 64], sizes = [2, 32], strides = [1, 1]} : vector<2x128xf32> to vector<2x32xf32>
    %518 = math.tanh %517 : vector<2x32xf32>
    %519 = vector.extract_strided_slice %477 {offsets = [0, 96], sizes = [2, 32], strides = [1, 1]} : vector<2x128xf32> to vector<2x32xf32>
    %520 = arith.negf %519 : vector<2x32xf32>
    %521 = math.exp %520 : vector<2x32xf32>
    %cst_113 = arith.constant 1.000000e+00 : f32
    %522 = vector.broadcast %cst_113 : f32 to vector<2x32xf32>
    %523 = arith.addf %522, %521 : vector<2x32xf32>
    %524 = arith.divf %522, %523 : vector<2x32xf32>
    %525 = arith.mulf %516, %504 : vector<2x32xf32>
    %526 = arith.mulf %510, %518 : vector<2x32xf32>
    %527 = arith.addf %525, %526 : vector<2x32xf32>
    %528 = math.tanh %527 : vector<2x32xf32>
    %529 = arith.mulf %524, %528 : vector<2x32xf32>
    %530 = arith.index_cast %c6_i32 : i32 to index
    %c0_114 = arith.constant 0 : index
    %c0_115 = arith.constant 0 : index
    %531 = vector.load %arg3[%530, %c0_114, %c0_115] : memref<8x2x32xf32, #tpu.memory_space<vmem>>, vector<1x2x32xf32>
    %532 = vector.shape_cast %531 : vector<1x2x32xf32> to vector<2x32xf32>
    %533 = vector.shape_cast %503 : vector<2x32xf32> to vector<1x2x32xf32>
    tpu.vector_store %arg3[%530, %c0_114, %c0_115], %533 {strides = array<i32>} : memref<8x2x32xf32, #tpu.memory_space<vmem>>, vector<1x2x32xf32>,
    %c7_i32_116 = arith.constant 7 : i32
    %534 = arith.subi %c7_i32_116, %c6_i32 : i32
    %535 = arith.index_cast %534 : i32 to index
    %c0_117 = arith.constant 0 : index
    %c0_118 = arith.constant 0 : index
    %536 = vector.load %arg4[%535, %c0_117, %c0_118] : memref<8x2x32xf32, #tpu.memory_space<vmem>>, vector<1x2x32xf32>
    %537 = vector.shape_cast %536 : vector<1x2x32xf32> to vector<2x32xf32>
    %538 = vector.shape_cast %529 : vector<2x32xf32> to vector<1x2x32xf32>
    tpu.vector_store %arg4[%535, %c0_117, %c0_118], %538 {strides = array<i32>} : memref<8x2x32xf32, #tpu.memory_space<vmem>>, vector<1x2x32xf32>,
    %539 = tpu.concatenate %503, %529 in 1 : vector<2x32xf32>, vector<2x32xf32> -> vector<2x64xf32>
    %540 = tpu.concatenate %501, %527 in 1 : vector<2x32xf32>, vector<2x32xf32> -> vector<2x64xf32>
    %c7_i32_119 = arith.constant 7 : i32
    %cst_120 = arith.constant dense<0.000000e+00> : vector<2x256xf32>
    %541 = tpu.matmul %539, %0, %cst_120 {dimension_numbers = #tpu.dot_dimension_numbers<[1], [0], [0], [1], [0, 0, 1, 1], [], []>} : vector<2x64xf32>, vector<64x256xf32>, vector<2x256xf32> -> vector<2x256xf32>
    %542 = arith.index_cast %c7_i32_119 : i32 to index
    %c0_121 = arith.constant 0 : index
    %c0_122 = arith.constant 0 : index
    %543 = vector.load %arg0[%542, %c0_121, %c0_122] : memref<8x2x256xf32, #tpu.memory_space<vmem>>, vector<1x2x256xf32>
    %544 = vector.shape_cast %543 : vector<1x2x256xf32> to vector<2x256xf32>
    %545 = vector.extract_strided_slice %544 {offsets = [0, 0], sizes = [2, 128], strides = [1, 1]} : vector<2x256xf32> to vector<2x128xf32>
    %546 = vector.extract_strided_slice %541 {offsets = [0, 0], sizes = [2, 128], strides = [1, 1]} : vector<2x256xf32> to vector<2x128xf32>
    %547 = arith.addf %545, %546 : vector<2x128xf32>
    %c7_i32_123 = arith.constant 7 : i32
    %548 = arith.subi %c7_i32_123, %c7_i32_119 : i32
    %549 = arith.index_cast %548 : i32 to index
    %c0_124 = arith.constant 0 : index
    %c0_125 = arith.constant 0 : index
    %550 = vector.load %arg0[%549, %c0_124, %c0_125] : memref<8x2x256xf32, #tpu.memory_space<vmem>>, vector<1x2x256xf32>
    %551 = vector.shape_cast %550 : vector<1x2x256xf32> to vector<2x256xf32>
    %552 = vector.extract_strided_slice %551 {offsets = [0, 128], sizes = [2, 128], strides = [1, 1]} : vector<2x256xf32> to vector<2x128xf32>
    %553 = vector.extract_strided_slice %541 {offsets = [0, 128], sizes = [2, 128], strides = [1, 1]} : vector<2x256xf32> to vector<2x128xf32>
    %554 = arith.addf %552, %553 : vector<2x128xf32>
    %555 = vector.extract_strided_slice %540 {offsets = [0, 0], sizes = [2, 32], strides = [1, 1]} : vector<2x64xf32> to vector<2x32xf32>
    %556 = vector.extract_strided_slice %547 {offsets = [0, 0], sizes = [2, 32], strides = [1, 1]} : vector<2x128xf32> to vector<2x32xf32>
    %557 = arith.negf %556 : vector<2x32xf32>
    %558 = math.exp %557 : vector<2x32xf32>
    %cst_126 = arith.constant 1.000000e+00 : f32
    %559 = vector.broadcast %cst_126 : f32 to vector<2x32xf32>
    %560 = arith.addf %559, %558 : vector<2x32xf32>
    %561 = arith.divf %559, %560 : vector<2x32xf32>
    %562 = vector.extract_strided_slice %547 {offsets = [0, 32], sizes = [2, 32], strides = [1, 1]} : vector<2x128xf32> to vector<2x32xf32>
    %563 = arith.negf %562 : vector<2x32xf32>
    %564 = math.exp %563 : vector<2x32xf32>
    %cst_127 = arith.constant 1.000000e+00 : f32
    %565 = vector.broadcast %cst_127 : f32 to vector<2x32xf32>
    %566 = arith.addf %565, %564 : vector<2x32xf32>
    %567 = arith.divf %565, %566 : vector<2x32xf32>
    %568 = vector.extract_strided_slice %547 {offsets = [0, 64], sizes = [2, 32], strides = [1, 1]} : vector<2x128xf32> to vector<2x32xf32>
    %569 = math.tanh %568 : vector<2x32xf32>
    %570 = vector.extract_strided_slice %547 {offsets = [0, 96], sizes = [2, 32], strides = [1, 1]} : vector<2x128xf32> to vector<2x32xf32>
    %571 = arith.negf %570 : vector<2x32xf32>
    %572 = math.exp %571 : vector<2x32xf32>
    %cst_128 = arith.constant 1.000000e+00 : f32
    %573 = vector.broadcast %cst_128 : f32 to vector<2x32xf32>
    %574 = arith.addf %573, %572 : vector<2x32xf32>
    %575 = arith.divf %573, %574 : vector<2x32xf32>
    %576 = arith.mulf %567, %555 : vector<2x32xf32>
    %577 = arith.mulf %561, %569 : vector<2x32xf32>
    %578 = arith.addf %576, %577 : vector<2x32xf32>
    %579 = math.tanh %578 : vector<2x32xf32>
    %580 = arith.mulf %575, %579 : vector<2x32xf32>
    %581 = vector.extract_strided_slice %540 {offsets = [0, 32], sizes = [2, 32], strides = [1, 1]} : vector<2x64xf32> to vector<2x32xf32>
    %582 = vector.extract_strided_slice %554 {offsets = [0, 0], sizes = [2, 32], strides = [1, 1]} : vector<2x128xf32> to vector<2x32xf32>
    %583 = arith.negf %582 : vector<2x32xf32>
    %584 = math.exp %583 : vector<2x32xf32>
    %cst_129 = arith.constant 1.000000e+00 : f32
    %585 = vector.broadcast %cst_129 : f32 to vector<2x32xf32>
    %586 = arith.addf %585, %584 : vector<2x32xf32>
    %587 = arith.divf %585, %586 : vector<2x32xf32>
    %588 = vector.extract_strided_slice %554 {offsets = [0, 32], sizes = [2, 32], strides = [1, 1]} : vector<2x128xf32> to vector<2x32xf32>
    %589 = arith.negf %588 : vector<2x32xf32>
    %590 = math.exp %589 : vector<2x32xf32>
    %cst_130 = arith.constant 1.000000e+00 : f32
    %591 = vector.broadcast %cst_130 : f32 to vector<2x32xf32>
    %592 = arith.addf %591, %590 : vector<2x32xf32>
    %593 = arith.divf %591, %592 : vector<2x32xf32>
    %594 = vector.extract_strided_slice %554 {offsets = [0, 64], sizes = [2, 32], strides = [1, 1]} : vector<2x128xf32> to vector<2x32xf32>
    %595 = math.tanh %594 : vector<2x32xf32>
    %596 = vector.extract_strided_slice %554 {offsets = [0, 96], sizes = [2, 32], strides = [1, 1]} : vector<2x128xf32> to vector<2x32xf32>
    %597 = arith.negf %596 : vector<2x32xf32>
    %598 = math.exp %597 : vector<2x32xf32>
    %cst_131 = arith.constant 1.000000e+00 : f32
    %599 = vector.broadcast %cst_131 : f32 to vector<2x32xf32>
    %600 = arith.addf %599, %598 : vector<2x32xf32>
    %601 = arith.divf %599, %600 : vector<2x32xf32>
    %602 = arith.mulf %593, %581 : vector<2x32xf32>
    %603 = arith.mulf %587, %595 : vector<2x32xf32>
    %604 = arith.addf %602, %603 : vector<2x32xf32>
    %605 = math.tanh %604 : vector<2x32xf32>
    %606 = arith.mulf %601, %605 : vector<2x32xf32>
    %607 = arith.index_cast %c7_i32_119 : i32 to index
    %c0_132 = arith.constant 0 : index
    %c0_133 = arith.constant 0 : index
    %608 = vector.load %arg3[%607, %c0_132, %c0_133] : memref<8x2x32xf32, #tpu.memory_space<vmem>>, vector<1x2x32xf32>
    %609 = vector.shape_cast %608 : vector<1x2x32xf32> to vector<2x32xf32>
    %610 = vector.shape_cast %580 : vector<2x32xf32> to vector<1x2x32xf32>
    tpu.vector_store %arg3[%607, %c0_132, %c0_133], %610 {strides = array<i32>} : memref<8x2x32xf32, #tpu.memory_space<vmem>>, vector<1x2x32xf32>,
    %c7_i32_134 = arith.constant 7 : i32
    %611 = arith.subi %c7_i32_134, %c7_i32_119 : i32
    %612 = arith.index_cast %611 : i32 to index
    %c0_135 = arith.constant 0 : index
    %c0_136 = arith.constant 0 : index
    %613 = vector.load %arg4[%612, %c0_135, %c0_136] : memref<8x2x32xf32, #tpu.memory_space<vmem>>, vector<1x2x32xf32>
    %614 = vector.shape_cast %613 : vector<1x2x32xf32> to vector<2x32xf32>
    %615 = vector.shape_cast %606 : vector<2x32xf32> to vector<1x2x32xf32>
    tpu.vector_store %arg4[%612, %c0_135, %c0_136], %615 {strides = array<i32>} : memref<8x2x32xf32, #tpu.memory_space<vmem>>, vector<1x2x32xf32>,
    %616 = tpu.concatenate %580, %606 in 1 : vector<2x32xf32>, vector<2x32xf32> -> vector<2x64xf32>
    %617 = tpu.concatenate %578, %604 in 1 : vector<2x32xf32>, vector<2x32xf32> -> vector<2x64xf32>
    %c8_i32 = arith.constant 8 : i32
    %c0_137 = arith.constant 0 : index
    %c0_138 = arith.constant 0 : index
    %c0_139 = arith.constant 0 : index
    %618 = vector.load %arg3[%c0_137, %c0_138, %c0_139] : memref<8x2x32xf32, #tpu.memory_space<vmem>>, vector<8x2x32xf32>
    %c0_140 = arith.constant 0 : index
    %c0_141 = arith.constant 0 : index
    %c0_142 = arith.constant 0 : index
    %619 = vector.load %arg4[%c0_140, %c0_141, %c0_142] : memref<8x2x32xf32, #tpu.memory_space<vmem>>, vector<8x2x32xf32>
    %620 = tpu.concatenate %618, %619 in 2 : vector<8x2x32xf32>, vector<8x2x32xf32> -> vector<8x2x64xf32>
    %c0_143 = arith.constant 0 : index
    %c0_144 = arith.constant 0 : index
    %c0_145 = arith.constant 0 : index
    %621 = vector.load %arg2[%c0_143, %c0_144, %c0_145] : memref<8x2x64xf32, #tpu.memory_space<vmem>>, vector<8x2x64xf32>
    tpu.vector_store %arg2[%c0_143, %c0_144, %c0_145], %620 {strides = array<i32>} : memref<8x2x64xf32, #tpu.memory_space<vmem>>, vector<8x2x64xf32>,
    return
  }
}

module attributes {stable_mosaic.version = 11 : i64} {
  func.func @_bilstm_kernel(%arg0: memref<4x2x256xf32, #tpu.memory_space<vmem>>, %arg1: memref<64x256xf32, #tpu.memory_space<vmem>>, %arg2: memref<4x2x64xf32, #tpu.memory_space<vmem>>, %arg3: memref<4x2x32xf32, #tpu.memory_space<vmem>>, %arg4: memref<4x2x32xf32, #tpu.memory_space<vmem>>) attributes {dimension_semantics = [], scalar_prefetch = 0 : i64, scratch_operands = 2 : i64, tpu.core_type = #tpu.core_type<tc>} {
    %c0 = arith.constant 0 : index
    %c0_0 = arith.constant 0 : index
    %0 = vector.load %arg1[%c0, %c0_0] : memref<64x256xf32, #tpu.memory_space<vmem>>, vector<64x256xf32>
    %cst = arith.constant 0.000000e+00 : f32
    %1 = vector.broadcast %cst : f32 to vector<2x64xf32>
    %c0_i32 = arith.constant 0 : i32
    %cst_1 = arith.constant dense<0.000000e+00> : vector<2x256xf32>
    %2 = tpu.matmul %1, %0, %cst_1 {dimension_numbers = #tpu.dot_dimension_numbers<[1], [0], [0], [1], [0, 0, 1, 1], [], []>} : vector<2x64xf32>, vector<64x256xf32>, vector<2x256xf32> -> vector<2x256xf32>
    %3 = arith.index_cast %c0_i32 : i32 to index
    %c0_2 = arith.constant 0 : index
    %c0_3 = arith.constant 0 : index
    %4 = vector.load %arg0[%3, %c0_2, %c0_3] : memref<4x2x256xf32, #tpu.memory_space<vmem>>, vector<1x2x256xf32>
    %5 = vector.shape_cast %4 : vector<1x2x256xf32> to vector<2x256xf32>
    %6 = vector.extract_strided_slice %5 {offsets = [0, 0], sizes = [2, 128], strides = [1, 1]} : vector<2x256xf32> to vector<2x128xf32>
    %7 = vector.extract_strided_slice %2 {offsets = [0, 0], sizes = [2, 128], strides = [1, 1]} : vector<2x256xf32> to vector<2x128xf32>
    %8 = arith.addf %6, %7 : vector<2x128xf32>
    %c3_i32 = arith.constant 3 : i32
    %9 = arith.subi %c3_i32, %c0_i32 : i32
    %10 = arith.index_cast %9 : i32 to index
    %c0_4 = arith.constant 0 : index
    %c0_5 = arith.constant 0 : index
    %11 = vector.load %arg0[%10, %c0_4, %c0_5] : memref<4x2x256xf32, #tpu.memory_space<vmem>>, vector<1x2x256xf32>
    %12 = vector.shape_cast %11 : vector<1x2x256xf32> to vector<2x256xf32>
    %13 = vector.extract_strided_slice %12 {offsets = [0, 128], sizes = [2, 128], strides = [1, 1]} : vector<2x256xf32> to vector<2x128xf32>
    %14 = vector.extract_strided_slice %2 {offsets = [0, 128], sizes = [2, 128], strides = [1, 1]} : vector<2x256xf32> to vector<2x128xf32>
    %15 = arith.addf %13, %14 : vector<2x128xf32>
    %16 = vector.extract_strided_slice %1 {offsets = [0, 0], sizes = [2, 32], strides = [1, 1]} : vector<2x64xf32> to vector<2x32xf32>
    %17 = vector.extract_strided_slice %8 {offsets = [0, 0], sizes = [2, 32], strides = [1, 1]} : vector<2x128xf32> to vector<2x32xf32>
    %18 = arith.negf %17 : vector<2x32xf32>
    %19 = math.exp %18 : vector<2x32xf32>
    %cst_6 = arith.constant 1.000000e+00 : f32
    %20 = vector.broadcast %cst_6 : f32 to vector<2x32xf32>
    %21 = arith.addf %20, %19 : vector<2x32xf32>
    %22 = arith.divf %20, %21 : vector<2x32xf32>
    %23 = vector.extract_strided_slice %8 {offsets = [0, 32], sizes = [2, 32], strides = [1, 1]} : vector<2x128xf32> to vector<2x32xf32>
    %24 = arith.negf %23 : vector<2x32xf32>
    %25 = math.exp %24 : vector<2x32xf32>
    %cst_7 = arith.constant 1.000000e+00 : f32
    %26 = vector.broadcast %cst_7 : f32 to vector<2x32xf32>
    %27 = arith.addf %26, %25 : vector<2x32xf32>
    %28 = arith.divf %26, %27 : vector<2x32xf32>
    %29 = vector.extract_strided_slice %8 {offsets = [0, 64], sizes = [2, 32], strides = [1, 1]} : vector<2x128xf32> to vector<2x32xf32>
    %30 = math.tanh %29 : vector<2x32xf32>
    %31 = vector.extract_strided_slice %8 {offsets = [0, 96], sizes = [2, 32], strides = [1, 1]} : vector<2x128xf32> to vector<2x32xf32>
    %32 = arith.negf %31 : vector<2x32xf32>
    %33 = math.exp %32 : vector<2x32xf32>
    %cst_8 = arith.constant 1.000000e+00 : f32
    %34 = vector.broadcast %cst_8 : f32 to vector<2x32xf32>
    %35 = arith.addf %34, %33 : vector<2x32xf32>
    %36 = arith.divf %34, %35 : vector<2x32xf32>
    %37 = arith.mulf %28, %16 : vector<2x32xf32>
    %38 = arith.mulf %22, %30 : vector<2x32xf32>
    %39 = arith.addf %37, %38 : vector<2x32xf32>
    %40 = math.tanh %39 : vector<2x32xf32>
    %41 = arith.mulf %36, %40 : vector<2x32xf32>
    %42 = vector.extract_strided_slice %1 {offsets = [0, 32], sizes = [2, 32], strides = [1, 1]} : vector<2x64xf32> to vector<2x32xf32>
    %43 = vector.extract_strided_slice %15 {offsets = [0, 0], sizes = [2, 32], strides = [1, 1]} : vector<2x128xf32> to vector<2x32xf32>
    %44 = arith.negf %43 : vector<2x32xf32>
    %45 = math.exp %44 : vector<2x32xf32>
    %cst_9 = arith.constant 1.000000e+00 : f32
    %46 = vector.broadcast %cst_9 : f32 to vector<2x32xf32>
    %47 = arith.addf %46, %45 : vector<2x32xf32>
    %48 = arith.divf %46, %47 : vector<2x32xf32>
    %49 = vector.extract_strided_slice %15 {offsets = [0, 32], sizes = [2, 32], strides = [1, 1]} : vector<2x128xf32> to vector<2x32xf32>
    %50 = arith.negf %49 : vector<2x32xf32>
    %51 = math.exp %50 : vector<2x32xf32>
    %cst_10 = arith.constant 1.000000e+00 : f32
    %52 = vector.broadcast %cst_10 : f32 to vector<2x32xf32>
    %53 = arith.addf %52, %51 : vector<2x32xf32>
    %54 = arith.divf %52, %53 : vector<2x32xf32>
    %55 = vector.extract_strided_slice %15 {offsets = [0, 64], sizes = [2, 32], strides = [1, 1]} : vector<2x128xf32> to vector<2x32xf32>
    %56 = math.tanh %55 : vector<2x32xf32>
    %57 = vector.extract_strided_slice %15 {offsets = [0, 96], sizes = [2, 32], strides = [1, 1]} : vector<2x128xf32> to vector<2x32xf32>
    %58 = arith.negf %57 : vector<2x32xf32>
    %59 = math.exp %58 : vector<2x32xf32>
    %cst_11 = arith.constant 1.000000e+00 : f32
    %60 = vector.broadcast %cst_11 : f32 to vector<2x32xf32>
    %61 = arith.addf %60, %59 : vector<2x32xf32>
    %62 = arith.divf %60, %61 : vector<2x32xf32>
    %63 = arith.mulf %54, %42 : vector<2x32xf32>
    %64 = arith.mulf %48, %56 : vector<2x32xf32>
    %65 = arith.addf %63, %64 : vector<2x32xf32>
    %66 = math.tanh %65 : vector<2x32xf32>
    %67 = arith.mulf %62, %66 : vector<2x32xf32>
    %68 = arith.index_cast %c0_i32 : i32 to index
    %c0_12 = arith.constant 0 : index
    %c0_13 = arith.constant 0 : index
    %69 = vector.load %arg3[%68, %c0_12, %c0_13] : memref<4x2x32xf32, #tpu.memory_space<vmem>>, vector<1x2x32xf32>
    %70 = vector.shape_cast %69 : vector<1x2x32xf32> to vector<2x32xf32>
    %71 = vector.shape_cast %41 : vector<2x32xf32> to vector<1x2x32xf32>
    tpu.vector_store %arg3[%68, %c0_12, %c0_13], %71 {strides = array<i32>} : memref<4x2x32xf32, #tpu.memory_space<vmem>>, vector<1x2x32xf32>,
    %c3_i32_14 = arith.constant 3 : i32
    %72 = arith.subi %c3_i32_14, %c0_i32 : i32
    %73 = arith.index_cast %72 : i32 to index
    %c0_15 = arith.constant 0 : index
    %c0_16 = arith.constant 0 : index
    %74 = vector.load %arg4[%73, %c0_15, %c0_16] : memref<4x2x32xf32, #tpu.memory_space<vmem>>, vector<1x2x32xf32>
    %75 = vector.shape_cast %74 : vector<1x2x32xf32> to vector<2x32xf32>
    %76 = vector.shape_cast %67 : vector<2x32xf32> to vector<1x2x32xf32>
    tpu.vector_store %arg4[%73, %c0_15, %c0_16], %76 {strides = array<i32>} : memref<4x2x32xf32, #tpu.memory_space<vmem>>, vector<1x2x32xf32>,
    %77 = tpu.concatenate %41, %67 in 1 : vector<2x32xf32>, vector<2x32xf32> -> vector<2x64xf32>
    %78 = tpu.concatenate %39, %65 in 1 : vector<2x32xf32>, vector<2x32xf32> -> vector<2x64xf32>
    %c1_i32 = arith.constant 1 : i32
    %cst_17 = arith.constant dense<0.000000e+00> : vector<2x256xf32>
    %79 = tpu.matmul %77, %0, %cst_17 {dimension_numbers = #tpu.dot_dimension_numbers<[1], [0], [0], [1], [0, 0, 1, 1], [], []>} : vector<2x64xf32>, vector<64x256xf32>, vector<2x256xf32> -> vector<2x256xf32>
    %80 = arith.index_cast %c1_i32 : i32 to index
    %c0_18 = arith.constant 0 : index
    %c0_19 = arith.constant 0 : index
    %81 = vector.load %arg0[%80, %c0_18, %c0_19] : memref<4x2x256xf32, #tpu.memory_space<vmem>>, vector<1x2x256xf32>
    %82 = vector.shape_cast %81 : vector<1x2x256xf32> to vector<2x256xf32>
    %83 = vector.extract_strided_slice %82 {offsets = [0, 0], sizes = [2, 128], strides = [1, 1]} : vector<2x256xf32> to vector<2x128xf32>
    %84 = vector.extract_strided_slice %79 {offsets = [0, 0], sizes = [2, 128], strides = [1, 1]} : vector<2x256xf32> to vector<2x128xf32>
    %85 = arith.addf %83, %84 : vector<2x128xf32>
    %c3_i32_20 = arith.constant 3 : i32
    %86 = arith.subi %c3_i32_20, %c1_i32 : i32
    %87 = arith.index_cast %86 : i32 to index
    %c0_21 = arith.constant 0 : index
    %c0_22 = arith.constant 0 : index
    %88 = vector.load %arg0[%87, %c0_21, %c0_22] : memref<4x2x256xf32, #tpu.memory_space<vmem>>, vector<1x2x256xf32>
    %89 = vector.shape_cast %88 : vector<1x2x256xf32> to vector<2x256xf32>
    %90 = vector.extract_strided_slice %89 {offsets = [0, 128], sizes = [2, 128], strides = [1, 1]} : vector<2x256xf32> to vector<2x128xf32>
    %91 = vector.extract_strided_slice %79 {offsets = [0, 128], sizes = [2, 128], strides = [1, 1]} : vector<2x256xf32> to vector<2x128xf32>
    %92 = arith.addf %90, %91 : vector<2x128xf32>
    %93 = vector.extract_strided_slice %78 {offsets = [0, 0], sizes = [2, 32], strides = [1, 1]} : vector<2x64xf32> to vector<2x32xf32>
    %94 = vector.extract_strided_slice %85 {offsets = [0, 0], sizes = [2, 32], strides = [1, 1]} : vector<2x128xf32> to vector<2x32xf32>
    %95 = arith.negf %94 : vector<2x32xf32>
    %96 = math.exp %95 : vector<2x32xf32>
    %cst_23 = arith.constant 1.000000e+00 : f32
    %97 = vector.broadcast %cst_23 : f32 to vector<2x32xf32>
    %98 = arith.addf %97, %96 : vector<2x32xf32>
    %99 = arith.divf %97, %98 : vector<2x32xf32>
    %100 = vector.extract_strided_slice %85 {offsets = [0, 32], sizes = [2, 32], strides = [1, 1]} : vector<2x128xf32> to vector<2x32xf32>
    %101 = arith.negf %100 : vector<2x32xf32>
    %102 = math.exp %101 : vector<2x32xf32>
    %cst_24 = arith.constant 1.000000e+00 : f32
    %103 = vector.broadcast %cst_24 : f32 to vector<2x32xf32>
    %104 = arith.addf %103, %102 : vector<2x32xf32>
    %105 = arith.divf %103, %104 : vector<2x32xf32>
    %106 = vector.extract_strided_slice %85 {offsets = [0, 64], sizes = [2, 32], strides = [1, 1]} : vector<2x128xf32> to vector<2x32xf32>
    %107 = math.tanh %106 : vector<2x32xf32>
    %108 = vector.extract_strided_slice %85 {offsets = [0, 96], sizes = [2, 32], strides = [1, 1]} : vector<2x128xf32> to vector<2x32xf32>
    %109 = arith.negf %108 : vector<2x32xf32>
    %110 = math.exp %109 : vector<2x32xf32>
    %cst_25 = arith.constant 1.000000e+00 : f32
    %111 = vector.broadcast %cst_25 : f32 to vector<2x32xf32>
    %112 = arith.addf %111, %110 : vector<2x32xf32>
    %113 = arith.divf %111, %112 : vector<2x32xf32>
    %114 = arith.mulf %105, %93 : vector<2x32xf32>
    %115 = arith.mulf %99, %107 : vector<2x32xf32>
    %116 = arith.addf %114, %115 : vector<2x32xf32>
    %117 = math.tanh %116 : vector<2x32xf32>
    %118 = arith.mulf %113, %117 : vector<2x32xf32>
    %119 = vector.extract_strided_slice %78 {offsets = [0, 32], sizes = [2, 32], strides = [1, 1]} : vector<2x64xf32> to vector<2x32xf32>
    %120 = vector.extract_strided_slice %92 {offsets = [0, 0], sizes = [2, 32], strides = [1, 1]} : vector<2x128xf32> to vector<2x32xf32>
    %121 = arith.negf %120 : vector<2x32xf32>
    %122 = math.exp %121 : vector<2x32xf32>
    %cst_26 = arith.constant 1.000000e+00 : f32
    %123 = vector.broadcast %cst_26 : f32 to vector<2x32xf32>
    %124 = arith.addf %123, %122 : vector<2x32xf32>
    %125 = arith.divf %123, %124 : vector<2x32xf32>
    %126 = vector.extract_strided_slice %92 {offsets = [0, 32], sizes = [2, 32], strides = [1, 1]} : vector<2x128xf32> to vector<2x32xf32>
    %127 = arith.negf %126 : vector<2x32xf32>
    %128 = math.exp %127 : vector<2x32xf32>
    %cst_27 = arith.constant 1.000000e+00 : f32
    %129 = vector.broadcast %cst_27 : f32 to vector<2x32xf32>
    %130 = arith.addf %129, %128 : vector<2x32xf32>
    %131 = arith.divf %129, %130 : vector<2x32xf32>
    %132 = vector.extract_strided_slice %92 {offsets = [0, 64], sizes = [2, 32], strides = [1, 1]} : vector<2x128xf32> to vector<2x32xf32>
    %133 = math.tanh %132 : vector<2x32xf32>
    %134 = vector.extract_strided_slice %92 {offsets = [0, 96], sizes = [2, 32], strides = [1, 1]} : vector<2x128xf32> to vector<2x32xf32>
    %135 = arith.negf %134 : vector<2x32xf32>
    %136 = math.exp %135 : vector<2x32xf32>
    %cst_28 = arith.constant 1.000000e+00 : f32
    %137 = vector.broadcast %cst_28 : f32 to vector<2x32xf32>
    %138 = arith.addf %137, %136 : vector<2x32xf32>
    %139 = arith.divf %137, %138 : vector<2x32xf32>
    %140 = arith.mulf %131, %119 : vector<2x32xf32>
    %141 = arith.mulf %125, %133 : vector<2x32xf32>
    %142 = arith.addf %140, %141 : vector<2x32xf32>
    %143 = math.tanh %142 : vector<2x32xf32>
    %144 = arith.mulf %139, %143 : vector<2x32xf32>
    %145 = arith.index_cast %c1_i32 : i32 to index
    %c0_29 = arith.constant 0 : index
    %c0_30 = arith.constant 0 : index
    %146 = vector.load %arg3[%145, %c0_29, %c0_30] : memref<4x2x32xf32, #tpu.memory_space<vmem>>, vector<1x2x32xf32>
    %147 = vector.shape_cast %146 : vector<1x2x32xf32> to vector<2x32xf32>
    %148 = vector.shape_cast %118 : vector<2x32xf32> to vector<1x2x32xf32>
    tpu.vector_store %arg3[%145, %c0_29, %c0_30], %148 {strides = array<i32>} : memref<4x2x32xf32, #tpu.memory_space<vmem>>, vector<1x2x32xf32>,
    %c3_i32_31 = arith.constant 3 : i32
    %149 = arith.subi %c3_i32_31, %c1_i32 : i32
    %150 = arith.index_cast %149 : i32 to index
    %c0_32 = arith.constant 0 : index
    %c0_33 = arith.constant 0 : index
    %151 = vector.load %arg4[%150, %c0_32, %c0_33] : memref<4x2x32xf32, #tpu.memory_space<vmem>>, vector<1x2x32xf32>
    %152 = vector.shape_cast %151 : vector<1x2x32xf32> to vector<2x32xf32>
    %153 = vector.shape_cast %144 : vector<2x32xf32> to vector<1x2x32xf32>
    tpu.vector_store %arg4[%150, %c0_32, %c0_33], %153 {strides = array<i32>} : memref<4x2x32xf32, #tpu.memory_space<vmem>>, vector<1x2x32xf32>,
    %154 = tpu.concatenate %118, %144 in 1 : vector<2x32xf32>, vector<2x32xf32> -> vector<2x64xf32>
    %155 = tpu.concatenate %116, %142 in 1 : vector<2x32xf32>, vector<2x32xf32> -> vector<2x64xf32>
    %c2_i32 = arith.constant 2 : i32
    %cst_34 = arith.constant dense<0.000000e+00> : vector<2x256xf32>
    %156 = tpu.matmul %154, %0, %cst_34 {dimension_numbers = #tpu.dot_dimension_numbers<[1], [0], [0], [1], [0, 0, 1, 1], [], []>} : vector<2x64xf32>, vector<64x256xf32>, vector<2x256xf32> -> vector<2x256xf32>
    %157 = arith.index_cast %c2_i32 : i32 to index
    %c0_35 = arith.constant 0 : index
    %c0_36 = arith.constant 0 : index
    %158 = vector.load %arg0[%157, %c0_35, %c0_36] : memref<4x2x256xf32, #tpu.memory_space<vmem>>, vector<1x2x256xf32>
    %159 = vector.shape_cast %158 : vector<1x2x256xf32> to vector<2x256xf32>
    %160 = vector.extract_strided_slice %159 {offsets = [0, 0], sizes = [2, 128], strides = [1, 1]} : vector<2x256xf32> to vector<2x128xf32>
    %161 = vector.extract_strided_slice %156 {offsets = [0, 0], sizes = [2, 128], strides = [1, 1]} : vector<2x256xf32> to vector<2x128xf32>
    %162 = arith.addf %160, %161 : vector<2x128xf32>
    %c3_i32_37 = arith.constant 3 : i32
    %163 = arith.subi %c3_i32_37, %c2_i32 : i32
    %164 = arith.index_cast %163 : i32 to index
    %c0_38 = arith.constant 0 : index
    %c0_39 = arith.constant 0 : index
    %165 = vector.load %arg0[%164, %c0_38, %c0_39] : memref<4x2x256xf32, #tpu.memory_space<vmem>>, vector<1x2x256xf32>
    %166 = vector.shape_cast %165 : vector<1x2x256xf32> to vector<2x256xf32>
    %167 = vector.extract_strided_slice %166 {offsets = [0, 128], sizes = [2, 128], strides = [1, 1]} : vector<2x256xf32> to vector<2x128xf32>
    %168 = vector.extract_strided_slice %156 {offsets = [0, 128], sizes = [2, 128], strides = [1, 1]} : vector<2x256xf32> to vector<2x128xf32>
    %169 = arith.addf %167, %168 : vector<2x128xf32>
    %170 = vector.extract_strided_slice %155 {offsets = [0, 0], sizes = [2, 32], strides = [1, 1]} : vector<2x64xf32> to vector<2x32xf32>
    %171 = vector.extract_strided_slice %162 {offsets = [0, 0], sizes = [2, 32], strides = [1, 1]} : vector<2x128xf32> to vector<2x32xf32>
    %172 = arith.negf %171 : vector<2x32xf32>
    %173 = math.exp %172 : vector<2x32xf32>
    %cst_40 = arith.constant 1.000000e+00 : f32
    %174 = vector.broadcast %cst_40 : f32 to vector<2x32xf32>
    %175 = arith.addf %174, %173 : vector<2x32xf32>
    %176 = arith.divf %174, %175 : vector<2x32xf32>
    %177 = vector.extract_strided_slice %162 {offsets = [0, 32], sizes = [2, 32], strides = [1, 1]} : vector<2x128xf32> to vector<2x32xf32>
    %178 = arith.negf %177 : vector<2x32xf32>
    %179 = math.exp %178 : vector<2x32xf32>
    %cst_41 = arith.constant 1.000000e+00 : f32
    %180 = vector.broadcast %cst_41 : f32 to vector<2x32xf32>
    %181 = arith.addf %180, %179 : vector<2x32xf32>
    %182 = arith.divf %180, %181 : vector<2x32xf32>
    %183 = vector.extract_strided_slice %162 {offsets = [0, 64], sizes = [2, 32], strides = [1, 1]} : vector<2x128xf32> to vector<2x32xf32>
    %184 = math.tanh %183 : vector<2x32xf32>
    %185 = vector.extract_strided_slice %162 {offsets = [0, 96], sizes = [2, 32], strides = [1, 1]} : vector<2x128xf32> to vector<2x32xf32>
    %186 = arith.negf %185 : vector<2x32xf32>
    %187 = math.exp %186 : vector<2x32xf32>
    %cst_42 = arith.constant 1.000000e+00 : f32
    %188 = vector.broadcast %cst_42 : f32 to vector<2x32xf32>
    %189 = arith.addf %188, %187 : vector<2x32xf32>
    %190 = arith.divf %188, %189 : vector<2x32xf32>
    %191 = arith.mulf %182, %170 : vector<2x32xf32>
    %192 = arith.mulf %176, %184 : vector<2x32xf32>
    %193 = arith.addf %191, %192 : vector<2x32xf32>
    %194 = math.tanh %193 : vector<2x32xf32>
    %195 = arith.mulf %190, %194 : vector<2x32xf32>
    %196 = vector.extract_strided_slice %155 {offsets = [0, 32], sizes = [2, 32], strides = [1, 1]} : vector<2x64xf32> to vector<2x32xf32>
    %197 = vector.extract_strided_slice %169 {offsets = [0, 0], sizes = [2, 32], strides = [1, 1]} : vector<2x128xf32> to vector<2x32xf32>
    %198 = arith.negf %197 : vector<2x32xf32>
    %199 = math.exp %198 : vector<2x32xf32>
    %cst_43 = arith.constant 1.000000e+00 : f32
    %200 = vector.broadcast %cst_43 : f32 to vector<2x32xf32>
    %201 = arith.addf %200, %199 : vector<2x32xf32>
    %202 = arith.divf %200, %201 : vector<2x32xf32>
    %203 = vector.extract_strided_slice %169 {offsets = [0, 32], sizes = [2, 32], strides = [1, 1]} : vector<2x128xf32> to vector<2x32xf32>
    %204 = arith.negf %203 : vector<2x32xf32>
    %205 = math.exp %204 : vector<2x32xf32>
    %cst_44 = arith.constant 1.000000e+00 : f32
    %206 = vector.broadcast %cst_44 : f32 to vector<2x32xf32>
    %207 = arith.addf %206, %205 : vector<2x32xf32>
    %208 = arith.divf %206, %207 : vector<2x32xf32>
    %209 = vector.extract_strided_slice %169 {offsets = [0, 64], sizes = [2, 32], strides = [1, 1]} : vector<2x128xf32> to vector<2x32xf32>
    %210 = math.tanh %209 : vector<2x32xf32>
    %211 = vector.extract_strided_slice %169 {offsets = [0, 96], sizes = [2, 32], strides = [1, 1]} : vector<2x128xf32> to vector<2x32xf32>
    %212 = arith.negf %211 : vector<2x32xf32>
    %213 = math.exp %212 : vector<2x32xf32>
    %cst_45 = arith.constant 1.000000e+00 : f32
    %214 = vector.broadcast %cst_45 : f32 to vector<2x32xf32>
    %215 = arith.addf %214, %213 : vector<2x32xf32>
    %216 = arith.divf %214, %215 : vector<2x32xf32>
    %217 = arith.mulf %208, %196 : vector<2x32xf32>
    %218 = arith.mulf %202, %210 : vector<2x32xf32>
    %219 = arith.addf %217, %218 : vector<2x32xf32>
    %220 = math.tanh %219 : vector<2x32xf32>
    %221 = arith.mulf %216, %220 : vector<2x32xf32>
    %222 = arith.index_cast %c2_i32 : i32 to index
    %c0_46 = arith.constant 0 : index
    %c0_47 = arith.constant 0 : index
    %223 = vector.load %arg3[%222, %c0_46, %c0_47] : memref<4x2x32xf32, #tpu.memory_space<vmem>>, vector<1x2x32xf32>
    %224 = vector.shape_cast %223 : vector<1x2x32xf32> to vector<2x32xf32>
    %225 = vector.shape_cast %195 : vector<2x32xf32> to vector<1x2x32xf32>
    tpu.vector_store %arg3[%222, %c0_46, %c0_47], %225 {strides = array<i32>} : memref<4x2x32xf32, #tpu.memory_space<vmem>>, vector<1x2x32xf32>,
    %c3_i32_48 = arith.constant 3 : i32
    %226 = arith.subi %c3_i32_48, %c2_i32 : i32
    %227 = arith.index_cast %226 : i32 to index
    %c0_49 = arith.constant 0 : index
    %c0_50 = arith.constant 0 : index
    %228 = vector.load %arg4[%227, %c0_49, %c0_50] : memref<4x2x32xf32, #tpu.memory_space<vmem>>, vector<1x2x32xf32>
    %229 = vector.shape_cast %228 : vector<1x2x32xf32> to vector<2x32xf32>
    %230 = vector.shape_cast %221 : vector<2x32xf32> to vector<1x2x32xf32>
    tpu.vector_store %arg4[%227, %c0_49, %c0_50], %230 {strides = array<i32>} : memref<4x2x32xf32, #tpu.memory_space<vmem>>, vector<1x2x32xf32>,
    %231 = tpu.concatenate %195, %221 in 1 : vector<2x32xf32>, vector<2x32xf32> -> vector<2x64xf32>
    %232 = tpu.concatenate %193, %219 in 1 : vector<2x32xf32>, vector<2x32xf32> -> vector<2x64xf32>
    %c3_i32_51 = arith.constant 3 : i32
    %cst_52 = arith.constant dense<0.000000e+00> : vector<2x256xf32>
    %233 = tpu.matmul %231, %0, %cst_52 {dimension_numbers = #tpu.dot_dimension_numbers<[1], [0], [0], [1], [0, 0, 1, 1], [], []>} : vector<2x64xf32>, vector<64x256xf32>, vector<2x256xf32> -> vector<2x256xf32>
    %234 = arith.index_cast %c3_i32_51 : i32 to index
    %c0_53 = arith.constant 0 : index
    %c0_54 = arith.constant 0 : index
    %235 = vector.load %arg0[%234, %c0_53, %c0_54] : memref<4x2x256xf32, #tpu.memory_space<vmem>>, vector<1x2x256xf32>
    %236 = vector.shape_cast %235 : vector<1x2x256xf32> to vector<2x256xf32>
    %237 = vector.extract_strided_slice %236 {offsets = [0, 0], sizes = [2, 128], strides = [1, 1]} : vector<2x256xf32> to vector<2x128xf32>
    %238 = vector.extract_strided_slice %233 {offsets = [0, 0], sizes = [2, 128], strides = [1, 1]} : vector<2x256xf32> to vector<2x128xf32>
    %239 = arith.addf %237, %238 : vector<2x128xf32>
    %c3_i32_55 = arith.constant 3 : i32
    %240 = arith.subi %c3_i32_55, %c3_i32_51 : i32
    %241 = arith.index_cast %240 : i32 to index
    %c0_56 = arith.constant 0 : index
    %c0_57 = arith.constant 0 : index
    %242 = vector.load %arg0[%241, %c0_56, %c0_57] : memref<4x2x256xf32, #tpu.memory_space<vmem>>, vector<1x2x256xf32>
    %243 = vector.shape_cast %242 : vector<1x2x256xf32> to vector<2x256xf32>
    %244 = vector.extract_strided_slice %243 {offsets = [0, 128], sizes = [2, 128], strides = [1, 1]} : vector<2x256xf32> to vector<2x128xf32>
    %245 = vector.extract_strided_slice %233 {offsets = [0, 128], sizes = [2, 128], strides = [1, 1]} : vector<2x256xf32> to vector<2x128xf32>
    %246 = arith.addf %244, %245 : vector<2x128xf32>
    %247 = vector.extract_strided_slice %232 {offsets = [0, 0], sizes = [2, 32], strides = [1, 1]} : vector<2x64xf32> to vector<2x32xf32>
    %248 = vector.extract_strided_slice %239 {offsets = [0, 0], sizes = [2, 32], strides = [1, 1]} : vector<2x128xf32> to vector<2x32xf32>
    %249 = arith.negf %248 : vector<2x32xf32>
    %250 = math.exp %249 : vector<2x32xf32>
    %cst_58 = arith.constant 1.000000e+00 : f32
    %251 = vector.broadcast %cst_58 : f32 to vector<2x32xf32>
    %252 = arith.addf %251, %250 : vector<2x32xf32>
    %253 = arith.divf %251, %252 : vector<2x32xf32>
    %254 = vector.extract_strided_slice %239 {offsets = [0, 32], sizes = [2, 32], strides = [1, 1]} : vector<2x128xf32> to vector<2x32xf32>
    %255 = arith.negf %254 : vector<2x32xf32>
    %256 = math.exp %255 : vector<2x32xf32>
    %cst_59 = arith.constant 1.000000e+00 : f32
    %257 = vector.broadcast %cst_59 : f32 to vector<2x32xf32>
    %258 = arith.addf %257, %256 : vector<2x32xf32>
    %259 = arith.divf %257, %258 : vector<2x32xf32>
    %260 = vector.extract_strided_slice %239 {offsets = [0, 64], sizes = [2, 32], strides = [1, 1]} : vector<2x128xf32> to vector<2x32xf32>
    %261 = math.tanh %260 : vector<2x32xf32>
    %262 = vector.extract_strided_slice %239 {offsets = [0, 96], sizes = [2, 32], strides = [1, 1]} : vector<2x128xf32> to vector<2x32xf32>
    %263 = arith.negf %262 : vector<2x32xf32>
    %264 = math.exp %263 : vector<2x32xf32>
    %cst_60 = arith.constant 1.000000e+00 : f32
    %265 = vector.broadcast %cst_60 : f32 to vector<2x32xf32>
    %266 = arith.addf %265, %264 : vector<2x32xf32>
    %267 = arith.divf %265, %266 : vector<2x32xf32>
    %268 = arith.mulf %259, %247 : vector<2x32xf32>
    %269 = arith.mulf %253, %261 : vector<2x32xf32>
    %270 = arith.addf %268, %269 : vector<2x32xf32>
    %271 = math.tanh %270 : vector<2x32xf32>
    %272 = arith.mulf %267, %271 : vector<2x32xf32>
    %273 = vector.extract_strided_slice %232 {offsets = [0, 32], sizes = [2, 32], strides = [1, 1]} : vector<2x64xf32> to vector<2x32xf32>
    %274 = vector.extract_strided_slice %246 {offsets = [0, 0], sizes = [2, 32], strides = [1, 1]} : vector<2x128xf32> to vector<2x32xf32>
    %275 = arith.negf %274 : vector<2x32xf32>
    %276 = math.exp %275 : vector<2x32xf32>
    %cst_61 = arith.constant 1.000000e+00 : f32
    %277 = vector.broadcast %cst_61 : f32 to vector<2x32xf32>
    %278 = arith.addf %277, %276 : vector<2x32xf32>
    %279 = arith.divf %277, %278 : vector<2x32xf32>
    %280 = vector.extract_strided_slice %246 {offsets = [0, 32], sizes = [2, 32], strides = [1, 1]} : vector<2x128xf32> to vector<2x32xf32>
    %281 = arith.negf %280 : vector<2x32xf32>
    %282 = math.exp %281 : vector<2x32xf32>
    %cst_62 = arith.constant 1.000000e+00 : f32
    %283 = vector.broadcast %cst_62 : f32 to vector<2x32xf32>
    %284 = arith.addf %283, %282 : vector<2x32xf32>
    %285 = arith.divf %283, %284 : vector<2x32xf32>
    %286 = vector.extract_strided_slice %246 {offsets = [0, 64], sizes = [2, 32], strides = [1, 1]} : vector<2x128xf32> to vector<2x32xf32>
    %287 = math.tanh %286 : vector<2x32xf32>
    %288 = vector.extract_strided_slice %246 {offsets = [0, 96], sizes = [2, 32], strides = [1, 1]} : vector<2x128xf32> to vector<2x32xf32>
    %289 = arith.negf %288 : vector<2x32xf32>
    %290 = math.exp %289 : vector<2x32xf32>
    %cst_63 = arith.constant 1.000000e+00 : f32
    %291 = vector.broadcast %cst_63 : f32 to vector<2x32xf32>
    %292 = arith.addf %291, %290 : vector<2x32xf32>
    %293 = arith.divf %291, %292 : vector<2x32xf32>
    %294 = arith.mulf %285, %273 : vector<2x32xf32>
    %295 = arith.mulf %279, %287 : vector<2x32xf32>
    %296 = arith.addf %294, %295 : vector<2x32xf32>
    %297 = math.tanh %296 : vector<2x32xf32>
    %298 = arith.mulf %293, %297 : vector<2x32xf32>
    %299 = arith.index_cast %c3_i32_51 : i32 to index
    %c0_64 = arith.constant 0 : index
    %c0_65 = arith.constant 0 : index
    %300 = vector.load %arg3[%299, %c0_64, %c0_65] : memref<4x2x32xf32, #tpu.memory_space<vmem>>, vector<1x2x32xf32>
    %301 = vector.shape_cast %300 : vector<1x2x32xf32> to vector<2x32xf32>
    %302 = vector.shape_cast %272 : vector<2x32xf32> to vector<1x2x32xf32>
    tpu.vector_store %arg3[%299, %c0_64, %c0_65], %302 {strides = array<i32>} : memref<4x2x32xf32, #tpu.memory_space<vmem>>, vector<1x2x32xf32>,
    %c3_i32_66 = arith.constant 3 : i32
    %303 = arith.subi %c3_i32_66, %c3_i32_51 : i32
    %304 = arith.index_cast %303 : i32 to index
    %c0_67 = arith.constant 0 : index
    %c0_68 = arith.constant 0 : index
    %305 = vector.load %arg4[%304, %c0_67, %c0_68] : memref<4x2x32xf32, #tpu.memory_space<vmem>>, vector<1x2x32xf32>
    %306 = vector.shape_cast %305 : vector<1x2x32xf32> to vector<2x32xf32>
    %307 = vector.shape_cast %298 : vector<2x32xf32> to vector<1x2x32xf32>
    tpu.vector_store %arg4[%304, %c0_67, %c0_68], %307 {strides = array<i32>} : memref<4x2x32xf32, #tpu.memory_space<vmem>>, vector<1x2x32xf32>,
    %308 = tpu.concatenate %272, %298 in 1 : vector<2x32xf32>, vector<2x32xf32> -> vector<2x64xf32>
    %309 = tpu.concatenate %270, %296 in 1 : vector<2x32xf32>, vector<2x32xf32> -> vector<2x64xf32>
    %c4_i32 = arith.constant 4 : i32
    %c0_69 = arith.constant 0 : index
    %c0_70 = arith.constant 0 : index
    %c0_71 = arith.constant 0 : index
    %310 = vector.load %arg3[%c0_69, %c0_70, %c0_71] : memref<4x2x32xf32, #tpu.memory_space<vmem>>, vector<4x2x32xf32>
    %c0_72 = arith.constant 0 : index
    %c0_73 = arith.constant 0 : index
    %c0_74 = arith.constant 0 : index
    %311 = vector.load %arg4[%c0_72, %c0_73, %c0_74] : memref<4x2x32xf32, #tpu.memory_space<vmem>>, vector<4x2x32xf32>
    %312 = tpu.concatenate %310, %311 in 2 : vector<4x2x32xf32>, vector<4x2x32xf32> -> vector<4x2x64xf32>
    %c0_75 = arith.constant 0 : index
    %c0_76 = arith.constant 0 : index
    %c0_77 = arith.constant 0 : index
    %313 = vector.load %arg2[%c0_75, %c0_76, %c0_77] : memref<4x2x64xf32, #tpu.memory_space<vmem>>, vector<4x2x64xf32>
    tpu.vector_store %arg2[%c0_75, %c0_76, %c0_77], %312 {strides = array<i32>} : memref<4x2x64xf32, #tpu.memory_space<vmem>>, vector<4x2x64xf32>,
    return
  }
}

module attributes {stable_mosaic.version = 11 : i64} {
  func.func @_attn_fc_kernel(%arg0: memref<2x8x64xf32, #tpu.memory_space<vmem>>, %arg1: memref<2x4x64xf32, #tpu.memory_space<vmem>>, %arg2: memref<64x64xf32, #tpu.memory_space<vmem>>, %arg3: memref<1x64xf32, #tpu.memory_space<vmem>>, %arg4: memref<64x1xf32, #tpu.memory_space<vmem>>, %arg5: memref<128x3xf32, #tpu.memory_space<vmem>>, %arg6: memref<1x3xf32, #tpu.memory_space<vmem>>, %arg7: memref<2x3xf32, #tpu.memory_space<vmem>>) attributes {dimension_semantics = [], scalar_prefetch = 0 : i64, scratch_operands = 0 : i64, tpu.core_type = #tpu.core_type<tc>} {
    %c0 = arith.constant 0 : index
    %c0_0 = arith.constant 0 : index
    %0 = vector.load %arg2[%c0, %c0_0] : memref<64x64xf32, #tpu.memory_space<vmem>>, vector<64x64xf32>
    %c0_1 = arith.constant 0 : index
    %c0_2 = arith.constant 0 : index
    %1 = vector.load %arg3[%c0_1, %c0_2] : memref<1x64xf32, #tpu.memory_space<vmem>>, vector<1x64xf32>
    %c0_3 = arith.constant 0 : index
    %c0_4 = arith.constant 0 : index
    %2 = vector.load %arg4[%c0_3, %c0_4] : memref<64x1xf32, #tpu.memory_space<vmem>>, vector<64x1xf32>
    %c0_5 = arith.constant 0 : index
    %c0_6 = arith.constant 0 : index
    %c0_7 = arith.constant 0 : index
    %3 = vector.load %arg0[%c0_5, %c0_6, %c0_7] : memref<2x8x64xf32, #tpu.memory_space<vmem>>, vector<1x8x64xf32>
    %4 = vector.shape_cast %3 : vector<1x8x64xf32> to vector<8x64xf32>
    %cst = arith.constant dense<0.000000e+00> : vector<8x64xf32>
    %5 = tpu.matmul %4, %0, %cst {dimension_numbers = #tpu.dot_dimension_numbers<[1], [0], [0], [1], [0, 0, 1, 1], [], []>} : vector<8x64xf32>, vector<64x64xf32>, vector<8x64xf32> -> vector<8x64xf32>
    %6 = vector.broadcast %1 : vector<1x64xf32> to vector<8x64xf32>
    %7 = arith.addf %5, %6 : vector<8x64xf32>
    %8 = math.tanh %7 : vector<8x64xf32>
    %cst_8 = arith.constant dense<0.000000e+00> : vector<8x1xf32>
    %9 = tpu.matmul %8, %2, %cst_8 {dimension_numbers = #tpu.dot_dimension_numbers<[1], [0], [0], [1], [0, 0, 1, 1], [], []>} : vector<8x64xf32>, vector<64x1xf32>, vector<8x1xf32> -> vector<8x1xf32>
    %cst_9 = arith.constant dense<0xFF800000> : vector<1xf32>
    %10 = vector.multi_reduction <maximumf>, %9, %cst_9 [0] : vector<8x1xf32> to vector<1xf32>
    %11 = vector.shape_cast %10 : vector<1xf32> to vector<1x1xf32>
    %12 = vector.broadcast %11 : vector<1x1xf32> to vector<8x1xf32>
    %13 = arith.subf %9, %12 : vector<8x1xf32>
    %14 = math.exp %13 : vector<8x1xf32>
    %cst_10 = arith.constant dense<0.000000e+00> : vector<1xf32>
    %15 = vector.multi_reduction <add>, %14, %cst_10 [0] : vector<8x1xf32> to vector<1xf32>
    %16 = vector.shape_cast %15 : vector<1xf32> to vector<1x1xf32>
    %17 = vector.broadcast %16 : vector<1x1xf32> to vector<8x1xf32>
    %18 = arith.divf %14, %17 : vector<8x1xf32>
    %19 = vector.broadcast %18 : vector<8x1xf32> to vector<8x64xf32>
    %20 = arith.mulf %19, %4 : vector<8x64xf32>
    %cst_11 = arith.constant dense<0.000000e+00> : vector<64xf32>
    %21 = vector.multi_reduction <add>, %20, %cst_11 [0] : vector<8x64xf32> to vector<64xf32>
    %22 = vector.shape_cast %21 : vector<64xf32> to vector<1x64xf32>
    %c1 = arith.constant 1 : index
    %c0_12 = arith.constant 0 : index
    %c0_13 = arith.constant 0 : index
    %23 = vector.load %arg0[%c1, %c0_12, %c0_13] : memref<2x8x64xf32, #tpu.memory_space<vmem>>, vector<1x8x64xf32>
    %24 = vector.shape_cast %23 : vector<1x8x64xf32> to vector<8x64xf32>
    %cst_14 = arith.constant dense<0.000000e+00> : vector<8x64xf32>
    %25 = tpu.matmul %24, %0, %cst_14 {dimension_numbers = #tpu.dot_dimension_numbers<[1], [0], [0], [1], [0, 0, 1, 1], [], []>} : vector<8x64xf32>, vector<64x64xf32>, vector<8x64xf32> -> vector<8x64xf32>
    %26 = vector.broadcast %1 : vector<1x64xf32> to vector<8x64xf32>
    %27 = arith.addf %25, %26 : vector<8x64xf32>
    %28 = math.tanh %27 : vector<8x64xf32>
    %cst_15 = arith.constant dense<0.000000e+00> : vector<8x1xf32>
    %29 = tpu.matmul %28, %2, %cst_15 {dimension_numbers = #tpu.dot_dimension_numbers<[1], [0], [0], [1], [0, 0, 1, 1], [], []>} : vector<8x64xf32>, vector<64x1xf32>, vector<8x1xf32> -> vector<8x1xf32>
    %cst_16 = arith.constant dense<0xFF800000> : vector<1xf32>
    %30 = vector.multi_reduction <maximumf>, %29, %cst_16 [0] : vector<8x1xf32> to vector<1xf32>
    %31 = vector.shape_cast %30 : vector<1xf32> to vector<1x1xf32>
    %32 = vector.broadcast %31 : vector<1x1xf32> to vector<8x1xf32>
    %33 = arith.subf %29, %32 : vector<8x1xf32>
    %34 = math.exp %33 : vector<8x1xf32>
    %cst_17 = arith.constant dense<0.000000e+00> : vector<1xf32>
    %35 = vector.multi_reduction <add>, %34, %cst_17 [0] : vector<8x1xf32> to vector<1xf32>
    %36 = vector.shape_cast %35 : vector<1xf32> to vector<1x1xf32>
    %37 = vector.broadcast %36 : vector<1x1xf32> to vector<8x1xf32>
    %38 = arith.divf %34, %37 : vector<8x1xf32>
    %39 = vector.broadcast %38 : vector<8x1xf32> to vector<8x64xf32>
    %40 = arith.mulf %39, %24 : vector<8x64xf32>
    %cst_18 = arith.constant dense<0.000000e+00> : vector<64xf32>
    %41 = vector.multi_reduction <add>, %40, %cst_18 [0] : vector<8x64xf32> to vector<64xf32>
    %42 = vector.shape_cast %41 : vector<64xf32> to vector<1x64xf32>
    %43 = tpu.concatenate %22, %42 in 0 : vector<1x64xf32>, vector<1x64xf32> -> vector<2x64xf32>
    %c0_19 = arith.constant 0 : index
    %c0_20 = arith.constant 0 : index
    %c0_21 = arith.constant 0 : index
    %44 = vector.load %arg1[%c0_19, %c0_20, %c0_21] : memref<2x4x64xf32, #tpu.memory_space<vmem>>, vector<1x4x64xf32>
    %45 = vector.shape_cast %44 : vector<1x4x64xf32> to vector<4x64xf32>
    %cst_22 = arith.constant dense<0.000000e+00> : vector<4x64xf32>
    %46 = tpu.matmul %45, %0, %cst_22 {dimension_numbers = #tpu.dot_dimension_numbers<[1], [0], [0], [1], [0, 0, 1, 1], [], []>} : vector<4x64xf32>, vector<64x64xf32>, vector<4x64xf32> -> vector<4x64xf32>
    %47 = vector.broadcast %1 : vector<1x64xf32> to vector<4x64xf32>
    %48 = arith.addf %46, %47 : vector<4x64xf32>
    %49 = math.tanh %48 : vector<4x64xf32>
    %cst_23 = arith.constant dense<0.000000e+00> : vector<4x1xf32>
    %50 = tpu.matmul %49, %2, %cst_23 {dimension_numbers = #tpu.dot_dimension_numbers<[1], [0], [0], [1], [0, 0, 1, 1], [], []>} : vector<4x64xf32>, vector<64x1xf32>, vector<4x1xf32> -> vector<4x1xf32>
    %cst_24 = arith.constant dense<0xFF800000> : vector<1xf32>
    %51 = vector.multi_reduction <maximumf>, %50, %cst_24 [0] : vector<4x1xf32> to vector<1xf32>
    %52 = vector.shape_cast %51 : vector<1xf32> to vector<1x1xf32>
    %53 = vector.broadcast %52 : vector<1x1xf32> to vector<4x1xf32>
    %54 = arith.subf %50, %53 : vector<4x1xf32>
    %55 = math.exp %54 : vector<4x1xf32>
    %cst_25 = arith.constant dense<0.000000e+00> : vector<1xf32>
    %56 = vector.multi_reduction <add>, %55, %cst_25 [0] : vector<4x1xf32> to vector<1xf32>
    %57 = vector.shape_cast %56 : vector<1xf32> to vector<1x1xf32>
    %58 = vector.broadcast %57 : vector<1x1xf32> to vector<4x1xf32>
    %59 = arith.divf %55, %58 : vector<4x1xf32>
    %60 = vector.broadcast %59 : vector<4x1xf32> to vector<4x64xf32>
    %61 = arith.mulf %60, %45 : vector<4x64xf32>
    %cst_26 = arith.constant dense<0.000000e+00> : vector<64xf32>
    %62 = vector.multi_reduction <add>, %61, %cst_26 [0] : vector<4x64xf32> to vector<64xf32>
    %63 = vector.shape_cast %62 : vector<64xf32> to vector<1x64xf32>
    %c1_27 = arith.constant 1 : index
    %c0_28 = arith.constant 0 : index
    %c0_29 = arith.constant 0 : index
    %64 = vector.load %arg1[%c1_27, %c0_28, %c0_29] : memref<2x4x64xf32, #tpu.memory_space<vmem>>, vector<1x4x64xf32>
    %65 = vector.shape_cast %64 : vector<1x4x64xf32> to vector<4x64xf32>
    %cst_30 = arith.constant dense<0.000000e+00> : vector<4x64xf32>
    %66 = tpu.matmul %65, %0, %cst_30 {dimension_numbers = #tpu.dot_dimension_numbers<[1], [0], [0], [1], [0, 0, 1, 1], [], []>} : vector<4x64xf32>, vector<64x64xf32>, vector<4x64xf32> -> vector<4x64xf32>
    %67 = vector.broadcast %1 : vector<1x64xf32> to vector<4x64xf32>
    %68 = arith.addf %66, %67 : vector<4x64xf32>
    %69 = math.tanh %68 : vector<4x64xf32>
    %cst_31 = arith.constant dense<0.000000e+00> : vector<4x1xf32>
    %70 = tpu.matmul %69, %2, %cst_31 {dimension_numbers = #tpu.dot_dimension_numbers<[1], [0], [0], [1], [0, 0, 1, 1], [], []>} : vector<4x64xf32>, vector<64x1xf32>, vector<4x1xf32> -> vector<4x1xf32>
    %cst_32 = arith.constant dense<0xFF800000> : vector<1xf32>
    %71 = vector.multi_reduction <maximumf>, %70, %cst_32 [0] : vector<4x1xf32> to vector<1xf32>
    %72 = vector.shape_cast %71 : vector<1xf32> to vector<1x1xf32>
    %73 = vector.broadcast %72 : vector<1x1xf32> to vector<4x1xf32>
    %74 = arith.subf %70, %73 : vector<4x1xf32>
    %75 = math.exp %74 : vector<4x1xf32>
    %cst_33 = arith.constant dense<0.000000e+00> : vector<1xf32>
    %76 = vector.multi_reduction <add>, %75, %cst_33 [0] : vector<4x1xf32> to vector<1xf32>
    %77 = vector.shape_cast %76 : vector<1xf32> to vector<1x1xf32>
    %78 = vector.broadcast %77 : vector<1x1xf32> to vector<4x1xf32>
    %79 = arith.divf %75, %78 : vector<4x1xf32>
    %80 = vector.broadcast %79 : vector<4x1xf32> to vector<4x64xf32>
    %81 = arith.mulf %80, %65 : vector<4x64xf32>
    %cst_34 = arith.constant dense<0.000000e+00> : vector<64xf32>
    %82 = vector.multi_reduction <add>, %81, %cst_34 [0] : vector<4x64xf32> to vector<64xf32>
    %83 = vector.shape_cast %82 : vector<64xf32> to vector<1x64xf32>
    %84 = tpu.concatenate %63, %83 in 0 : vector<1x64xf32>, vector<1x64xf32> -> vector<2x64xf32>
    %85 = tpu.concatenate %43, %84 in 1 : vector<2x64xf32>, vector<2x64xf32> -> vector<2x128xf32>
    %c0_35 = arith.constant 0 : index
    %c0_36 = arith.constant 0 : index
    %86 = vector.load %arg5[%c0_35, %c0_36] : memref<128x3xf32, #tpu.memory_space<vmem>>, vector<128x3xf32>
    %cst_37 = arith.constant dense<0.000000e+00> : vector<2x3xf32>
    %87 = tpu.matmul %85, %86, %cst_37 {dimension_numbers = #tpu.dot_dimension_numbers<[1], [0], [0], [1], [0, 0, 1, 1], [], []>} : vector<2x128xf32>, vector<128x3xf32>, vector<2x3xf32> -> vector<2x3xf32>
    %c0_38 = arith.constant 0 : index
    %c0_39 = arith.constant 0 : index
    %88 = vector.load %arg6[%c0_38, %c0_39] : memref<1x3xf32, #tpu.memory_space<vmem>>, vector<1x3xf32>
    %89 = vector.broadcast %88 : vector<1x3xf32> to vector<2x3xf32>
    %90 = arith.addf %87, %89 : vector<2x3xf32>
    %c0_40 = arith.constant 0 : index
    %c0_41 = arith.constant 0 : index
    %91 = vector.load %arg7[%c0_40, %c0_41] : memref<2x3xf32, #tpu.memory_space<vmem>>, vector<2x3xf32>
    tpu.vector_store %arg7[%c0_40, %c0_41], %90 {strides = array<i32>} : memref<2x3xf32, #tpu.memory_space<vmem>>, vector<2x3xf32>,
    return
  }
}

</mosaic_0001>

<bundles_post_ra>
// kernel: bilstm_attention_forward.5
= control target key start
LH: loop header
LB: loop body
LE: loop exit
PB: predicated region body
PF: predicated region fallthrough
CT: control target
= control target key end

     0   :  { %s769_s0 = inlined_call_operand.vmem [shape: f32[2,8,64], index: 0, kind: input, shape index: {}]   ;;  %s770_s1 = inlined_call_operand.vmem [shape: f32[2,4,64], index: 1, kind: input, shape index: {}]   ;;  %s771_s2 = inlined_call_operand.vmem [shape: f32[64,64], index: 2, kind: input, shape index: {}]   ;;  %s772_s3 = inlined_call_operand.vmem [shape: f32[1,64], index: 3, kind: input, shape index: {}]   ;;  %s773_s4 = inlined_call_operand.vmem [shape: f32[64,1], index: 4, kind: input, shape index: {}]   ;;  %s774_s5 = inlined_call_operand.vmem [shape: f32[128,3], index: 5, kind: input, shape index: {}]   ;;  %s775_s6 = inlined_call_operand.vmem [shape: f32[1,3], index: 6, kind: input, shape index: {}]   ;;  %s776_s7 = inlined_call_operand.hbm [shape: f32[2,3], index: 7, kind: output, shape index: {}]  }
   0x1   :  { %v34_v0 = vld [vmem:[%s771_s2 + $0x38] sm:$0xff]  ;;  %v33_v1 = vld [vmem:[%s771_s2 + $0x30] sm:$0xff]  ;;  %v32_v2 = vld [vmem:[%s771_s2 + $0x28] sm:$0xff] }
   0x2   :  { %60 = vmatpush.msra.mxu1 %v34_v0  ;;  %155 = vmatpush.msra.mxu2 %v34_v0  ;;  %v31_v3 = vld [vmem:[%s771_s2 + $0x20] sm:$0xff]  ;;  %v43_v4 = vld [vmem:[%s773_s4 + $0x38] sm:$0xff]  ;;  %v42_v6 = vld [vmem:[%s773_s4 + $0x30] sm:$0xff] }
   0x3   :  { %250 = vmatpush.msra.mxu0 %v34_v0  ;;  %v30_v5 = vld [vmem:[%s771_s2 + $0x18] sm:$0xff]  ;;  %179 = vmatpush.msra.mxu3 %v43_v4 }
   0x4   :  { %61 = vmatpush.msra.mxu1 %v33_v1  ;;  %156 = vmatpush.msra.mxu2 %v33_v1 }
   0x5   :  { %251 = vmatpush.msra.mxu0 %v33_v1 }
   0x6   :  { %62 = vmatpush.msra.mxu1 %v32_v2  ;;  %157 = vmatpush.msra.mxu2 %v32_v2 }
   0x7   :  { %252 = vmatpush.msra.mxu0 %v32_v2 }
   0x8   :  { %63 = vmatpush.msra.mxu1 %v31_v3  ;;  %158 = vmatpush.msra.mxu2 %v31_v3 }
   0x9   :  { %12 = vsyncpa [#allocation3], 0  ;;  %v29_v7 = vld [vmem:[%s771_s2 + $0x10] sm:$0xff]  ;;  %253 = vmatpush.msra.mxu0 %v31_v3  ;;  %180 = vmatpush.msra.mxu3 %v42_v6  ;;  %v41_v8 = vld [vmem:[%s773_s4 + $0x28] sm:$0xff]  ;;  %vm48_vm0 = vcmask 523264   ;;  %vm96_vm1 = vcmask 7168  }
   0xa   :  { %64 = vmatpush.msra.mxu1 %v30_v5  ;;  %159 = vmatpush.msra.mxu2 %v30_v5  ;;  %v28_v9 = vld [vmem:[%s771_s2 + $0x8] sm:$0xff]  ;;  %v40_v10 = vld [vmem:[%s773_s4 + $0x20] sm:$0xff]  ;;  %v39_v14 = vld [vmem:[%s773_s4 + $0x18] sm:$0xff]  ;;  %vm286_vm2 = vcmask 3072   ;;  %s559_s17 = smov 64   ;;  %s560_s21 = smov [#allocation2]  }
   0xb   :  { %254 = vmatpush.msra.mxu0 %v30_v5  ;;  %181 = vmatpush.msra.mxu3 %v41_v8  ;;  %v27_v11 = vld [vmem:[%s771_s2] sm:$0xff]  ;;  %v645_v13 = vld [vmem:[%s769_s0 + $0x8] sm:$0xff]  ;;  %v38_v16 = vld [vmem:[%s773_s4 + $0x10] sm:$0xff]  ;;  %s480_s22 = sshll.u32 %s560_s21, 4  ;;  %s482_s25 = sshll.u32 %s776_s7, 4  ;;  %s481_s22 = int_to_ptr.vmem [resolvable:$true] %s480_s22  ;;  %s483_s25 = int_to_ptr.hbm [resolvable:$true] %s482_s25 }
   0xc   :  { %65 = vmatpush.msra.mxu1 %v29_v7  ;;  %160 = vmatpush.msra.mxu2 %v29_v7  ;;  %v640_v12 = vld [vmem:[%s769_s0] sm:$0xff]  ;;  %v37_v18 = vld [vmem:[%s773_s4 + $0x8] sm:$0xff] }
   0xd   :  { %255 = vmatpush.msra.mxu0 %v29_v7  ;;  %182 = vmatpush.msra.mxu3 %v40_v10  ;;  %v653_v15 = vld [vmem:[%s770_s1] sm:$0xf]  ;;  %v667_v17 = vld [vmem:[%s770_s1 + $0x4] sm:$0xf] }
   0xe   :  { %66 = vmatpush.msra.mxu1 %v28_v9  ;;  %161 = vmatpush.msra.mxu2 %v28_v9  ;;  %v36_v19 = vld [vmem:[%s773_s4] sm:$0xff] }
   0xf   :  { %256 = vmatpush.msra.mxu0 %v28_v9  ;;  %183 = vmatpush.msra.mxu3 %v39_v14  ;;  %v506_v20 = vld [vmem:[%s772_s3] ss:$0 sm:$0xff] }
  0x10   :  { %67 = vmatpush.msra.mxu1 %v27_v11  ;;  %162 = vmatpush.msra.mxu2 %v27_v11 }
  0x11   :  { %491 = vmatmul.msk.f32.vlgmr.msra.gmra.mxu1 %vm48_vm0, %v640_v12  ;;  %494 = vmatmul.msk.f32.vlgmr.msra.gmra.mxu2 %vm48_vm0, %v645_v13 }
  0x12   :  { %346 = vmatpush.msrb.mxu2 %v34_v0  ;;  %257 = vmatpush.msra.mxu0 %v27_v11 }
  0x13   :  { %496 = vmatmul.msk.f32.vlgmr.msra.gmra.mxu0 %vm48_vm0, %v653_v15  ;;  %84 = vmatpush.msrb.mxu1 %v43_v4 }
  0x14   :  { %347 = vmatpush.msrb.mxu2 %v33_v1  ;;  %184 = vmatpush.msra.mxu3 %v38_v16  ;;  %v558_v1 = vmov 0  }
  0x15   :  { %85 = vmatpush.msrb.mxu1 %v42_v6  ;;  %505 = vset.pattern.permute.xlu1 %v558_v1 }
  0x16   :  { %348 = vmatpush.msrb.mxu2 %v32_v2  ;;  %185 = vmatpush.msra.mxu3 %v37_v18 }
  0x17   :  { %86 = vmatpush.msrb.mxu1 %v41_v8  ;;  %504 = vset.pattern.permute.xlu0 %v558_v1 }
  0x18   :  { %349 = vmatpush.msrb.mxu2 %v31_v3  ;;  %186 = vmatpush.msra.mxu3 %v36_v19 }
  0x19   :  { %87 = vmatpush.msrb.mxu1 %v40_v10 }
  0x1a   :  { %350 = vmatpush.msrb.mxu2 %v30_v5  ;;  %370 = vmatpush.msrb.mxu3 %v43_v4 }
  0x1b   :  { %88 = vmatpush.msrb.mxu1 %v39_v14 }
  0x1c   :  { %351 = vmatpush.msrb.mxu2 %v29_v7  ;;  %371 = vmatpush.msrb.mxu3 %v42_v6 }
  0x1d   :  { %89 = vmatpush.msrb.mxu1 %v38_v16 }
  0x1e   :  { %352 = vmatpush.msrb.mxu2 %v28_v9  ;;  %372 = vmatpush.msrb.mxu3 %v41_v8 }
  0x1f   :  { %90 = vmatpush.msrb.mxu1 %v37_v18 }
  0x20   :  { %353 = vmatpush.msrb.mxu2 %v27_v11  ;;  %373 = vmatpush.msrb.mxu3 %v40_v10 }
  0x21   :  { %499 = vmatmul.msk.f32.vlgmr.msrb.gmra.mxu2 %vm48_vm0, %v667_v17  ;;  %91 = vmatpush.msrb.mxu1 %v36_v19 }
  0x22   :  { %374 = vmatpush.msrb.mxu3 %v39_v14 }
  0x23   :  { %274 = vmatpush.msra.mxu1 %v43_v4 }
  0x24   :  { %375 = vmatpush.msrb.mxu3 %v38_v16 }
  0x25   :  { %275 = vmatpush.msra.mxu1 %v42_v6 }
  0x26   :  { %376 = vmatpush.msrb.mxu3 %v37_v18 }
  0x27   :  { %276 = vmatpush.msra.mxu1 %v41_v8 }
  0x28   :  { %377 = vmatpush.msrb.mxu3 %v36_v19 }
  0x29   :  { %277 = vmatpush.msra.mxu1 %v40_v10 }
  0x2b   :  { %278 = vmatpush.msra.mxu1 %v39_v14 }
  0x2d   :  { %279 = vmatpush.msra.mxu1 %v38_v16 }
  0x2f   :  { %280 = vmatpush.msra.mxu1 %v37_v18 }
  0x31   :  { %281 = vmatpush.msra.mxu1 %v36_v19 }
  0x8e   :  { %v69_v21 = vpop.f32.mrf.mxu1 }
  0x8f   :  { %v70_v22 = vadd.f32 %v506_v20, %v69_v21 }
  0x90   :  { %v259_v23 = vpop.f32.mrf.mxu0 }
  0x91   :  { %508 = vtanh.f32 %v70_v22  ;;  %v260_v24 = vadd.f32 %v506_v20, %v259_v23 }
  0x93   :  { %510 = vtanh.f32 %v260_v24 }
  0x94   :  { %v164_v25 = vpop.f32.mrf.mxu2 }
  0x95   :  { %v165_v26 = vadd.f32 %v506_v20, %v164_v25 }
  0x97   :  { %v509_v27 = vpop.eup %508  ;;  %512 = vtanh.f32 %v165_v26 }
  0x98   :  { %492 = vmatmul.msk.f32.vlgmr.msrb.gmra.mxu1 %vm48_vm0, %v509_v27 }
  0x99   :  { %v511_v28 = vpop.eup %510 }
  0x9d   :  { %v513_v29 = vpop.eup %512 }
  0x9e   :  { %495 = vmatmul.msk.f32.vlgmr.msra.gmra.mxu3 %vm48_vm0, %v513_v29 }
  0xa0   :  { %497 = vmatmul.msk.f32.vlgmr.msra.gmra.mxu1 %vm48_vm0, %v511_v28 }
  0xa4   :  { %v355_v30 = vpop.f32.mrf.mxu2 }
  0xa5   :  { %v356_v31 = vadd.f32 %v506_v20, %v355_v30 }
  0xa7   :  { %514 = vtanh.f32 %v356_v31 }
  0xad   :  { %v515_v32 = vpop.eup %514 }
  0xae   :  { %500 = vmatmul.msk.f32.vlgmr.msrb.gmra.mxu3 %vm48_vm0, %v515_v32 }
 0x115   :  { %v93_v33 = vpop.f32.mrf.mxu1 }
 0x116   :  { %v97_v34 = vsel %vm96_vm1, %v93_v33, -inf }
 0x117   :  { %v98_v35 = vrot.slane %v97_v34, 4 }
 0x119   :  { %v99_v36 = vmax.f32 %v97_v34, %v98_v35 }
 0x11b   :  { %v100_v37 = vrot.slane %v99_v36, 2 }
 0x11d   :  { %v101_v38 = vmax.f32 %v99_v36, %v100_v37  ;;  %v283_v39 = vpop.f32.mrf.mxu1 }
 0x11e   :  { %v287_v40 = vsel %vm286_vm2, %v283_v39, -inf }
 0x11f   :  { %v102_v41 = vrot.slane %v101_v38, 1  ;;  %v288_v42 = vrot.slane %v287_v40, 4 }
 0x121   :  { %v103_v43 = vmax.f32 %v101_v38, %v102_v41  ;;  %v289_v44 = vmax.f32 %v287_v40, %v288_v42  ;;  %v188_v45 = vpop.f32.mrf.mxu3 }
 0x122   :  { %v191_v46 = vsel %vm96_vm1, %v188_v45, -inf }
 0x123   :  { %v104_v47 = vsub.f32 %v93_v33, %v103_v43  ;;  %v290_v48 = vrot.slane %v289_v44, 2  ;;  %v192_v49 = vrot.slane %v191_v46, 4 }
 0x125   :  { %v105_v50 = vmul.f32 1.442695, %v104_v47  ;;  %v291_v51 = vmax.f32 %v289_v44, %v290_v48  ;;  %v193_v52 = vmax.f32 %v191_v46, %v192_v49 }
 0x127   :  { %516 = vpow2.f32 %v105_v50  ;;  %v292_v53 = vrot.slane %v291_v51, 1  ;;  %v194_v54 = vrot.slane %v193_v52, 2 }
 0x129   :  { %v293_v55 = vmax.f32 %v291_v51, %v292_v53  ;;  %v195_v56 = vmax.f32 %v193_v52, %v194_v54 }
 0x12b   :  { %v294_v57 = vsub.f32 %v283_v39, %v293_v55  ;;  %v196_v58 = vrot.slane %v195_v56, 1 }
 0x12d   :  { %v687_v59 = vpop.eup %516  ;;  %v295_v60 = vmul.f32 1.442695, %v294_v57  ;;  %v197_v61 = vmax.f32 %v195_v56, %v196_v58 }
 0x12e   :  { %v107_v62 = vsel %vm96_vm1, %v687_v59, 0.0 }
 0x12f   :  { %v108_v63 = vrot.slane %v107_v62, 4  ;;  %518 = vpow2.f32 %v295_v60  ;;  %v198_v0 = vsub.f32 %v188_v45, %v197_v61 }
 0x131   :  { %v109_v2 = vadd.f32 %v108_v63, %v107_v62  ;;  %v199_v3 = vmul.f32 1.442695, %v198_v0  ;;  %v379_v4 = vpop.f32.mrf.mxu3 }
 0x132   :  { %v382_v5 = vsel %vm286_vm2, %v379_v4, -inf }
 0x133   :  { %v110_v6 = vrot.slane %v109_v2, 2  ;;  %520 = vpow2.f32 %v199_v3  ;;  %v383_v7 = vrot.slane %v382_v5, 4 }
 0x135   :  { %v692_v8 = vpop.eup %518  ;;  %v111_v9 = vadd.f32 %v110_v6, %v109_v2  ;;  %v384_v10 = vmax.f32 %v382_v5, %v383_v7 }
 0x136   :  { %v297_v11 = vsel %vm286_vm2, %v692_v8, 0.0 }
 0x137   :  { %v112_v14 = vrot.slane %v111_v9, 1  ;;  %v298_v16 = vrot.slane %v297_v11, 4  ;;  %v385_v18 = vrot.slane %v384_v10, 2 }
 0x139   :  { %v696_v19 = vpop.eup %520  ;;  %v113_v20 = vadd.f32 %v112_v14, %v111_v9  ;;  %v299_v21 = vadd.f32 %v298_v16, %v297_v11  ;;  %v386_v22 = vmax.f32 %v384_v10, %v385_v18 }
 0x13a   :  { %v201_v23 = vsel %vm96_vm1, %v696_v19, 0.0 }
 0x13b   :  { %522 = vrcp.f32 %v113_v20  ;;  %v300_v24 = vrot.slane %v299_v21, 2  ;;  %v202_v25 = vrot.slane %v201_v23, 4  ;;  %v387_v26 = vrot.slane %v386_v22, 1 }
 0x13c   :  { %v125_v41 = vand.u32 2147483648, %v113_v20  ;;  %v123_v43 = vand.u32 2147483647, %v113_v20  ;;  %vm119_vm4 = vweird.f32 %v113_v20 }
 0x13d   :  { %v301_v27 = vadd.f32 %v300_v24, %v299_v21  ;;  %v203_v28 = vadd.f32 %v202_v25, %v201_v23  ;;  %v388_v29 = vmax.f32 %v386_v22, %v387_v26 }
 0x13e   :  { %v126_v46 = vor.u32 1.1754944e-38, %v125_v41  ;;  %vm124_vm6 = vcmp.eq.f32.partialorder %v123_v43, 8.507059e+37 }
 0x13f   :  { %v302_v30 = vrot.slane %v301_v27, 1  ;;  %v204_v31 = vrot.slane %v203_v28, 2  ;;  %v389_v32 = vsub.f32 %v379_v4, %v388_v29 }
 0x141   :  { %v523_v33 = vpop.eup %522  ;;  %v303_v34 = vadd.f32 %v302_v30, %v301_v27  ;;  %v205_v35 = vadd.f32 %v204_v31, %v203_v28  ;;  %v390_v36 = vmul.f32 1.442695, %v389_v32  ;;  %v447_v32 = vld [vmem:[%s774_s5 + $0x70] sm:$0xff] }
 0x142   :  { %v115_v37 = vmul.f32 %v523_v33, %v113_v20  ;;  %vm120_vm3 = vweird.f32 %v523_v33 }
 0x143   :  { %524 = vrcp.f32 %v303_v34  ;;  %v206_v38 = vrot.slane %v205_v35, 1  ;;  %vm121_vm5 = vmor %vm119_vm4, %vm120_vm3  ;;  %v313_v56 = vand.u32 2147483647, %v303_v34  ;;  %v315_v57 = vand.u32 2147483648, %v303_v34 }
 0x144   :  { %526 = vpow2.f32 %v390_v36  ;;  %v116_v39 = vsub.f32 1.0, %v115_v37  ;;  %vm309_vm8 = vweird.f32 %v303_v34  ;;  %vm325_vm4 = vcmask 519168   ;;  %v444_v37 = vld [vmem:[%s774_s5 + $0x58] sm:$0xff] }
 0x145   :  { %v207_v40 = vadd.f32 %v206_v38, %v205_v35  ;;  %vm314_vm10 = vcmp.eq.f32.partialorder %v313_v56, 8.507059e+37  ;;  %v316_v1 = vor.u32 1.1754944e-38, %v315_v57  ;;  %v445_v35 = vld [vmem:[%s774_s5 + $0x60] sm:$0xff]  ;;  %v434_v57 = vld [vmem:[%s774_s5 + $0x8] sm:$0xff] }
 0x146   :  { %v117_v42 = vmul.f32 %v523_v33, %v116_v39  ;;  %v442_v39 = vld [vmem:[%s774_s5 + $0x48] sm:$0xff] }
 0x147   :  { %528 = vrcp.f32 %v207_v40  ;;  %v217_v2 = vand.u32 2147483647, %v207_v40  ;;  %v219_v3 = vand.u32 2147483648, %v207_v40  ;;  %vm213_vm12 = vweird.f32 %v207_v40 }
 0x148   :  { %v118_v44 = vadd.f32 %v523_v33, %v117_v42  ;;  %v440_v42 = vld [vmem:[%s774_s5 + $0x38] sm:$0xff] }
 0x149   :  { %v525_v45 = vpop.eup %524  ;;  %v220_v11 = vor.u32 1.1754944e-38, %v219_v3  ;;  %vm218_vm14 = vcmp.eq.f32.partialorder %v217_v2, 8.507059e+37 }
 0x14a   :  { %v527_v47 = vpop.eup %526  ;;  %v122_v48 = vsel %vm121_vm5, %v523_v33, %v118_v44  ;;  %v305_v49 = vmul.f32 %v525_v45, %v303_v34  ;;  %vm310_vm7 = vweird.f32 %v525_v45  ;;  %v446_v34 = vld [vmem:[%s774_s5 + $0x68] sm:$0xff]  ;;  %vm236_vm5 = vcmask 1040384  }
 0x14b   :  { %v392_v50 = vsel %vm286_vm2, %v527_v47, 0.0  ;;  %v127_v51 = vsel %vm124_vm6, %v126_v46, %v122_v48  ;;  %vm311_vm9 = vmor %vm309_vm8, %vm310_vm7  ;;  %v438_v48 = vld [vmem:[%s774_s5 + $0x28] sm:$0xff]  ;;  %vm473_vm6 = vcmask 17408  }
 0x14c   :  { %v393_v52 = vrot.slane %v392_v50, 4  ;;  %v128_v53 = vmul.f32 %v687_v59, %v127_v51  ;;  %v306_v54 = vsub.f32 1.0, %v305_v49 }
 0x14d   :  { %v529_v55 = vpop.eup %528 }
 0x14e   :  { %v394_v58 = vadd.f32 %v393_v52, %v392_v50  ;;  %131 = vperm.xlu1 %505, %v128_v53   ;;  %v307_v60 = vmul.f32 %v525_v45, %v306_v54  ;;  %v209_v61 = vmul.f32 %v529_v55, %v207_v40  ;;  %vm214_vm11 = vweird.f32 %v529_v55  ;;  %v441_v40 = vld [vmem:[%s774_s5 + $0x40] sm:$0xff]  ;;  %v436_v52 = vld [vmem:[%s774_s5 + $0x18] sm:$0xff]  ;;  %v435_v54 = vld [vmem:[%s774_s5 + $0x10] sm:$0xff] }
 0x14f   :  { %vm215_vm13 = vmor %vm213_vm12, %vm214_vm11  ;;  %v437_v50 = vld [vmem:[%s774_s5 + $0x20] sm:$0xff] }
 0x150   :  { %v395_v62 = vrot.slane %v394_v58, 2  ;;  %v308_v63 = vadd.f32 %v525_v45, %v307_v60  ;;  %v210_v0 = vsub.f32 1.0, %v209_v61 }
 0x152   :  { %v396_v4 = vadd.f32 %v395_v62, %v394_v58  ;;  %v312_v59 = vsel %vm311_vm9, %v525_v45, %v308_v63  ;;  %v211_v5 = vmul.f32 %v529_v55, %v210_v0  ;;  %v439_v45 = vld [vmem:[%s774_s5 + $0x30] sm:$0xff] }
 0x153   :  { %v317_v6 = vsel %vm314_vm10, %v316_v1, %v312_v59  ;;  %v433_v1 = vld [vmem:[%s774_s5] sm:$0xff] }
 0x154   :  { %v397_v7 = vrot.slane %v396_v4, 1  ;;  %v318_v9 = vmul.f32 %v692_v8, %v317_v6  ;;  %v212_v10 = vadd.f32 %v529_v55, %v211_v5 }
 0x156   :  { %v398_v14 = vadd.f32 %v397_v7, %v396_v4  ;;  %321 = vperm.xlu0 %504, %v318_v9   ;;  %v216_v16 = vsel %vm215_vm13, %v529_v55, %v212_v10 }
 0x157   :  { %v221_v18 = vsel %vm218_vm14, %v220_v11, %v216_v16 }
 0x158   :  { %530 = vrcp.f32 %v398_v14  ;;  %v222_v20 = vmul.f32 %v696_v19, %v221_v18  ;;  %v410_v24 = vand.u32 2147483648, %v398_v14  ;;  %v408_v8 = vand.u32 2147483647, %v398_v14  ;;  %v448_v19 = vld [vmem:[%s774_s5 + $0x78] sm:$0xff] }
 0x159   :  { %vm404_vm1 = vweird.f32 %v398_v14  ;;  %453 = vmatpush.msrb.mxu0 %v448_v19 }
 0x15a   :  { %225 = vperm.xlu1 %505, %v222_v20   ;;  %v411_v27 = vor.u32 1.1754944e-38, %v410_v24  ;;  %vm409_vm3 = vcmp.eq.f32.partialorder %v408_v8, 8.507059e+37  ;;  %v507_v24 = vld [vmem:[%s775_s6] ss:$0 sm:$0xff] }
 0x15b   :  { %454 = vmatpush.msrb.mxu0 %v447_v32 }
 0x15d   :  { %455 = vmatpush.msrb.mxu0 %v446_v34 }
 0x15e   :  { %v531_v21 = vpop.eup %530 }
 0x15f   :  { %v400_v22 = vmul.f32 %v531_v21, %v398_v14  ;;  %vm405_vm15 = vweird.f32 %v531_v21  ;;  %456 = vmatpush.msrb.mxu0 %v445_v35 }
 0x160   :  { %vm406_vm2 = vmor %vm404_vm1, %vm405_vm15 }
 0x161   :  { %v401_v23 = vsub.f32 1.0, %v400_v22  ;;  %457 = vmatpush.msrb.mxu0 %v444_v37 }
 0x163   :  { %v402_v25 = vmul.f32 %v531_v21, %v401_v23 }
 0x165   :  { %v403_v26 = vadd.f32 %v531_v21, %v402_v25 }
 0x167   :  { %v407_v28 = vsel %vm406_vm2, %v531_v21, %v403_v26 }
 0x168   :  { %v412_v29 = vsel %vm409_vm3, %v411_v27, %v407_v28 }
 0x169   :  { %v413_v30 = vmul.f32 %v527_v47, %v412_v29 }
 0x16b   :  { %416 = vperm.xlu0 %504, %v413_v30  }
 0x1c0   :  { %v132_v63 = vpop.permute.xlu1 %131 }
 0x1c1   :  { %v134_v3 = vmul.f32 %v132_v63, %v640_v12 }
 0x1c3   :  { %v135_v59 = vsel %vm48_vm0, %v134_v3, 0.0 }
 0x1c4   :  { %v136_v6 = vrot.slane %v135_v59, 4 }
 0x1c6   :  { %v137_v9 = vadd.f32 %v136_v6, %v135_v59 }
 0x1c8   :  { %v322_v31 = vpop.permute.xlu0 %321  ;;  %v138_v11 = vrot.slane %v137_v9, 2 }
 0x1c9   :  { %v324_v33 = vmul.f32 %v322_v31, %v653_v15  ;;  %v443_v15 = vld [vmem:[%s774_s5 + $0x50] sm:$0xff] }
 0x1ca   :  { %458 = vmatpush.msrb.mxu0 %v443_v15  ;;  %v139_v16 = vadd.f32 %v138_v11, %v137_v9 }
 0x1cb   :  { %v326_v36 = vsel %vm325_vm4, %v324_v33, 0.0 }
 0x1cc   :  { %v327_v38 = vrot.slane %v326_v36, 4  ;;  %459 = vmatpush.msrb.mxu0 %v442_v39  ;;  %v226_v0 = vpop.permute.xlu1 %225  ;;  %v140_v20 = vrot.slane %v139_v16, 1 }
 0x1cd   :  { %v228_v2 = vmul.f32 %v645_v13, %v226_v0 }
 0x1ce   :  { %v328_v41 = vadd.f32 %v327_v38, %v326_v36  ;;  %460 = vmatpush.msrb.mxu0 %v441_v40  ;;  %v141_v22 = vadd.f32 %v140_v20, %v139_v16 }
 0x1cf   :  { %v229_v4 = vsel %vm48_vm0, %v228_v2, 0.0 }
 0x1d0   :  { %v329_v46 = vrot.slane %v328_v41, 2  ;;  %461 = vmatpush.msrb.mxu0 %v440_v42  ;;  %v230_v5 = vrot.slane %v229_v4, 4 }
 0x1d2   :  { %462 = vmatpush.msrb.mxu0 %v439_v45  ;;  %v330_v51 = vadd.f32 %v329_v46, %v328_v41  ;;  %v231_v7 = vadd.f32 %v230_v5, %v229_v4 }
 0x1d4   :  { %463 = vmatpush.msrb.mxu0 %v438_v48  ;;  %v331_v56 = vrot.slane %v330_v51, 1  ;;  %v232_v10 = vrot.slane %v231_v7, 2 }
 0x1d6   :  { %464 = vmatpush.msrb.mxu0 %v437_v50  ;;  %v332_v60 = vadd.f32 %v331_v56, %v330_v51  ;;  %v233_v14 = vadd.f32 %v232_v10, %v231_v7 }
 0x1d8   :  { %465 = vmatpush.msrb.mxu0 %v436_v52  ;;  %v234_v18 = vrot.slane %v233_v14, 1 }
 0x1da   :  { %466 = vmatpush.msrb.mxu0 %v435_v54  ;;  %v235_v21 = vadd.f32 %v234_v18, %v233_v14 }
 0x1dc   :  { %467 = vmatpush.msrb.mxu0 %v434_v57  ;;  %v237_v23 = vsel %vm236_vm5, %v141_v22, %v235_v21 }
 0x1dd   :  { %v417_v43 = vpop.permute.xlu0 %416 }
 0x1de   :  { %v419_v44 = vmul.f32 %v667_v17, %v417_v43  ;;  %468 = vmatpush.msrb.mxu0 %v433_v1 }
 0x1e0   :  { %v420_v47 = vsel %vm325_vm4, %v419_v44, 0.0 }
 0x1e1   :  { %v421_v49 = vrot.slane %v420_v47, 4 }
 0x1e3   :  { %v422_v17 = vadd.f32 %v421_v49, %v420_v47 }
 0x1e5   :  { %v423_v53 = vrot.slane %v422_v17, 2 }
 0x1e7   :  { %v424_v55 = vadd.f32 %v423_v53, %v422_v17 }
 0x1e9   :  { %v425_v58 = vrot.slane %v424_v55, 1 }
 0x1eb   :  { %v426_v61 = vadd.f32 %v425_v58, %v424_v55 }
 0x1ed   :  { %v427_v62 = vsel %vm236_vm5, %v332_v60, %v426_v61 }
 0x1ee   :  { %429 = vrot.lane.b32.xlu2 %v427_v62, %s559_s17 }
 0x248   :  { %v430_v13 = vpop.permute.xlu2 %429 }
 0x249   :  { %v432_v12 = vsel %vm48_vm0, %v237_v23, %v430_v13 }
 0x24a   :  { %469 = vmatmul.f32.vlgmr.msrb.gmra.mxu0 %v432_v12 }
 0x2c7   :  { %v470_v25 = vpop.f32.mrf.mxu0 }
 0x2c8   :  { %v471_v8 = vadd.f32 %v507_v24, %v470_v25 }
 0x2ca   :  { %474 = vst.msk [vmem:[#allocation2] sm:$0x3] %vm473_vm6, %v471_v8 }
 0x2cb   :  { %485 = dma.vmem_to_hbm [thread:$0]  %s481_s22, 32, %s483_s25, [#allocation3]  }
 0x2cc   :  { %556 = dma.done.wait [#allocation3], 32  }
 0x2cd   :  { %557 = vsyncadd [#allocation3], 4294967264 }
 0x2ce   :  { %490 = vsyncpa [#allocation3], 1 }

// kernel: bilstm_attention_forward.4
= control target key start
LH: loop header
LB: loop body
LE: loop exit
PB: predicated region body
PF: predicated region fallthrough
CT: control target
= control target key end

     0   :  { %v782_v16 = vmov 0.0   ;;  %s783_s16 = smov 64   ;;  %s784_s17 = smov 32   ;;  %vm179_vm8 = vcmask 261120   ;;  %vm27_vm9 = vcmask 523264   ;;  %s987_s1 = inlined_call_operand.vmem [shape: f32[64,256], index: 1, kind: input, shape index: {}]   ;;  %s988_s0 = inlined_call_operand.vmem [shape: f32[4,2,256], index: 0, kind: input, shape index: {}]   ;;  %s989_s2 = inlined_call_operand.vmem [shape: f32[4,2,64], index: 2, kind: output, shape index: {}]  }
   0x1   :  { %v25_v0 = vld [vmem:[%s987_s1 + $0x70] sm:$0xff]  ;;  %v26_v1 = vld [vmem:[%s987_s1 + $0x78] sm:$0xff]  ;;  %v23_v2 = vld [vmem:[%s987_s1 + $0x60] sm:$0xff]  ;;  %s785_s18 = smov 96  }
   0x2   :  { %39 = vmatpush.msra.mxu0 %v25_v0  ;;  %59 = vmatpush.msra.mxu1 %v26_v1  ;;  %v24_v3 = vld [vmem:[%s987_s1 + $0x68] sm:$0xff]  ;;  %v21_v4 = vld [vmem:[%s987_s1 + $0x50] sm:$0xff]  ;;  %v22_v5 = vld [vmem:[%s987_s1 + $0x58] sm:$0xff] }
   0x3   :  { %199 = vmatpush.msra.mxu2 %v25_v0  ;;  %219 = vmatpush.msra.mxu3 %v26_v1  ;;  %v19_v6 = vld [vmem:[%s987_s1 + $0x40] sm:$0xff]  ;;  %v20_v7 = vld [vmem:[%s987_s1 + $0x48] sm:$0xff]  ;;  %v17_v8 = vld [vmem:[%s987_s1 + $0x30] sm:$0xff] }
   0x4   :  { %40 = vmatpush.msra.mxu0 %v23_v2  ;;  %60 = vmatpush.msra.mxu1 %v24_v3  ;;  %v18_v9 = vld [vmem:[%s987_s1 + $0x38] sm:$0xff]  ;;  %v15_v10 = vld [vmem:[%s987_s1 + $0x20] sm:$0xff]  ;;  %v16_v11 = vld [vmem:[%s987_s1 + $0x28] sm:$0xff] }
   0x5   :  { %200 = vmatpush.msra.mxu2 %v23_v2  ;;  %220 = vmatpush.msra.mxu3 %v24_v3  ;;  %v13_v12 = vld [vmem:[%s987_s1 + $0x10] sm:$0xff]  ;;  %v14_v13 = vld [vmem:[%s987_s1 + $0x18] sm:$0xff]  ;;  %v11_v14 = vld [vmem:[%s987_s1] sm:$0xff] }
   0x6   :  { %41 = vmatpush.msra.mxu0 %v21_v4  ;;  %61 = vmatpush.msra.mxu1 %v22_v5  ;;  %v12_v15 = vld [vmem:[%s987_s1 + $0x8] sm:$0xff]  ;;  %v71_v17 = vld [vmem:[%s988_s0] sm:$0xf] }
   0x7   :  { %201 = vmatpush.msra.mxu2 %v21_v4  ;;  %221 = vmatpush.msra.mxu3 %v22_v5  ;;  %v694_v19 = vld [vmem:[%s988_s0 + $0xc] sm:$0xf] }
   0x8   :  { %42 = vmatpush.msra.mxu0 %v19_v6  ;;  %62 = vmatpush.msra.mxu1 %v20_v7  ;;  %v76_v21 = vrot.slane %v694_v19, 2 }
   0x9   :  { %202 = vmatpush.msra.mxu2 %v19_v6  ;;  %222 = vmatpush.msra.mxu3 %v20_v7 }
   0xa   :  { %43 = vmatpush.msra.mxu0 %v17_v8  ;;  %63 = vmatpush.msra.mxu1 %v18_v9 }
   0xb   :  { %203 = vmatpush.msra.mxu2 %v17_v8  ;;  %223 = vmatpush.msra.mxu3 %v18_v9 }
   0xc   :  { %44 = vmatpush.msra.mxu0 %v15_v10  ;;  %64 = vmatpush.msra.mxu1 %v16_v11 }
   0xd   :  { %204 = vmatpush.msra.mxu2 %v15_v10  ;;  %224 = vmatpush.msra.mxu3 %v16_v11 }
   0xe   :  { %45 = vmatpush.msra.mxu0 %v13_v12  ;;  %65 = vmatpush.msra.mxu1 %v14_v13 }
   0xf   :  { %205 = vmatpush.msra.mxu2 %v13_v12  ;;  %225 = vmatpush.msra.mxu3 %v14_v13 }
  0x10   :  { %46 = vmatpush.msra.mxu0 %v11_v14  ;;  %66 = vmatpush.msra.mxu1 %v12_v15 }
  0x11   :  { %47 = vmatmul.f32.vlgmr.msra.gmra.mxu0 %v782_v16  ;;  %67 = vmatmul.f32.vlgmr.msra.gmra.mxu1 %v782_v16  ;;  %v699_v16 = vld [vmem:[%s988_s0 + $0x4] sm:$0xf] }
  0x12   :  { %206 = vmatpush.msra.mxu2 %v11_v14  ;;  %226 = vmatpush.msra.mxu3 %v12_v15 }
  0x13   :  { %363 = vmatpush.msrb.mxu0 %v25_v0  ;;  %383 = vmatpush.msrb.mxu1 %v26_v1 }
  0x14   :  { %525 = vmatpush.msrb.mxu2 %v25_v0  ;;  %545 = vmatpush.msrb.mxu3 %v26_v1 }
  0x15   :  { %364 = vmatpush.msrb.mxu0 %v23_v2  ;;  %384 = vmatpush.msrb.mxu1 %v24_v3 }
  0x16   :  { %526 = vmatpush.msrb.mxu2 %v23_v2  ;;  %546 = vmatpush.msrb.mxu3 %v24_v3 }
  0x17   :  { %365 = vmatpush.msrb.mxu0 %v21_v4  ;;  %385 = vmatpush.msrb.mxu1 %v22_v5 }
  0x18   :  { %527 = vmatpush.msrb.mxu2 %v21_v4  ;;  %547 = vmatpush.msrb.mxu3 %v22_v5 }
  0x19   :  { %366 = vmatpush.msrb.mxu0 %v19_v6  ;;  %386 = vmatpush.msrb.mxu1 %v20_v7 }
  0x1a   :  { %528 = vmatpush.msrb.mxu2 %v19_v6  ;;  %548 = vmatpush.msrb.mxu3 %v20_v7 }
  0x1b   :  { %367 = vmatpush.msrb.mxu0 %v17_v8  ;;  %387 = vmatpush.msrb.mxu1 %v18_v9 }
  0x1c   :  { %529 = vmatpush.msrb.mxu2 %v17_v8  ;;  %549 = vmatpush.msrb.mxu3 %v18_v9 }
  0x1d   :  { %368 = vmatpush.msrb.mxu0 %v15_v10  ;;  %388 = vmatpush.msrb.mxu1 %v16_v11 }
  0x1e   :  { %530 = vmatpush.msrb.mxu2 %v15_v10  ;;  %550 = vmatpush.msrb.mxu3 %v16_v11 }
  0x1f   :  { %369 = vmatpush.msrb.mxu0 %v13_v12  ;;  %389 = vmatpush.msrb.mxu1 %v14_v13 }
  0x20   :  { %531 = vmatpush.msrb.mxu2 %v13_v12  ;;  %551 = vmatpush.msrb.mxu3 %v14_v13 }
  0x21   :  { %370 = vmatpush.msrb.mxu0 %v11_v14  ;;  %390 = vmatpush.msrb.mxu1 %v12_v15 }
  0x22   :  { %532 = vmatpush.msrb.mxu2 %v11_v14  ;;  %552 = vmatpush.msrb.mxu3 %v12_v15  ;;  %v700_v14 = vld [vmem:[%s988_s0 + $0x8] sm:$0xf] }
  0x23   :  { %v237_v15 = vrot.slane %v700_v14, 2  ;;  %v706_v14 = vld [vmem:[%s988_s0 + $0x4] sm:$0xf] }
  0x8e   :  { %v48_v18 = vpop.f32.mrf.mxu0  ;;  %v68_v22 = vpop.f32.mrf.mxu1 }
  0x8f   :  { %v72_v20 = vadd.f32 %v71_v17, %v48_v18  ;;  %v78_v23 = vadd.f32 %v76_v21, %v68_v22 }
  0x91   :  { %718 = vtanh.f32 %v72_v20  ;;  %v695_v26 = vmul.f32 -1.442695, %v72_v20  ;;  %v696_v27 = vmul.f32 -1.442695, %v78_v23 }
  0x92   :  { %720 = vtanh.f32 %v78_v23 }
  0x93   :  { %722 = vpow2.f32 %v695_v26 }
  0x94   :  { %724 = vpow2.f32 %v696_v27 }
  0x97   :  { %v719_v24 = vpop.eup %718 }
  0x98   :  { %101 = vrot.lane.b32.xlu0 %v719_v24, %s783_s16  ;;  %v721_v25 = vpop.eup %720 }
  0x99   :  { %v723_v28 = vpop.eup %722 }
  0x9a   :  { %v82_v29 = vadd.f32 1.0, %v723_v28  ;;  %v725_v30 = vpop.eup %724 }
  0x9b   :  { %v119_v31 = vadd.f32 1.0, %v725_v30 }
  0x9c   :  { %726 = vrcp.f32 %v82_v29  ;;  %v94_v40 = vand.u32 2147483648, %v82_v29  ;;  %vm88_vm1 = vweird.f32 %v82_v29  ;;  %v92_v41 = vand.u32 2147483647, %v82_v29 }
  0x9d   :  { %728 = vrcp.f32 %v119_v31  ;;  %vm125_vm4 = vweird.f32 %v119_v31  ;;  %v131_v49 = vand.u32 2147483648, %v119_v31  ;;  %v129_v50 = vand.u32 2147483647, %v119_v31 }
  0x9e   :  { %v95_v44 = vor.u32 1.1754944e-38, %v94_v40  ;;  %vm93_vm3 = vcmp.eq.f32.partialorder %v92_v41, 8.507059e+37 }
  0x9f   :  { %v132_v52 = vor.u32 1.1754944e-38, %v131_v49  ;;  %vm130_vm7 = vcmp.eq.f32.partialorder %v129_v50, 8.507059e+37 }
  0xa0   :  { %138 = vrot.lane.b32.xlu0 %v721_v25, %s783_s16 }
  0xa2   :  { %v727_v32 = vpop.eup %726 }
  0xa3   :  { %v84_v33 = vmul.f32 %v727_v32, %v82_v29  ;;  %v729_v35 = vpop.eup %728  ;;  %vm89_vm0 = vweird.f32 %v727_v32 }
  0xa4   :  { %v121_v37 = vmul.f32 %v729_v35, %v119_v31  ;;  %vm90_vm2 = vmor %vm88_vm1, %vm89_vm0  ;;  %vm126_vm5 = vweird.f32 %v729_v35 }
  0xa5   :  { %v85_v34 = vsub.f32 1.0, %v84_v33  ;;  %vm127_vm6 = vmor %vm125_vm4, %vm126_vm5 }
  0xa6   :  { %v122_v39 = vsub.f32 1.0, %v121_v37 }
  0xa7   :  { %v86_v36 = vmul.f32 %v727_v32, %v85_v34 }
  0xa8   :  { %v123_v43 = vmul.f32 %v729_v35, %v122_v39 }
  0xa9   :  { %v87_v38 = vadd.f32 %v727_v32, %v86_v36 }
  0xaa   :  { %v124_v48 = vadd.f32 %v729_v35, %v123_v43 }
  0xab   :  { %v91_v42 = vsel %vm90_vm2, %v727_v32, %v87_v38 }
  0xac   :  { %v96_v46 = vsel %vm93_vm3, %v95_v44, %v91_v42  ;;  %v128_v51 = vsel %vm127_vm6, %v729_v35, %v124_v48 }
  0xad   :  { %v133_v53 = vsel %vm130_vm7, %v132_v52, %v128_v51  ;;  %v99_v56 = vmul.f32 0.0, %v96_v46 }
  0xae   :  { %v136_v59 = vmul.f32 0.0, %v133_v53 }
 0x10a   :  { %v102_v45 = vpop.permute.xlu0 %101 }
 0x10b   :  { %v104_v47 = vmul.f32 %v102_v45, %v96_v46 }
 0x10d   :  { %106 = vrot.lane.b32.xlu1 %v104_v47, %s784_s17 }
 0x112   :  { %v139_v54 = vpop.permute.xlu0 %138 }
 0x113   :  { %v141_v55 = vmul.f32 %v139_v54, %v133_v53 }
 0x115   :  { %143 = vrot.lane.b32.xlu1 %v141_v55, %s784_s17 }
 0x17f   :  { %v107_v57 = vpop.permute.xlu1 %106 }
 0x180   :  { %v109_v58 = vadd.f32 %v107_v57, %v99_v56 }
 0x182   :  { %730 = vtanh.f32 %v109_v58 }
 0x187   :  { %v144_v60 = vpop.permute.xlu1 %143 }
 0x188   :  { %v731_v61 = vpop.eup %730  ;;  %v146_v62 = vadd.f32 %v144_v60, %v136_v59 }
 0x189   :  { %112 = vrot.lane.b32.xlu2 %v731_v61, %s783_s16 }
 0x18a   :  { %732 = vtanh.f32 %v146_v62 }
 0x190   :  { %v733_v63 = vpop.eup %732 }
 0x191   :  { %149 = vrot.lane.b32.xlu2 %v733_v63, %s783_s16 }
 0x1e3   :  { %v113_v0 = vpop.permute.xlu2 %112 }
 0x1e4   :  { %v115_v1 = vmul.f32 %v113_v0, %v96_v46 }
 0x1e6   :  { %154 = vst [vmem:[#allocation1] ss:$4 sm:$0xff] %v115_v1 }
 0x1eb   :  { %v150_v2 = vpop.permute.xlu2 %149 }
 0x1ec   :  { %v152_v3 = vmul.f32 %v150_v2, %v133_v53 }
 0x1ed   :  { %v861_v4 = vld.sshfl [vmem:[#allocation1] sm:$0xff pattern:$0x73625140] }
 0x1ee   :  { %162 = vst [vmem:[#allocation1] ss:$4 sm:$0xff] %v152_v3 }
 0x1f5   :  { %v863_v5 = vld.sshfl [vmem:[#allocation1] sm:$0xff pattern:$0x73625140] }
 0x1f6   :  { %169 = vst [vmem:[#allocation1] ss:$4 sm:$0xff] %v115_v1 }
 0x1fd   :  { %v170_v6 = vld.sshfl [vmem:[#allocation1] sm:$0xff pattern:$0x73625140] }
 0x1fe   :  { %174 = vst [vmem:[#allocation1] ss:$4 sm:$0xff] %v152_v3  ;;  %171 = vrot.lane.b32.xlu0 %v170_v6, %s784_s17 }
 0x205   :  { %v175_v7 = vld.sshfl [vmem:[#allocation1] sm:$0xff pattern:$0x73625140] }
 0x206   :  { %182 = vst [vmem:[#allocation1] ss:$4 sm:$0xff] %v109_v58  ;;  %176 = vrot.lane.b32.xlu1 %v175_v7, %s783_s16 }
 0x20d   :  { %v183_v8 = vld.sshfl [vmem:[#allocation1] sm:$0xff pattern:$0x73625140] }
 0x20e   :  { %184 = vrot.lane.b32.xlu2 %v183_v8, %s785_s18 }
 0x268   :  { %v185_v9 = vpop.permute.xlu2 %184 }
 0x269   :  { %v869_v10 = vsel %vm179_vm8, %v185_v9, %v146_v62 }
 0x26a   :  { %261 = vrot.lane.b32.xlu2 %v869_v10, %s784_s17 }
 0x270   :  { %v172_v11 = vpop.permute.xlu0 %171 }
 0x278   :  { %v177_v12 = vpop.permute.xlu1 %176 }
 0x279   :  { %v180_v13 = vsel %vm179_vm8, %v172_v11, %v177_v12 }
 0x27a   :  { %697 = vmatmul.msk.f32.vlgmr.msra.gmra.mxu2 %vm27_vm9, %v180_v13  ;;  %698 = vmatmul.msk.f32.vlgmr.msra.gmra.mxu3 %vm27_vm9, %v180_v13 }
 0x2c4   :  { %v262_v53 = vpop.permute.xlu2 %261 }
 0x2fd   :  { %v208_v17 = vpop.f32.mrf.mxu2  ;;  %v228_v18 = vpop.f32.mrf.mxu3 }
 0x2fe   :  { %v233_v19 = vadd.f32 %v699_v16, %v208_v17  ;;  %v239_v20 = vadd.f32 %v237_v15, %v228_v18  ;;  %v399_v15 = vrot.slane %v706_v14, 2  ;;  %v705_v16 = vld [vmem:[%s988_s0 + $0x8] sm:$0xf] }
 0x300   :  { %734 = vtanh.f32 %v233_v19  ;;  %v701_v23 = vmul.f32 -1.442695, %v233_v19  ;;  %v702_v24 = vmul.f32 -1.442695, %v239_v20 }
 0x301   :  { %736 = vtanh.f32 %v239_v20 }
 0x302   :  { %738 = vpow2.f32 %v701_v23 }
 0x303   :  { %740 = vpow2.f32 %v702_v24 }
 0x306   :  { %v735_v21 = vpop.eup %734 }
 0x307   :  { %v737_v22 = vpop.eup %736  ;;  %266 = vrot.lane.b32.xlu0 %v735_v21, %s783_s16 }
 0x308   :  { %303 = vrot.lane.b32.xlu1 %v737_v22, %s783_s16  ;;  %v739_v25 = vpop.eup %738 }
 0x309   :  { %v741_v26 = vpop.eup %740  ;;  %v243_v27 = vadd.f32 1.0, %v739_v25 }
 0x30a   :  { %v284_v28 = vadd.f32 1.0, %v741_v26 }
 0x30b   :  { %742 = vrcp.f32 %v243_v27  ;;  %v255_v39 = vand.u32 2147483648, %v243_v27  ;;  %vm249_vm12 = vweird.f32 %v243_v27  ;;  %v253_v41 = vand.u32 2147483647, %v243_v27 }
 0x30c   :  { %744 = vrcp.f32 %v284_v28  ;;  %v296_v40 = vand.u32 2147483648, %v284_v28  ;;  %vm290_vm13 = vweird.f32 %v284_v28  ;;  %v294_v42 = vand.u32 2147483647, %v284_v28 }
 0x30d   :  { %v256_v45 = vor.u32 1.1754944e-38, %v255_v39  ;;  %vm254_vm0 = vcmp.eq.f32.partialorder %v253_v41, 8.507059e+37 }
 0x30e   :  { %v297_v46 = vor.u32 1.1754944e-38, %v296_v40  ;;  %vm295_vm1 = vcmp.eq.f32.partialorder %v294_v42, 8.507059e+37 }
 0x311   :  { %v743_v29 = vpop.eup %742 }
 0x312   :  { %v745_v30 = vpop.eup %744  ;;  %v245_v31 = vmul.f32 %v743_v29, %v243_v27  ;;  %vm250_vm10 = vweird.f32 %v743_v29 }
 0x313   :  { %v286_v32 = vmul.f32 %v745_v30, %v284_v28  ;;  %vm291_vm11 = vweird.f32 %v745_v30  ;;  %vm251_vm14 = vmor %vm249_vm12, %vm250_vm10 }
 0x314   :  { %v246_v33 = vsub.f32 1.0, %v245_v31  ;;  %vm292_vm15 = vmor %vm290_vm13, %vm291_vm11 }
 0x315   :  { %v287_v34 = vsub.f32 1.0, %v286_v32 }
 0x316   :  { %v247_v35 = vmul.f32 %v743_v29, %v246_v33 }
 0x317   :  { %v288_v36 = vmul.f32 %v745_v30, %v287_v34 }
 0x318   :  { %v248_v37 = vadd.f32 %v743_v29, %v247_v35 }
 0x319   :  { %v289_v38 = vadd.f32 %v745_v30, %v288_v36 }
 0x31a   :  { %v252_v43 = vsel %vm251_vm14, %v743_v29, %v248_v37 }
 0x31b   :  { %v293_v44 = vsel %vm292_vm15, %v745_v30, %v289_v38  ;;  %v257_v48 = vsel %vm254_vm0, %v256_v45, %v252_v43 }
 0x31c   :  { %v298_v50 = vsel %vm295_vm1, %v297_v46, %v293_v44  ;;  %v264_v54 = vmul.f32 %v262_v53, %v257_v48 }
 0x31d   :  { %v301_v55 = vmul.f32 %v298_v50, %v869_v10 }
 0x379   :  { %v267_v47 = vpop.permute.xlu0 %266 }
 0x37a   :  { %v304_v49 = vpop.permute.xlu1 %303  ;;  %v269_v51 = vmul.f32 %v267_v47, %v257_v48 }
 0x37b   :  { %v306_v52 = vmul.f32 %v304_v49, %v298_v50 }
 0x37c   :  { %271 = vrot.lane.b32.xlu0 %v269_v51, %s784_s17 }
 0x37d   :  { %308 = vrot.lane.b32.xlu1 %v306_v52, %s784_s17 }
 0x3ee   :  { %v272_v56 = vpop.permute.xlu0 %271 }
 0x3ef   :  { %v309_v57 = vpop.permute.xlu1 %308  ;;  %v274_v58 = vadd.f32 %v272_v56, %v264_v54 }
 0x3f0   :  { %v311_v59 = vadd.f32 %v309_v57, %v301_v55 }
 0x3f1   :  { %746 = vtanh.f32 %v274_v58 }
 0x3f2   :  { %748 = vtanh.f32 %v311_v59 }
 0x3f7   :  { %v747_v60 = vpop.eup %746 }
 0x3f8   :  { %v749_v61 = vpop.eup %748  ;;  %277 = vrot.lane.b32.xlu2 %v747_v60, %s783_s16 }
 0x3f9   :  { %314 = vrot.lane.b32.xlu0 %v749_v61, %s783_s16 }
 0x452   :  { %v278_v62 = vpop.permute.xlu2 %277 }
 0x453   :  { %v280_v63 = vmul.f32 %v278_v62, %v257_v48 }
 0x455   :  { %319 = vst [vmem:[#allocation1] ss:$4 sm:$0xff] %v280_v63 }
 0x45c   :  { %v889_v2 = vld.sshfl [vmem:[#allocation1] sm:$0xff pattern:$0x73625140] }
 0x46b   :  { %v315_v0 = vpop.permute.xlu0 %314 }
 0x46c   :  { %v317_v1 = vmul.f32 %v315_v0, %v298_v50 }
 0x46e   :  { %327 = vst [vmem:[#allocation1] ss:$4 sm:$0xff] %v317_v1 }
 0x475   :  { %v891_v3 = vld.sshfl [vmem:[#allocation1] sm:$0xff pattern:$0x73625140] }
 0x476   :  { %334 = vst [vmem:[#allocation1] ss:$4 sm:$0xff] %v280_v63 }
 0x47d   :  { %v335_v6 = vld.sshfl [vmem:[#allocation1] sm:$0xff pattern:$0x73625140] }
 0x47e   :  { %336 = vrot.lane.b32.xlu1 %v335_v6, %s784_s17  ;;  %339 = vst [vmem:[#allocation1] ss:$4 sm:$0xff] %v317_v1 }
 0x485   :  { %v340_v7 = vld.sshfl [vmem:[#allocation1] sm:$0xff pattern:$0x73625140] }
 0x486   :  { %341 = vrot.lane.b32.xlu2 %v340_v7, %s783_s16  ;;  %346 = vst [vmem:[#allocation1] ss:$4 sm:$0xff] %v274_v58 }
 0x48d   :  { %v347_v8 = vld.sshfl [vmem:[#allocation1] sm:$0xff pattern:$0x73625140] }
 0x48e   :  { %348 = vrot.lane.b32.xlu0 %v347_v8, %s785_s18 }
 0x4e0   :  { %v342_v9 = vpop.permute.xlu2 %341 }
 0x4f0   :  { %v337_v10 = vpop.permute.xlu1 %336 }
 0x4f1   :  { %v344_v11 = vsel %vm179_vm8, %v337_v10, %v342_v9 }
 0x4f2   :  { %703 = vmatmul.msk.f32.vlgmr.msrb.gmra.mxu0 %vm27_vm9, %v344_v11  ;;  %704 = vmatmul.msk.f32.vlgmr.msrb.gmra.mxu1 %vm27_vm9, %v344_v11 }
 0x500   :  { %v349_v12 = vpop.permute.xlu0 %348 }
 0x501   :  { %v351_v13 = vsel %vm179_vm8, %v349_v12, %v311_v59 }
 0x502   :  { %423 = vrot.lane.b32.xlu0 %v351_v13, %s784_s17 }
 0x56f   :  { %v372_v17 = vpop.f32.mrf.mxu0  ;;  %v392_v18 = vpop.f32.mrf.mxu1 }
 0x570   :  { %v396_v19 = vadd.f32 %v705_v16, %v372_v17  ;;  %v401_v20 = vadd.f32 %v399_v15, %v392_v18  ;;  %v559_v16 = vld [vmem:[%s988_s0] sm:$0xf]  ;;  %v711_v18 = vld [vmem:[%s988_s0 + $0xc] sm:$0xf] }
 0x571   :  { %v561_v17 = vrot.slane %v559_v16, 2 }
 0x572   :  { %750 = vtanh.f32 %v396_v19  ;;  %v708_v23 = vmul.f32 -1.442695, %v401_v20  ;;  %v707_v27 = vmul.f32 -1.442695, %v396_v19 }
 0x573   :  { %752 = vtanh.f32 %v401_v20 }
 0x574   :  { %754 = vpow2.f32 %v708_v23  ;;  %v424_v57 = vpop.permute.xlu0 %423 }
 0x578   :  { %v751_v21 = vpop.eup %750 }
 0x579   :  { %v753_v22 = vpop.eup %752  ;;  %428 = vrot.lane.b32.xlu1 %v751_v21, %s783_s16 }
 0x57a   :  { %465 = vrot.lane.b32.xlu2 %v753_v22, %s783_s16  ;;  %v755_v24 = vpop.eup %754 }
 0x57b   :  { %v446_v25 = vadd.f32 1.0, %v755_v24 }
 0x57d   :  { %756 = vrcp.f32 %v446_v25  ;;  %v458_v34 = vand.u32 2147483648, %v446_v25  ;;  %vm452_vm3 = vweird.f32 %v446_v25  ;;  %v456_v35 = vand.u32 2147483647, %v446_v25 }
 0x57e   :  { %758 = vpow2.f32 %v707_v27 }
 0x57f   :  { %v459_v37 = vor.u32 1.1754944e-38, %v458_v34  ;;  %vm457_vm5 = vcmp.eq.f32.partialorder %v456_v35, 8.507059e+37 }
 0x583   :  { %v757_v26 = vpop.eup %756 }
 0x584   :  { %v448_v28 = vmul.f32 %v757_v26, %v446_v25  ;;  %v759_v30 = vpop.eup %758  ;;  %vm453_vm2 = vweird.f32 %v757_v26 }
 0x585   :  { %v405_v32 = vadd.f32 1.0, %v759_v30  ;;  %vm454_vm4 = vmor %vm452_vm3, %vm453_vm2  ;;  %vm159_vm3 = vcmask 254976  }
 0x586   :  { %v449_v29 = vsub.f32 1.0, %v448_v28 }
 0x587   :  { %760 = vrcp.f32 %v405_v32  ;;  %v417_v46 = vand.u32 2147483648, %v405_v32  ;;  %vm411_vm7 = vweird.f32 %v405_v32  ;;  %v415_v47 = vand.u32 2147483647, %v405_v32 }
 0x588   :  { %v450_v31 = vmul.f32 %v757_v26, %v449_v29 }
 0x589   :  { %v418_v49 = vor.u32 1.1754944e-38, %v417_v46  ;;  %vm416_vm11 = vcmp.eq.f32.partialorder %v415_v47, 8.507059e+37 }
 0x58a   :  { %v451_v33 = vadd.f32 %v757_v26, %v450_v31 }
 0x58c   :  { %v455_v36 = vsel %vm454_vm4, %v757_v26, %v451_v33  ;;  %vm685_vm4 = vcmask 517120  }
 0x58d   :  { %v460_v39 = vsel %vm457_vm5, %v459_v37, %v455_v36  ;;  %v761_v40 = vpop.eup %760 }
 0x58e   :  { %v407_v42 = vmul.f32 %v761_v40, %v405_v32  ;;  %vm412_vm6 = vweird.f32 %v761_v40  ;;  %v463_v53 = vmul.f32 %v460_v39, %v351_v13 }
 0x58f   :  { %vm413_vm10 = vmor %vm411_vm7, %vm412_vm6 }
 0x590   :  { %v408_v43 = vsub.f32 1.0, %v407_v42 }
 0x592   :  { %v409_v44 = vmul.f32 %v761_v40, %v408_v43 }
 0x594   :  { %v410_v45 = vadd.f32 %v761_v40, %v409_v44 }
 0x596   :  { %v414_v48 = vsel %vm413_vm10, %v761_v40, %v410_v45 }
 0x597   :  { %v419_v50 = vsel %vm416_vm11, %v418_v49, %v414_v48 }
 0x598   :  { %v426_v58 = vmul.f32 %v424_v57, %v419_v50 }
 0x5d4   :  { %v466_v38 = vpop.permute.xlu2 %465 }
 0x5d5   :  { %v468_v41 = vmul.f32 %v466_v38, %v460_v39 }
 0x5d7   :  { %470 = vrot.lane.b32.xlu2 %v468_v41, %s784_s17 }
 0x5eb   :  { %v429_v51 = vpop.permute.xlu1 %428 }
 0x5ec   :  { %v431_v52 = vmul.f32 %v429_v51, %v419_v50 }
 0x5ee   :  { %433 = vrot.lane.b32.xlu1 %v431_v52, %s784_s17 }
 0x631   :  { %v471_v54 = vpop.permute.xlu2 %470 }
 0x632   :  { %v473_v55 = vadd.f32 %v471_v54, %v463_v53 }
 0x634   :  { %762 = vtanh.f32 %v473_v55 }
 0x63a   :  { %v763_v56 = vpop.eup %762 }
 0x63b   :  { %476 = vrot.lane.b32.xlu1 %v763_v56, %s783_s16 }
 0x660   :  { %v434_v59 = vpop.permute.xlu1 %433 }
 0x661   :  { %v436_v60 = vadd.f32 %v434_v59, %v426_v58 }
 0x663   :  { %764 = vtanh.f32 %v436_v60 }
 0x669   :  { %v765_v61 = vpop.eup %764 }
 0x66a   :  { %439 = vrot.lane.b32.xlu0 %v765_v61, %s783_s16 }
 0x6ad   :  { %v477_v0 = vpop.permute.xlu1 %476 }
 0x6ae   :  { %v479_v1 = vmul.f32 %v477_v0, %v460_v39 }
 0x6dc   :  { %v440_v62 = vpop.permute.xlu0 %439 }
 0x6dd   :  { %v442_v63 = vmul.f32 %v440_v62, %v419_v50 }
 0x6df   :  { %481 = vst [vmem:[#allocation1] ss:$4 sm:$0xff] %v442_v63 }
 0x6e6   :  { %v913_v6 = vld.sshfl [vmem:[#allocation1] sm:$0xff pattern:$0x73625140] }
 0x6e7   :  { %489 = vst [vmem:[#allocation1] ss:$4 sm:$0xff] %v479_v1 }
 0x6ee   :  { %v915_v7 = vld.sshfl [vmem:[#allocation1] sm:$0xff pattern:$0x73625140] }
 0x6ef   :  { %496 = vst [vmem:[#allocation1] ss:$4 sm:$0xff] %v442_v63 }
 0x6f6   :  { %v497_v8 = vld.sshfl [vmem:[#allocation1] sm:$0xff pattern:$0x73625140] }
 0x6f7   :  { %498 = vrot.lane.b32.xlu2 %v497_v8, %s784_s17  ;;  %501 = vst [vmem:[#allocation1] ss:$4 sm:$0xff] %v479_v1 }
 0x6fe   :  { %v502_v9 = vld.sshfl [vmem:[#allocation1] sm:$0xff pattern:$0x73625140] }
 0x6ff   :  { %503 = vrot.lane.b32.xlu0 %v502_v9, %s783_s16  ;;  %508 = vst [vmem:[#allocation1] ss:$4 sm:$0xff] %v436_v60 }
 0x706   :  { %v509_v10 = vld.sshfl [vmem:[#allocation1] sm:$0xff pattern:$0x73625140] }
 0x707   :  { %510 = vrot.lane.b32.xlu1 %v509_v10, %s785_s18 }
 0x751   :  { %v499_v11 = vpop.permute.xlu2 %498 }
 0x771   :  { %v504_v12 = vpop.permute.xlu0 %503 }
 0x772   :  { %v506_v13 = vsel %vm179_vm8, %v499_v11, %v504_v12 }
 0x773   :  { %709 = vmatmul.msk.f32.vlgmr.msrb.gmra.mxu2 %vm27_vm9, %v506_v13  ;;  %710 = vmatmul.msk.f32.vlgmr.msrb.gmra.mxu3 %vm27_vm9, %v506_v13 }
 0x779   :  { %v511_v14 = vpop.permute.xlu1 %510 }
 0x77a   :  { %v924_v15 = vsel %vm179_vm8, %v511_v14, %v473_v55 }
 0x77b   :  { %585 = vrot.lane.b32.xlu1 %v924_v15, %s784_s17 }
 0x7ed   :  { %v586_v55 = vpop.permute.xlu1 %585 }
 0x7f6   :  { %v534_v19 = vpop.f32.mrf.mxu2  ;;  %v554_v20 = vpop.f32.mrf.mxu3 }
 0x7f7   :  { %v558_v21 = vadd.f32 %v711_v18, %v534_v19  ;;  %v563_v22 = vadd.f32 %v561_v17, %v554_v20 }
 0x7f9   :  { %766 = vtanh.f32 %v558_v21  ;;  %v712_v25 = vmul.f32 -1.442695, %v558_v21  ;;  %v713_v29 = vmul.f32 -1.442695, %v563_v22 }
 0x7fa   :  { %768 = vtanh.f32 %v563_v22 }
 0x7fb   :  { %770 = vpow2.f32 %v712_v25 }
 0x7ff   :  { %v767_v23 = vpop.eup %766 }
 0x800   :  { %v769_v24 = vpop.eup %768  ;;  %590 = vrot.lane.b32.xlu2 %v767_v23, %s783_s16 }
 0x801   :  { %627 = vrot.lane.b32.xlu0 %v769_v24, %s783_s16  ;;  %v771_v26 = vpop.eup %770 }
 0x802   :  { %v567_v27 = vadd.f32 1.0, %v771_v26 }
 0x804   :  { %772 = vrcp.f32 %v567_v27  ;;  %v579_v36 = vand.u32 2147483648, %v567_v27  ;;  %vm573_vm12 = vweird.f32 %v567_v27  ;;  %v577_v37 = vand.u32 2147483647, %v567_v27 }
 0x805   :  { %774 = vpow2.f32 %v713_v29 }
 0x806   :  { %v580_v39 = vor.u32 1.1754944e-38, %v579_v36  ;;  %vm578_vm14 = vcmp.eq.f32.partialorder %v577_v37, 8.507059e+37 }
 0x80a   :  { %v773_v28 = vpop.eup %772 }
 0x80b   :  { %v569_v30 = vmul.f32 %v773_v28, %v567_v27  ;;  %v775_v33 = vpop.eup %774  ;;  %vm574_vm9 = vweird.f32 %v773_v28 }
 0x80c   :  { %v608_v34 = vadd.f32 1.0, %v775_v33  ;;  %vm575_vm13 = vmor %vm573_vm12, %vm574_vm9 }
 0x80d   :  { %v570_v31 = vsub.f32 1.0, %v569_v30 }
 0x80e   :  { %776 = vrcp.f32 %v608_v34  ;;  %v620_v48 = vand.u32 2147483648, %v608_v34  ;;  %vm614_vm0 = vweird.f32 %v608_v34  ;;  %v618_v49 = vand.u32 2147483647, %v608_v34 }
 0x80f   :  { %v571_v32 = vmul.f32 %v773_v28, %v570_v31 }
 0x810   :  { %v621_v51 = vor.u32 1.1754944e-38, %v620_v48  ;;  %vm619_vm2 = vcmp.eq.f32.partialorder %v618_v49, 8.507059e+37 }
 0x811   :  { %v572_v35 = vadd.f32 %v773_v28, %v571_v32 }
 0x813   :  { %v576_v38 = vsel %vm575_vm13, %v773_v28, %v572_v35 }
 0x814   :  { %v581_v41 = vsel %vm578_vm14, %v580_v39, %v576_v38  ;;  %v777_v43 = vpop.eup %776 }
 0x815   :  { %v610_v44 = vmul.f32 %v777_v43, %v608_v34  ;;  %vm615_vm15 = vweird.f32 %v777_v43  ;;  %v588_v56 = vmul.f32 %v586_v55, %v581_v41 }
 0x816   :  { %vm616_vm1 = vmor %vm614_vm0, %vm615_vm15 }
 0x817   :  { %v611_v45 = vsub.f32 1.0, %v610_v44 }
 0x819   :  { %v612_v46 = vmul.f32 %v777_v43, %v611_v45 }
 0x81b   :  { %v613_v47 = vadd.f32 %v777_v43, %v612_v46 }
 0x81d   :  { %v617_v50 = vsel %vm616_vm1, %v777_v43, %v613_v47 }
 0x81e   :  { %v622_v53 = vsel %vm619_vm2, %v621_v51, %v617_v50 }
 0x81f   :  { %v625_v60 = vmul.f32 %v622_v53, %v924_v15 }
 0x85a   :  { %v591_v40 = vpop.permute.xlu2 %590 }
 0x85b   :  { %v593_v42 = vmul.f32 %v591_v40, %v581_v41 }
 0x85d   :  { %595 = vrot.lane.b32.xlu2 %v593_v42, %s784_s17 }
 0x873   :  { %v628_v52 = vpop.permute.xlu0 %627 }
 0x874   :  { %v630_v54 = vmul.f32 %v628_v52, %v622_v53 }
 0x876   :  { %632 = vrot.lane.b32.xlu0 %v630_v54, %s784_s17 }
 0x87e   :  { %164 = vrot.lane.b32.xlu0 %v863_v5, %s784_s17 }
 0x8b7   :  { %v596_v57 = vpop.permute.xlu2 %595 }
 0x8b8   :  { %v598_v58 = vadd.f32 %v596_v57, %v588_v56 }
 0x8ba   :  { %778 = vtanh.f32 %v598_v58 }
 0x8c0   :  { %v779_v59 = vpop.eup %778 }
 0x8c1   :  { %601 = vrot.lane.b32.xlu1 %v779_v59, %s783_s16 }
 0x8c9   :  { %329 = vrot.lane.b32.xlu1 %v891_v3, %s784_s17 }
 0x8d1   :  { %156 = vrot.lane.b32.xlu1 %v861_v4, %s784_s17 }
 0x8e8   :  { %v633_v61 = vpop.permute.xlu0 %632 }
 0x8e9   :  { %v635_v62 = vadd.f32 %v633_v61, %v625_v60 }
 0x8eb   :  { %780 = vtanh.f32 %v635_v62 }
 0x8f0   :  { %v165_v5 = vpop.permute.xlu0 %164 }
 0x8f1   :  { %v781_v63 = vpop.eup %780  ;;  %168 = vst.msk [vmem:[#allocation3 + $0x6] sm:$0x3] %vm159_vm3, %v165_v5 }
 0x8f2   :  { %638 = vrot.lane.b32.xlu2 %v781_v63, %s783_s16 }
 0x8f8   :  { %v664_v21 = vld [vmem:[#allocation3 + $0x6] sm:$0x3] }
 0x8fa   :  { %491 = vrot.lane.b32.xlu2 %v915_v7, %s784_s17 }
 0x902   :  { %321 = vrot.lane.b32.xlu2 %v889_v2, %s784_s17 }
 0x933   :  { %v602_v3 = vpop.permute.xlu1 %601 }
 0x934   :  { %v604_v4 = vmul.f32 %v602_v3, %v581_v41 }
 0x936   :  { %643 = vst [vmem:[#allocation1] ss:$4 sm:$0xff] %v604_v4 }
 0x93b   :  { %v330_v0 = vpop.permute.xlu1 %329 }
 0x93c   :  { %333 = vst.msk [vmem:[#allocation3 + $0x4] sm:$0x3] %vm159_vm3, %v330_v0 }
 0x93d   :  { %v644_v1 = vld.sshfl [vmem:[#allocation1] sm:$0xff pattern:$0x73625140] }
 0x93e   :  { %645 = vrot.lane.b32.xlu1 %v644_v1, %s784_s17 }
 0x943   :  { %v157_v8 = vpop.permute.xlu1 %156  ;;  %v663_v9 = vld [vmem:[#allocation3 + $0x4] sm:$0x3] }
 0x944   :  { %160 = vst.msk [vmem:[#allocation2] sm:$0x3] %vm159_vm3, %v157_v8 }
 0x946   :  { %673 = vrot.lane.b32.xlu1 %v663_v9, %s784_s17 }
 0x94b   :  { %v657_v24 = vld [vmem:[#allocation2] sm:$0x3] }
 0x94c   :  { %v639_v10 = vpop.permute.xlu2 %638 }
 0x94d   :  { %v641_v7 = vmul.f32 %v639_v10, %v622_v53 }
 0x94f   :  { %651 = vst [vmem:[#allocation1] ss:$4 sm:$0xff] %v641_v7 }
 0x954   :  { %v492_v11 = vpop.permute.xlu2 %491 }
 0x955   :  { %495 = vst.msk [vmem:[#allocation3 + $0x2] sm:$0x3] %vm159_vm3, %v492_v11 }
 0x956   :  { %v652_v2 = vld.sshfl [vmem:[#allocation1] sm:$0xff pattern:$0x73625140] }
 0x957   :  { %653 = vrot.lane.b32.xlu0 %v652_v2, %s784_s17 }
 0x95c   :  { %v322_v12 = vpop.permute.xlu2 %321  ;;  %v662_v13 = vld [vmem:[#allocation3 + $0x2] sm:$0x3] }
 0x95d   :  { %325 = vst.msk [vmem:[#allocation2 + $0x2] sm:$0x3] %vm159_vm3, %v322_v12 }
 0x95f   :  { %483 = vrot.lane.b32.xlu0 %v913_v6, %s784_s17 }
 0x964   :  { %v658_v6 = vld [vmem:[#allocation2 + $0x2] sm:$0x3] }
 0x967   :  { %671 = vrot.lane.b32.xlu0 %v662_v13, %s784_s17 }
 0x9b0   :  { %v646_v14 = vpop.permute.xlu1 %645 }
 0x9b1   :  { %649 = vst.msk [vmem:[#allocation2 + $0x6] sm:$0x3] %vm159_vm3, %v646_v14 }
 0x9b8   :  { %v674_v18 = vpop.permute.xlu1 %673  ;;  %v660_v27 = vld [vmem:[#allocation2 + $0x6] sm:$0x3] }
 0x9c9   :  { %v654_v15 = vpop.permute.xlu0 %653 }
 0x9ca   :  { %656 = vst.msk [vmem:[#allocation3] sm:$0x3] %vm159_vm3, %v654_v15 }
 0x9d1   :  { %v484_v16 = vpop.permute.xlu0 %483  ;;  %v661_v17 = vld [vmem:[#allocation3] sm:$0x3] }
 0x9d2   :  { %487 = vst.msk [vmem:[#allocation2 + $0x4] sm:$0x3] %vm159_vm3, %v484_v16  ;;  %669 = vrot.lane.b32.xlu2 %v661_v17, %s784_s17 }
 0x9d9   :  { %v659_v19 = vld [vmem:[#allocation2 + $0x4] sm:$0x3]  ;;  %v672_v20 = vpop.permute.xlu0 %671 }
 0x9da   :  { %v683_v22 = vsel %vm179_vm8, %v659_v19, %v674_v18  ;;  %v682_v23 = vsel %vm179_vm8, %v658_v6, %v672_v20  ;;  %675 = vrot.lane.b32.xlu2 %v664_v21, %s784_s17 }
 0x9db   :  { %688 = vst.msk [vmem:[%s989_s2 + $0x4] sm:$0x3] %vm685_vm4, %v683_v22 }
 0x9dc   :  { %687 = vst.msk [vmem:[%s989_s2 + $0x2] sm:$0x3] %vm685_vm4, %v682_v23 }
 0xa2c   :  { %v670_v25 = vpop.permute.xlu2 %669 }
 0xa2d   :  { %v681_v26 = vsel %vm179_vm8, %v657_v24, %v670_v25 }
 0xa2e   :  { %686 = vst.msk [vmem:[%s989_s2] sm:$0x3] %vm685_vm4, %v681_v26 }
 0xa34   :  { %v676_v28 = vpop.permute.xlu2 %675 }
 0xa35   :  { %v684_v29 = vsel %vm179_vm8, %v660_v27, %v676_v28 }
 0xa36   :  { %689 = vst.msk [vmem:[%s989_s2 + $0x6] sm:$0x3] %vm685_vm4, %v684_v29 }

// kernel: bilstm_attention_forward.3
= control target key start
LH: loop header
LB: loop body
LE: loop exit
PB: predicated region body
PF: predicated region fallthrough
CT: control target
= control target key end

     0   :  { %v1554_v16 = vmov 0.0   ;;  %s1555_s16 = smov 64   ;;  %s1556_s17 = smov 32   ;;  %vm179_vm8 = vcmask 261120   ;;  %vm27_vm9 = vcmask 523264   ;;  %s2075_s1 = inlined_call_operand.vmem [shape: f32[64,256], index: 1, kind: input, shape index: {}]   ;;  %s2076_s0 = inlined_call_operand.vmem [shape: f32[8,2,256], index: 0, kind: input, shape index: {}]   ;;  %s2077_s2 = inlined_call_operand.vmem [shape: f32[8,2,64], index: 2, kind: output, shape index: {}]  }
   0x1   :  { %v1576_v0 = vld [vmem:[%s2075_s1 + $0x70] sm:$0xff]  ;;  %v1581_v1 = vld [vmem:[%s2075_s1 + $0x78] sm:$0xff]  ;;  %v1586_v2 = vld [vmem:[%s2075_s1 + $0x60] sm:$0xff]  ;;  %s1557_s18 = smov 96  }
   0x2   :  { %39 = vmatpush.msra.mxu0 %v1576_v0  ;;  %59 = vmatpush.msra.mxu1 %v1581_v1  ;;  %v1593_v3 = vld [vmem:[%s2075_s1 + $0x68] sm:$0xff]  ;;  %v1598_v4 = vld [vmem:[%s2075_s1 + $0x50] sm:$0xff]  ;;  %v1603_v5 = vld [vmem:[%s2075_s1 + $0x58] sm:$0xff] }
   0x3   :  { %199 = vmatpush.msra.mxu2 %v1576_v0  ;;  %219 = vmatpush.msra.mxu3 %v1581_v1  ;;  %v1612_v6 = vld [vmem:[%s2075_s1 + $0x40] sm:$0xff]  ;;  %v1617_v7 = vld [vmem:[%s2075_s1 + $0x48] sm:$0xff]  ;;  %v1626_v8 = vld [vmem:[%s2075_s1 + $0x30] sm:$0xff] }
   0x4   :  { %40 = vmatpush.msra.mxu0 %v1586_v2  ;;  %60 = vmatpush.msra.mxu1 %v1593_v3  ;;  %v1631_v9 = vld [vmem:[%s2075_s1 + $0x38] sm:$0xff]  ;;  %v1640_v10 = vld [vmem:[%s2075_s1 + $0x20] sm:$0xff]  ;;  %v1645_v11 = vld [vmem:[%s2075_s1 + $0x28] sm:$0xff] }
   0x5   :  { %200 = vmatpush.msra.mxu2 %v1586_v2  ;;  %220 = vmatpush.msra.mxu3 %v1593_v3  ;;  %v1654_v12 = vld [vmem:[%s2075_s1 + $0x10] sm:$0xff]  ;;  %v1659_v13 = vld [vmem:[%s2075_s1 + $0x18] sm:$0xff]  ;;  %v1668_v14 = vld [vmem:[%s2075_s1] sm:$0xff] }
   0x6   :  { %41 = vmatpush.msra.mxu0 %v1598_v4  ;;  %61 = vmatpush.msra.mxu1 %v1603_v5  ;;  %v1673_v15 = vld [vmem:[%s2075_s1 + $0x8] sm:$0xff]  ;;  %v71_v17 = vld [vmem:[%s2076_s0] sm:$0xf]  ;;  %v1378_v19 = vld [vmem:[%s2076_s0 + $0x1c] sm:$0xf] }
   0x7   :  { %201 = vmatpush.msra.mxu2 %v1598_v4  ;;  %221 = vmatpush.msra.mxu3 %v1603_v5  ;;  %v76_v21 = vrot.slane %v1378_v19, 2 }
   0x8   :  { %42 = vmatpush.msra.mxu0 %v1612_v6  ;;  %62 = vmatpush.msra.mxu1 %v1617_v7 }
   0x9   :  { %202 = vmatpush.msra.mxu2 %v1612_v6  ;;  %222 = vmatpush.msra.mxu3 %v1617_v7 }
   0xa   :  { %43 = vmatpush.msra.mxu0 %v1626_v8  ;;  %63 = vmatpush.msra.mxu1 %v1631_v9 }
   0xb   :  { %203 = vmatpush.msra.mxu2 %v1626_v8  ;;  %223 = vmatpush.msra.mxu3 %v1631_v9 }
   0xc   :  { %44 = vmatpush.msra.mxu0 %v1640_v10  ;;  %64 = vmatpush.msra.mxu1 %v1645_v11 }
   0xd   :  { %204 = vmatpush.msra.mxu2 %v1640_v10  ;;  %224 = vmatpush.msra.mxu3 %v1645_v11 }
   0xe   :  { %45 = vmatpush.msra.mxu0 %v1654_v12  ;;  %65 = vmatpush.msra.mxu1 %v1659_v13 }
   0xf   :  { %205 = vmatpush.msra.mxu2 %v1654_v12  ;;  %225 = vmatpush.msra.mxu3 %v1659_v13 }
  0x10   :  { %46 = vmatpush.msra.mxu0 %v1668_v14  ;;  %66 = vmatpush.msra.mxu1 %v1673_v15 }
  0x11   :  { %47 = vmatmul.f32.vlgmr.msra.gmra.mxu0 %v1554_v16  ;;  %67 = vmatmul.f32.vlgmr.msra.gmra.mxu1 %v1554_v16 }
  0x12   :  { %206 = vmatpush.msra.mxu2 %v1668_v14  ;;  %226 = vmatpush.msra.mxu3 %v1673_v15 }
  0x13   :  { %363 = vmatpush.msrb.mxu0 %v1576_v0  ;;  %383 = vmatpush.msrb.mxu1 %v1581_v1 }
  0x14   :  { %527 = vmatpush.msrb.mxu2 %v1576_v0  ;;  %547 = vmatpush.msrb.mxu3 %v1581_v1 }
  0x15   :  { %364 = vmatpush.msrb.mxu0 %v1586_v2  ;;  %384 = vmatpush.msrb.mxu1 %v1593_v3 }
  0x16   :  { %528 = vmatpush.msrb.mxu2 %v1586_v2  ;;  %548 = vmatpush.msrb.mxu3 %v1593_v3 }
  0x17   :  { %365 = vmatpush.msrb.mxu0 %v1598_v4  ;;  %385 = vmatpush.msrb.mxu1 %v1603_v5 }
  0x18   :  { %529 = vmatpush.msrb.mxu2 %v1598_v4  ;;  %549 = vmatpush.msrb.mxu3 %v1603_v5 }
  0x19   :  { %366 = vmatpush.msrb.mxu0 %v1612_v6  ;;  %386 = vmatpush.msrb.mxu1 %v1617_v7 }
  0x1a   :  { %530 = vmatpush.msrb.mxu2 %v1612_v6  ;;  %550 = vmatpush.msrb.mxu3 %v1617_v7 }
  0x1b   :  { %367 = vmatpush.msrb.mxu0 %v1626_v8  ;;  %387 = vmatpush.msrb.mxu1 %v1631_v9 }
  0x1c   :  { %531 = vmatpush.msrb.mxu2 %v1626_v8  ;;  %551 = vmatpush.msrb.mxu3 %v1631_v9 }
  0x1d   :  { %368 = vmatpush.msrb.mxu0 %v1640_v10  ;;  %388 = vmatpush.msrb.mxu1 %v1645_v11 }
  0x1e   :  { %532 = vmatpush.msrb.mxu2 %v1640_v10  ;;  %552 = vmatpush.msrb.mxu3 %v1645_v11 }
  0x1f   :  { %369 = vmatpush.msrb.mxu0 %v1654_v12  ;;  %389 = vmatpush.msrb.mxu1 %v1659_v13 }
  0x20   :  { %533 = vmatpush.msrb.mxu2 %v1654_v12  ;;  %553 = vmatpush.msrb.mxu3 %v1659_v13 }
  0x21   :  { %370 = vmatpush.msrb.mxu0 %v1668_v14  ;;  %390 = vmatpush.msrb.mxu1 %v1673_v15 }
  0x22   :  { %534 = vmatpush.msrb.mxu2 %v1668_v14  ;;  %554 = vmatpush.msrb.mxu3 %v1673_v15 }
  0x23   :  { %691 = vmatpush.msra.mxu0 %v1576_v0  ;;  %711 = vmatpush.msra.mxu1 %v1581_v1 }
  0x25   :  { %692 = vmatpush.msra.mxu0 %v1586_v2  ;;  %712 = vmatpush.msra.mxu1 %v1593_v3 }
  0x27   :  { %693 = vmatpush.msra.mxu0 %v1598_v4  ;;  %713 = vmatpush.msra.mxu1 %v1603_v5 }
  0x29   :  { %694 = vmatpush.msra.mxu0 %v1612_v6  ;;  %714 = vmatpush.msra.mxu1 %v1617_v7 }
  0x2b   :  { %695 = vmatpush.msra.mxu0 %v1626_v8  ;;  %715 = vmatpush.msra.mxu1 %v1631_v9 }
  0x2d   :  { %696 = vmatpush.msra.mxu0 %v1640_v10  ;;  %716 = vmatpush.msra.mxu1 %v1645_v11 }
  0x2f   :  { %697 = vmatpush.msra.mxu0 %v1654_v12  ;;  %717 = vmatpush.msra.mxu1 %v1659_v13 }
  0x31   :  { %698 = vmatpush.msra.mxu0 %v1668_v14  ;;  %718 = vmatpush.msra.mxu1 %v1673_v15 }
  0x8e   :  { %v48_v18 = vpop.f32.mrf.mxu0  ;;  %v68_v22 = vpop.f32.mrf.mxu1 }
  0x8f   :  { %v72_v20 = vadd.f32 %v71_v17, %v48_v18  ;;  %v78_v23 = vadd.f32 %v76_v21, %v68_v22 }
  0x91   :  { %1426 = vtanh.f32 %v72_v20  ;;  %v1379_v26 = vmul.f32 -1.442695, %v72_v20  ;;  %v1380_v27 = vmul.f32 -1.442695, %v78_v23 }
  0x92   :  { %1428 = vtanh.f32 %v78_v23 }
  0x93   :  { %1430 = vpow2.f32 %v1379_v26 }
  0x94   :  { %1432 = vpow2.f32 %v1380_v27 }
  0x97   :  { %v1427_v24 = vpop.eup %1426 }
  0x98   :  { %101 = vrot.lane.b32.xlu0 %v1427_v24, %s1555_s16  ;;  %v1429_v25 = vpop.eup %1428 }
  0x99   :  { %v1431_v28 = vpop.eup %1430 }
  0x9a   :  { %v82_v29 = vadd.f32 1.0, %v1431_v28  ;;  %v1433_v30 = vpop.eup %1432 }
  0x9b   :  { %v119_v31 = vadd.f32 1.0, %v1433_v30  ;;  %v1384_v30 = vld [vmem:[%s2076_s0 + $0x18] sm:$0xf] }
  0x9c   :  { %1434 = vrcp.f32 %v82_v29  ;;  %v94_v40 = vand.u32 2147483648, %v82_v29  ;;  %vm88_vm1 = vweird.f32 %v82_v29  ;;  %v92_v41 = vand.u32 2147483647, %v82_v29 }
  0x9d   :  { %1436 = vrcp.f32 %v119_v31  ;;  %vm125_vm4 = vweird.f32 %v119_v31  ;;  %v131_v49 = vand.u32 2147483648, %v119_v31  ;;  %v129_v50 = vand.u32 2147483647, %v119_v31 }
  0x9e   :  { %v95_v44 = vor.u32 1.1754944e-38, %v94_v40  ;;  %vm93_vm3 = vcmp.eq.f32.partialorder %v92_v41, 8.507059e+37 }
  0x9f   :  { %v132_v52 = vor.u32 1.1754944e-38, %v131_v49  ;;  %vm130_vm7 = vcmp.eq.f32.partialorder %v129_v50, 8.507059e+37 }
  0xa0   :  { %138 = vrot.lane.b32.xlu0 %v1429_v25, %s1555_s16 }
  0xa2   :  { %v1435_v32 = vpop.eup %1434 }
  0xa3   :  { %v84_v33 = vmul.f32 %v1435_v32, %v82_v29  ;;  %v1437_v35 = vpop.eup %1436  ;;  %vm89_vm0 = vweird.f32 %v1435_v32 }
  0xa4   :  { %v121_v37 = vmul.f32 %v1437_v35, %v119_v31  ;;  %vm90_vm2 = vmor %vm88_vm1, %vm89_vm0  ;;  %vm126_vm5 = vweird.f32 %v1437_v35  ;;  %v237_v31 = vrot.slane %v1384_v30, 2 }
  0xa5   :  { %v85_v34 = vsub.f32 1.0, %v84_v33  ;;  %vm127_vm6 = vmor %vm125_vm4, %vm126_vm5 }
  0xa6   :  { %v122_v39 = vsub.f32 1.0, %v121_v37 }
  0xa7   :  { %v86_v36 = vmul.f32 %v1435_v32, %v85_v34 }
  0xa8   :  { %v123_v43 = vmul.f32 %v1437_v35, %v122_v39 }
  0xa9   :  { %v87_v38 = vadd.f32 %v1435_v32, %v86_v36 }
  0xaa   :  { %v124_v48 = vadd.f32 %v1437_v35, %v123_v43 }
  0xab   :  { %v91_v42 = vsel %vm90_vm2, %v1435_v32, %v87_v38  ;;  %v1383_v32 = vld [vmem:[%s2076_s0 + $0x4] sm:$0xf] }
  0xac   :  { %v96_v46 = vsel %vm93_vm3, %v95_v44, %v91_v42  ;;  %v128_v51 = vsel %vm127_vm6, %v1437_v35, %v124_v48 }
  0xad   :  { %v133_v53 = vsel %vm130_vm7, %v132_v52, %v128_v51  ;;  %v99_v56 = vmul.f32 0.0, %v96_v46 }
  0xae   :  { %v136_v59 = vmul.f32 0.0, %v133_v53 }
 0x10a   :  { %v102_v45 = vpop.permute.xlu0 %101 }
 0x10b   :  { %v104_v47 = vmul.f32 %v102_v45, %v96_v46 }
 0x10d   :  { %106 = vrot.lane.b32.xlu1 %v104_v47, %s1556_s17 }
 0x112   :  { %v139_v54 = vpop.permute.xlu0 %138 }
 0x113   :  { %v141_v55 = vmul.f32 %v139_v54, %v133_v53 }
 0x115   :  { %143 = vrot.lane.b32.xlu1 %v141_v55, %s1556_s17 }
 0x17f   :  { %v107_v57 = vpop.permute.xlu1 %106 }
 0x180   :  { %v109_v58 = vadd.f32 %v107_v57, %v99_v56 }
 0x182   :  { %1438 = vtanh.f32 %v109_v58 }
 0x187   :  { %v144_v60 = vpop.permute.xlu1 %143 }
 0x188   :  { %v1439_v61 = vpop.eup %1438  ;;  %v146_v62 = vadd.f32 %v144_v60, %v136_v59 }
 0x189   :  { %112 = vrot.lane.b32.xlu2 %v1439_v61, %s1555_s16 }
 0x18a   :  { %1440 = vtanh.f32 %v146_v62 }
 0x190   :  { %v1441_v63 = vpop.eup %1440 }
 0x191   :  { %149 = vrot.lane.b32.xlu2 %v1441_v63, %s1555_s16 }
 0x1e3   :  { %v113_v16 = vpop.permute.xlu2 %112 }
 0x1e4   :  { %v115_v17 = vmul.f32 %v113_v16, %v96_v46 }
 0x1e6   :  { %154 = vst [vmem:[#allocation1] ss:$4 sm:$0xff] %v115_v17 }
 0x1eb   :  { %v150_v18 = vpop.permute.xlu2 %149 }
 0x1ec   :  { %v152_v19 = vmul.f32 %v150_v18, %v133_v53 }
 0x1ed   :  { %v1745_v20 = vld.sshfl [vmem:[#allocation1] sm:$0xff pattern:$0x73625140] }
 0x1ee   :  { %162 = vst [vmem:[#allocation1] ss:$4 sm:$0xff] %v152_v19 }
 0x1f5   :  { %v1747_v21 = vld.sshfl [vmem:[#allocation1] sm:$0xff pattern:$0x73625140] }
 0x1f6   :  { %169 = vst [vmem:[#allocation1] ss:$4 sm:$0xff] %v115_v17 }
 0x1fd   :  { %v170_v22 = vld.sshfl [vmem:[#allocation1] sm:$0xff pattern:$0x73625140] }
 0x1fe   :  { %174 = vst [vmem:[#allocation1] ss:$4 sm:$0xff] %v152_v19  ;;  %171 = vrot.lane.b32.xlu0 %v170_v22, %s1556_s17 }
 0x205   :  { %v175_v23 = vld.sshfl [vmem:[#allocation1] sm:$0xff pattern:$0x73625140] }
 0x206   :  { %182 = vst [vmem:[#allocation1] ss:$4 sm:$0xff] %v109_v58  ;;  %176 = vrot.lane.b32.xlu1 %v175_v23, %s1555_s16 }
 0x20d   :  { %v183_v24 = vld.sshfl [vmem:[#allocation1] sm:$0xff pattern:$0x73625140] }
 0x20e   :  { %184 = vrot.lane.b32.xlu2 %v183_v24, %s1557_s18 }
 0x268   :  { %v185_v25 = vpop.permute.xlu2 %184 }
 0x269   :  { %v1753_v26 = vsel %vm179_vm8, %v185_v25, %v146_v62 }
 0x26a   :  { %261 = vrot.lane.b32.xlu2 %v1753_v26, %s1556_s17 }
 0x270   :  { %v172_v27 = vpop.permute.xlu0 %171 }
 0x278   :  { %v177_v28 = vpop.permute.xlu1 %176 }
 0x279   :  { %v180_v29 = vsel %vm179_vm8, %v172_v27, %v177_v28 }
 0x27a   :  { %1381 = vmatmul.msk.f32.vlgmr.msra.gmra.mxu2 %vm27_vm9, %v180_v29  ;;  %1382 = vmatmul.msk.f32.vlgmr.msra.gmra.mxu3 %vm27_vm9, %v180_v29 }
 0x27b   :  { %853 = vmatpush.msra.mxu2 %v1576_v0  ;;  %873 = vmatpush.msra.mxu3 %v1581_v1 }
 0x27d   :  { %854 = vmatpush.msra.mxu2 %v1586_v2  ;;  %874 = vmatpush.msra.mxu3 %v1593_v3 }
 0x27f   :  { %855 = vmatpush.msra.mxu2 %v1598_v4  ;;  %875 = vmatpush.msra.mxu3 %v1603_v5 }
 0x281   :  { %856 = vmatpush.msra.mxu2 %v1612_v6  ;;  %876 = vmatpush.msra.mxu3 %v1617_v7 }
 0x283   :  { %857 = vmatpush.msra.mxu2 %v1626_v8  ;;  %877 = vmatpush.msra.mxu3 %v1631_v9 }
 0x285   :  { %858 = vmatpush.msra.mxu2 %v1640_v10  ;;  %878 = vmatpush.msra.mxu3 %v1645_v11 }
 0x287   :  { %859 = vmatpush.msra.mxu2 %v1654_v12  ;;  %879 = vmatpush.msra.mxu3 %v1659_v13 }
 0x289   :  { %860 = vmatpush.msra.mxu2 %v1668_v14  ;;  %880 = vmatpush.msra.mxu3 %v1673_v15 }
 0x2c4   :  { %v262_v23 = vpop.permute.xlu2 %261 }
 0x2fd   :  { %v208_v33 = vpop.f32.mrf.mxu2  ;;  %v228_v34 = vpop.f32.mrf.mxu3 }
 0x2fe   :  { %v233_v35 = vadd.f32 %v1383_v32, %v208_v33  ;;  %v239_v36 = vadd.f32 %v237_v31, %v228_v34 }
 0x300   :  { %1442 = vtanh.f32 %v233_v35  ;;  %v1385_v39 = vmul.f32 -1.442695, %v233_v35  ;;  %v1386_v40 = vmul.f32 -1.442695, %v239_v36 }
 0x301   :  { %1444 = vtanh.f32 %v239_v36 }
 0x302   :  { %1446 = vpow2.f32 %v1385_v39 }
 0x303   :  { %1448 = vpow2.f32 %v1386_v40 }
 0x306   :  { %v1443_v37 = vpop.eup %1442 }
 0x307   :  { %v1445_v38 = vpop.eup %1444  ;;  %266 = vrot.lane.b32.xlu0 %v1443_v37, %s1555_s16 }
 0x308   :  { %303 = vrot.lane.b32.xlu1 %v1445_v38, %s1555_s16  ;;  %v1447_v41 = vpop.eup %1446 }
 0x309   :  { %v1449_v42 = vpop.eup %1448  ;;  %v243_v43 = vadd.f32 1.0, %v1447_v41 }
 0x30a   :  { %v284_v44 = vadd.f32 1.0, %v1449_v42 }
 0x30b   :  { %1450 = vrcp.f32 %v243_v43  ;;  %v255_v55 = vand.u32 2147483648, %v243_v43  ;;  %vm249_vm12 = vweird.f32 %v243_v43  ;;  %v253_v57 = vand.u32 2147483647, %v243_v43 }
 0x30c   :  { %1452 = vrcp.f32 %v284_v44  ;;  %v296_v56 = vand.u32 2147483648, %v284_v44  ;;  %vm290_vm13 = vweird.f32 %v284_v44  ;;  %v294_v58 = vand.u32 2147483647, %v284_v44 }
 0x30d   :  { %v256_v61 = vor.u32 1.1754944e-38, %v255_v55  ;;  %vm254_vm0 = vcmp.eq.f32.partialorder %v253_v57, 8.507059e+37 }
 0x30e   :  { %v297_v62 = vor.u32 1.1754944e-38, %v296_v56  ;;  %vm295_vm1 = vcmp.eq.f32.partialorder %v294_v58, 8.507059e+37 }
 0x311   :  { %v1451_v45 = vpop.eup %1450 }
 0x312   :  { %v1453_v46 = vpop.eup %1452  ;;  %v245_v47 = vmul.f32 %v1451_v45, %v243_v43  ;;  %vm250_vm10 = vweird.f32 %v1451_v45 }
 0x313   :  { %v286_v48 = vmul.f32 %v1453_v46, %v284_v44  ;;  %vm291_vm11 = vweird.f32 %v1453_v46  ;;  %vm251_vm14 = vmor %vm249_vm12, %vm250_vm10 }
 0x314   :  { %v246_v49 = vsub.f32 1.0, %v245_v47  ;;  %vm292_vm15 = vmor %vm290_vm13, %vm291_vm11 }
 0x315   :  { %v287_v50 = vsub.f32 1.0, %v286_v48  ;;  %v1389_v48 = vld [vmem:[%s2076_s0 + $0x8] sm:$0xf] }
 0x316   :  { %v247_v51 = vmul.f32 %v1451_v45, %v246_v49 }
 0x317   :  { %v288_v52 = vmul.f32 %v1453_v46, %v287_v50 }
 0x318   :  { %v248_v53 = vadd.f32 %v1451_v45, %v247_v51 }
 0x319   :  { %v289_v54 = vadd.f32 %v1453_v46, %v288_v52 }
 0x31a   :  { %v252_v59 = vsel %vm251_vm14, %v1451_v45, %v248_v53 }
 0x31b   :  { %v293_v60 = vsel %vm292_vm15, %v1453_v46, %v289_v54  ;;  %v257_v16 = vsel %vm254_vm0, %v256_v61, %v252_v59  ;;  %v1390_v46 = vld [vmem:[%s2076_s0 + $0x14] sm:$0xf] }
 0x31c   :  { %v298_v18 = vsel %vm295_vm1, %v297_v62, %v293_v60  ;;  %v264_v24 = vmul.f32 %v262_v23, %v257_v16  ;;  %v401_v47 = vrot.slane %v1390_v46, 2 }
 0x31d   :  { %v301_v25 = vmul.f32 %v298_v18, %v1753_v26 }
 0x379   :  { %v267_v63 = vpop.permute.xlu0 %266 }
 0x37a   :  { %v304_v17 = vpop.permute.xlu1 %303  ;;  %v269_v19 = vmul.f32 %v267_v63, %v257_v16 }
 0x37b   :  { %v306_v22 = vmul.f32 %v304_v17, %v298_v18 }
 0x37c   :  { %271 = vrot.lane.b32.xlu0 %v269_v19, %s1556_s17 }
 0x37d   :  { %308 = vrot.lane.b32.xlu1 %v306_v22, %s1556_s17 }
 0x3ee   :  { %v272_v27 = vpop.permute.xlu0 %271 }
 0x3ef   :  { %v309_v28 = vpop.permute.xlu1 %308  ;;  %v274_v29 = vadd.f32 %v272_v27, %v264_v24 }
 0x3f0   :  { %v311_v30 = vadd.f32 %v309_v28, %v301_v25 }
 0x3f1   :  { %1454 = vtanh.f32 %v274_v29 }
 0x3f2   :  { %1456 = vtanh.f32 %v311_v30 }
 0x3f7   :  { %v1455_v31 = vpop.eup %1454 }
 0x3f8   :  { %v1457_v32 = vpop.eup %1456  ;;  %277 = vrot.lane.b32.xlu2 %v1455_v31, %s1555_s16 }
 0x3f9   :  { %314 = vrot.lane.b32.xlu0 %v1457_v32, %s1555_s16 }
 0x452   :  { %v278_v33 = vpop.permute.xlu2 %277 }
 0x453   :  { %v280_v34 = vmul.f32 %v278_v33, %v257_v16 }
 0x455   :  { %319 = vst [vmem:[#allocation1] ss:$4 sm:$0xff] %v280_v34 }
 0x45c   :  { %v1789_v37 = vld.sshfl [vmem:[#allocation1] sm:$0xff pattern:$0x73625140] }
 0x46b   :  { %v315_v35 = vpop.permute.xlu0 %314 }
 0x46c   :  { %v317_v36 = vmul.f32 %v315_v35, %v298_v18 }
 0x46e   :  { %327 = vst [vmem:[#allocation1] ss:$4 sm:$0xff] %v317_v36 }
 0x475   :  { %v1791_v26 = vld.sshfl [vmem:[#allocation1] sm:$0xff pattern:$0x73625140] }
 0x476   :  { %334 = vst [vmem:[#allocation1] ss:$4 sm:$0xff] %v280_v34 }
 0x47d   :  { %v335_v38 = vld.sshfl [vmem:[#allocation1] sm:$0xff pattern:$0x73625140] }
 0x47e   :  { %339 = vst [vmem:[#allocation1] ss:$4 sm:$0xff] %v317_v36  ;;  %336 = vrot.lane.b32.xlu1 %v335_v38, %s1556_s17 }
 0x485   :  { %v340_v39 = vld.sshfl [vmem:[#allocation1] sm:$0xff pattern:$0x73625140] }
 0x486   :  { %346 = vst [vmem:[#allocation1] ss:$4 sm:$0xff] %v274_v29  ;;  %341 = vrot.lane.b32.xlu2 %v340_v39, %s1555_s16 }
 0x48d   :  { %v347_v40 = vld.sshfl [vmem:[#allocation1] sm:$0xff pattern:$0x73625140] }
 0x48e   :  { %348 = vrot.lane.b32.xlu0 %v347_v40, %s1557_s18 }
 0x4e0   :  { %v342_v41 = vpop.permute.xlu2 %341 }
 0x4f0   :  { %v337_v42 = vpop.permute.xlu1 %336 }
 0x4f1   :  { %v344_v43 = vsel %vm179_vm8, %v337_v42, %v342_v41 }
 0x4f2   :  { %1387 = vmatmul.msk.f32.vlgmr.msrb.gmra.mxu0 %vm27_vm9, %v344_v43  ;;  %1388 = vmatmul.msk.f32.vlgmr.msrb.gmra.mxu1 %vm27_vm9, %v344_v43 }
 0x4f3   :  { %1015 = vmatpush.msrb.mxu0 %v1576_v0  ;;  %1035 = vmatpush.msrb.mxu1 %v1581_v1 }
 0x4f5   :  { %1016 = vmatpush.msrb.mxu0 %v1586_v2  ;;  %1036 = vmatpush.msrb.mxu1 %v1593_v3 }
 0x4f7   :  { %1017 = vmatpush.msrb.mxu0 %v1598_v4  ;;  %1037 = vmatpush.msrb.mxu1 %v1603_v5 }
 0x4f9   :  { %1018 = vmatpush.msrb.mxu0 %v1612_v6  ;;  %1038 = vmatpush.msrb.mxu1 %v1617_v7 }
 0x4fb   :  { %1019 = vmatpush.msrb.mxu0 %v1626_v8  ;;  %1039 = vmatpush.msrb.mxu1 %v1631_v9 }
 0x4fd   :  { %1020 = vmatpush.msrb.mxu0 %v1640_v10  ;;  %1040 = vmatpush.msrb.mxu1 %v1645_v11 }
 0x4ff   :  { %1021 = vmatpush.msrb.mxu0 %v1654_v12  ;;  %1041 = vmatpush.msrb.mxu1 %v1659_v13 }
 0x500   :  { %v349_v44 = vpop.permute.xlu0 %348 }
 0x501   :  { %v351_v45 = vsel %vm179_vm8, %v349_v44, %v311_v30  ;;  %1022 = vmatpush.msrb.mxu0 %v1668_v14  ;;  %1042 = vmatpush.msrb.mxu1 %v1673_v15 }
 0x502   :  { %425 = vrot.lane.b32.xlu0 %v351_v45, %s1556_s17 }
 0x56f   :  { %v372_v49 = vpop.f32.mrf.mxu0  ;;  %v392_v50 = vpop.f32.mrf.mxu1 }
 0x570   :  { %v397_v51 = vadd.f32 %v1389_v48, %v372_v49  ;;  %v403_v52 = vadd.f32 %v401_v47, %v392_v50 }
 0x572   :  { %1458 = vtanh.f32 %v397_v51  ;;  %v1392_v55 = vmul.f32 -1.442695, %v403_v52  ;;  %v1391_v59 = vmul.f32 -1.442695, %v397_v51 }
 0x573   :  { %1460 = vtanh.f32 %v403_v52 }
 0x574   :  { %1462 = vpow2.f32 %v1392_v55  ;;  %v426_v46 = vpop.permute.xlu0 %425 }
 0x578   :  { %v1459_v53 = vpop.eup %1458 }
 0x579   :  { %v1461_v54 = vpop.eup %1460  ;;  %430 = vrot.lane.b32.xlu1 %v1459_v53, %s1555_s16 }
 0x57a   :  { %467 = vrot.lane.b32.xlu2 %v1461_v54, %s1555_s16  ;;  %v1463_v56 = vpop.eup %1462 }
 0x57b   :  { %v448_v57 = vadd.f32 1.0, %v1463_v56 }
 0x57d   :  { %1464 = vrcp.f32 %v448_v57  ;;  %v460_v18 = vand.u32 2147483648, %v448_v57  ;;  %vm454_vm3 = vweird.f32 %v448_v57  ;;  %v458_v19 = vand.u32 2147483647, %v448_v57 }
 0x57e   :  { %1466 = vpow2.f32 %v1391_v59 }
 0x57f   :  { %v461_v23 = vor.u32 1.1754944e-38, %v460_v18  ;;  %vm459_vm5 = vcmp.eq.f32.partialorder %v458_v19, 8.507059e+37 }
 0x583   :  { %v1465_v58 = vpop.eup %1464 }
 0x584   :  { %v450_v60 = vmul.f32 %v1465_v58, %v448_v57  ;;  %v1467_v62 = vpop.eup %1466  ;;  %vm455_vm2 = vweird.f32 %v1465_v58 }
 0x585   :  { %v407_v16 = vadd.f32 1.0, %v1467_v62  ;;  %vm456_vm4 = vmor %vm454_vm3, %vm455_vm2 }
 0x586   :  { %v451_v61 = vsub.f32 1.0, %v450_v60 }
 0x587   :  { %1468 = vrcp.f32 %v407_v16  ;;  %v419_v33 = vand.u32 2147483648, %v407_v16  ;;  %vm413_vm7 = vweird.f32 %v407_v16  ;;  %v417_v34 = vand.u32 2147483647, %v407_v16 }
 0x588   :  { %v452_v63 = vmul.f32 %v1465_v58, %v451_v61 }
 0x589   :  { %v420_v36 = vor.u32 1.1754944e-38, %v419_v33  ;;  %vm418_vm11 = vcmp.eq.f32.partialorder %v417_v34, 8.507059e+37 }
 0x58a   :  { %v453_v17 = vadd.f32 %v1465_v58, %v452_v63 }
 0x58c   :  { %v457_v22 = vsel %vm456_vm4, %v1465_v58, %v453_v17 }
 0x58d   :  { %v462_v25 = vsel %vm459_vm5, %v461_v23, %v457_v22  ;;  %v1469_v27 = vpop.eup %1468 }
 0x58e   :  { %v409_v29 = vmul.f32 %v1469_v27, %v407_v16  ;;  %vm414_vm6 = vweird.f32 %v1469_v27  ;;  %v465_v41 = vmul.f32 %v462_v25, %v351_v45 }
 0x58f   :  { %vm415_vm10 = vmor %vm413_vm7, %vm414_vm6 }
 0x590   :  { %v410_v30 = vsub.f32 1.0, %v409_v29 }
 0x592   :  { %v411_v31 = vmul.f32 %v1469_v27, %v410_v30 }
 0x594   :  { %v412_v32 = vadd.f32 %v1469_v27, %v411_v31 }
 0x596   :  { %v416_v35 = vsel %vm415_vm10, %v1469_v27, %v412_v32 }
 0x597   :  { %v421_v38 = vsel %vm418_vm11, %v420_v36, %v416_v35 }
 0x598   :  { %v428_v47 = vmul.f32 %v426_v46, %v421_v38 }
 0x5d4   :  { %v468_v24 = vpop.permute.xlu2 %467 }
 0x5d5   :  { %v470_v28 = vmul.f32 %v468_v24, %v462_v25 }
 0x5d7   :  { %472 = vrot.lane.b32.xlu2 %v470_v28, %s1556_s17 }
 0x5eb   :  { %v431_v39 = vpop.permute.xlu1 %430 }
 0x5ec   :  { %v433_v40 = vmul.f32 %v431_v39, %v421_v38 }
 0x5ee   :  { %435 = vrot.lane.b32.xlu1 %v433_v40, %s1556_s17 }
 0x631   :  { %v473_v42 = vpop.permute.xlu2 %472 }
 0x632   :  { %v475_v43 = vadd.f32 %v473_v42, %v465_v41 }
 0x634   :  { %1470 = vtanh.f32 %v475_v43 }
 0x63a   :  { %v1471_v44 = vpop.eup %1470 }
 0x63b   :  { %478 = vrot.lane.b32.xlu1 %v1471_v44, %s1555_s16 }
 0x660   :  { %v436_v48 = vpop.permute.xlu1 %435 }
 0x661   :  { %v438_v49 = vadd.f32 %v436_v48, %v428_v47 }
 0x663   :  { %1472 = vtanh.f32 %v438_v49 }
 0x669   :  { %v1473_v50 = vpop.eup %1472 }
 0x66a   :  { %441 = vrot.lane.b32.xlu0 %v1473_v50, %s1555_s16 }
 0x6ad   :  { %v479_v53 = vpop.permute.xlu1 %478 }
 0x6ae   :  { %v481_v54 = vmul.f32 %v479_v53, %v462_v25 }
 0x6dc   :  { %v442_v51 = vpop.permute.xlu0 %441 }
 0x6dd   :  { %v444_v52 = vmul.f32 %v442_v51, %v421_v38 }
 0x6df   :  { %483 = vst [vmem:[#allocation1] ss:$4 sm:$0xff] %v444_v52 }
 0x6e6   :  { %v1829_v45 = vld.sshfl [vmem:[#allocation1] sm:$0xff pattern:$0x73625140] }
 0x6e7   :  { %491 = vst [vmem:[#allocation1] ss:$4 sm:$0xff] %v481_v54 }
 0x6ee   :  { %v1831_v55 = vld.sshfl [vmem:[#allocation1] sm:$0xff pattern:$0x73625140] }
 0x6ef   :  { %498 = vst [vmem:[#allocation1] ss:$4 sm:$0xff] %v444_v52 }
 0x6f6   :  { %v499_v56 = vld.sshfl [vmem:[#allocation1] sm:$0xff pattern:$0x73625140] }
 0x6f7   :  { %503 = vst [vmem:[#allocation1] ss:$4 sm:$0xff] %v481_v54  ;;  %500 = vrot.lane.b32.xlu2 %v499_v56, %s1556_s17 }
 0x6fe   :  { %v504_v57 = vld.sshfl [vmem:[#allocation1] sm:$0xff pattern:$0x73625140] }
 0x6ff   :  { %505 = vrot.lane.b32.xlu0 %v504_v57, %s1555_s16  ;;  %510 = vst [vmem:[#allocation1] ss:$4 sm:$0xff] %v438_v49 }
 0x706   :  { %v511_v58 = vld.sshfl [vmem:[#allocation1] sm:$0xff pattern:$0x73625140] }
 0x707   :  { %512 = vrot.lane.b32.xlu1 %v511_v58, %s1557_s18 }
 0x751   :  { %v501_v59 = vpop.permute.xlu2 %500 }
 0x771   :  { %v506_v60 = vpop.permute.xlu0 %505 }
 0x772   :  { %v508_v61 = vsel %vm179_vm8, %v501_v59, %v506_v60 }
 0x773   :  { %1393 = vmatmul.msk.f32.vlgmr.msrb.gmra.mxu2 %vm27_vm9, %v508_v61  ;;  %1394 = vmatmul.msk.f32.vlgmr.msrb.gmra.mxu3 %vm27_vm9, %v508_v61 }
 0x774   :  { %1177 = vmatpush.msrb.mxu2 %v1576_v0  ;;  %1197 = vmatpush.msrb.mxu3 %v1581_v1  ;;  %v1396_v0 = vld [vmem:[%s2076_s0 + $0x10] sm:$0xf] }
 0x775   :  { %v565_v1 = vrot.slane %v1396_v0, 2 }
 0x776   :  { %1178 = vmatpush.msrb.mxu2 %v1586_v2  ;;  %1198 = vmatpush.msrb.mxu3 %v1593_v3  ;;  %v1395_v2 = vld [vmem:[%s2076_s0 + $0xc] sm:$0xf] }
 0x778   :  { %1179 = vmatpush.msrb.mxu2 %v1598_v4  ;;  %1199 = vmatpush.msrb.mxu3 %v1603_v5 }
 0x779   :  { %v513_v62 = vpop.permute.xlu1 %512 }
 0x77a   :  { %v1846_v63 = vsel %vm179_vm8, %v513_v62, %v475_v43  ;;  %1180 = vmatpush.msrb.mxu2 %v1612_v6  ;;  %1200 = vmatpush.msrb.mxu3 %v1617_v7 }
 0x77b   :  { %589 = vrot.lane.b32.xlu1 %v1846_v63, %s1556_s17 }
 0x77c   :  { %1181 = vmatpush.msrb.mxu2 %v1626_v8  ;;  %1201 = vmatpush.msrb.mxu3 %v1631_v9 }
 0x77e   :  { %1182 = vmatpush.msrb.mxu2 %v1640_v10  ;;  %1202 = vmatpush.msrb.mxu3 %v1645_v11 }
 0x780   :  { %1183 = vmatpush.msrb.mxu2 %v1654_v12  ;;  %1203 = vmatpush.msrb.mxu3 %v1659_v13 }
 0x782   :  { %1184 = vmatpush.msrb.mxu2 %v1668_v14  ;;  %1204 = vmatpush.msrb.mxu3 %v1673_v15 }
 0x7ed   :  { %v590_v43 = vpop.permute.xlu1 %589 }
 0x7f6   :  { %v536_v3 = vpop.f32.mrf.mxu2  ;;  %v556_v4 = vpop.f32.mrf.mxu3 }
 0x7f7   :  { %v561_v5 = vadd.f32 %v1395_v2, %v536_v3  ;;  %v567_v6 = vadd.f32 %v565_v1, %v556_v4  ;;  %v1402_v4 = vld [vmem:[%s2076_s0 + $0xc] sm:$0xf] }
 0x7f9   :  { %1474 = vtanh.f32 %v561_v5  ;;  %v1397_v9 = vmul.f32 -1.442695, %v561_v5  ;;  %v1398_v13 = vmul.f32 -1.442695, %v567_v6  ;;  %v727_v5 = vrot.slane %v1402_v4, 2 }
 0x7fa   :  { %1476 = vtanh.f32 %v567_v6  ;;  %v1401_v6 = vld [vmem:[%s2076_s0 + $0x10] sm:$0xf] }
 0x7fb   :  { %1478 = vpow2.f32 %v1397_v9 }
 0x7ff   :  { %v1475_v7 = vpop.eup %1474 }
 0x800   :  { %v1477_v8 = vpop.eup %1476  ;;  %594 = vrot.lane.b32.xlu2 %v1475_v7, %s1555_s16 }
 0x801   :  { %631 = vrot.lane.b32.xlu0 %v1477_v8, %s1555_s16  ;;  %v1479_v10 = vpop.eup %1478 }
 0x802   :  { %v571_v11 = vadd.f32 1.0, %v1479_v10 }
 0x804   :  { %1480 = vrcp.f32 %v571_v11  ;;  %v583_v22 = vand.u32 2147483648, %v571_v11  ;;  %vm577_vm13 = vweird.f32 %v571_v11  ;;  %v581_v23 = vand.u32 2147483647, %v571_v11 }
 0x805   :  { %1482 = vpow2.f32 %v1398_v13 }
 0x806   :  { %v584_v25 = vor.u32 1.1754944e-38, %v583_v22  ;;  %vm582_vm15 = vcmp.eq.f32.partialorder %v581_v23, 8.507059e+37 }
 0x80a   :  { %v1481_v12 = vpop.eup %1480 }
 0x80b   :  { %v573_v14 = vmul.f32 %v1481_v12, %v571_v11  ;;  %v1483_v17 = vpop.eup %1482  ;;  %vm578_vm12 = vweird.f32 %v1481_v12 }
 0x80c   :  { %v612_v18 = vadd.f32 1.0, %v1483_v17  ;;  %vm579_vm14 = vmor %vm577_vm13, %vm578_vm12 }
 0x80d   :  { %v574_v15 = vsub.f32 1.0, %v573_v14 }
 0x80e   :  { %1484 = vrcp.f32 %v612_v18  ;;  %v624_v35 = vand.u32 2147483648, %v612_v18  ;;  %vm618_vm1 = vweird.f32 %v612_v18  ;;  %v622_v36 = vand.u32 2147483647, %v612_v18 }
 0x80f   :  { %v575_v16 = vmul.f32 %v1481_v12, %v574_v15 }
 0x810   :  { %v625_v39 = vor.u32 1.1754944e-38, %v624_v35  ;;  %vm623_vm3 = vcmp.eq.f32.partialorder %v622_v36, 8.507059e+37 }
 0x811   :  { %v576_v19 = vadd.f32 %v1481_v12, %v575_v16 }
 0x813   :  { %v580_v24 = vsel %vm579_vm14, %v1481_v12, %v576_v19 }
 0x814   :  { %v585_v28 = vsel %vm582_vm15, %v584_v25, %v580_v24  ;;  %v1485_v30 = vpop.eup %1484 }
 0x815   :  { %v614_v31 = vmul.f32 %v1485_v30, %v612_v18  ;;  %vm619_vm0 = vweird.f32 %v1485_v30  ;;  %v592_v44 = vmul.f32 %v590_v43, %v585_v28 }
 0x816   :  { %vm620_vm2 = vmor %vm618_vm1, %vm619_vm0 }
 0x817   :  { %v615_v32 = vsub.f32 1.0, %v614_v31 }
 0x819   :  { %v616_v33 = vmul.f32 %v1485_v30, %v615_v32 }
 0x81b   :  { %v617_v34 = vadd.f32 %v1485_v30, %v616_v33 }
 0x81d   :  { %v621_v38 = vsel %vm620_vm2, %v1485_v30, %v617_v34 }
 0x81e   :  { %v626_v41 = vsel %vm623_vm3, %v625_v39, %v621_v38 }
 0x81f   :  { %v629_v49 = vmul.f32 %v626_v41, %v1846_v63 }
 0x85a   :  { %v595_v27 = vpop.permute.xlu2 %594 }
 0x85b   :  { %v597_v29 = vmul.f32 %v595_v27, %v585_v28 }
 0x85d   :  { %599 = vrot.lane.b32.xlu2 %v597_v29, %s1556_s17 }
 0x873   :  { %v632_v40 = vpop.permute.xlu0 %631 }
 0x874   :  { %v634_v42 = vmul.f32 %v632_v40, %v626_v41 }
 0x876   :  { %636 = vrot.lane.b32.xlu0 %v634_v42, %s1556_s17 }
 0x8b7   :  { %v600_v46 = vpop.permute.xlu2 %599 }
 0x8b8   :  { %v602_v47 = vadd.f32 %v600_v46, %v592_v44 }
 0x8ba   :  { %1486 = vtanh.f32 %v602_v47 }
 0x8c0   :  { %v1487_v48 = vpop.eup %1486 }
 0x8c1   :  { %605 = vrot.lane.b32.xlu1 %v1487_v48, %s1555_s16 }
 0x8e8   :  { %v637_v50 = vpop.permute.xlu0 %636 }
 0x8e9   :  { %v639_v51 = vadd.f32 %v637_v50, %v629_v49 }
 0x8eb   :  { %1488 = vtanh.f32 %v639_v51 }
 0x8f1   :  { %v1489_v52 = vpop.eup %1488 }
 0x8f2   :  { %642 = vrot.lane.b32.xlu2 %v1489_v52, %s1555_s16 }
 0x933   :  { %v606_v53 = vpop.permute.xlu1 %605 }
 0x934   :  { %v608_v54 = vmul.f32 %v606_v53, %v585_v28 }
 0x936   :  { %647 = vst [vmem:[#allocation1] ss:$4 sm:$0xff] %v608_v54 }
 0x93d   :  { %v1873_v58 = vld.sshfl [vmem:[#allocation1] sm:$0xff pattern:$0x73625140] }
 0x94c   :  { %v643_v56 = vpop.permute.xlu2 %642 }
 0x94d   :  { %v645_v57 = vmul.f32 %v643_v56, %v626_v41 }
 0x94f   :  { %655 = vst [vmem:[#allocation1] ss:$4 sm:$0xff] %v645_v57 }
 0x956   :  { %v1875_v59 = vld.sshfl [vmem:[#allocation1] sm:$0xff pattern:$0x73625140] }
 0x957   :  { %662 = vst [vmem:[#allocation1] ss:$4 sm:$0xff] %v608_v54 }
 0x95e   :  { %v663_v60 = vld.sshfl [vmem:[#allocation1] sm:$0xff pattern:$0x73625140] }
 0x95f   :  { %664 = vrot.lane.b32.xlu0 %v663_v60, %s1556_s17  ;;  %667 = vst [vmem:[#allocation1] ss:$4 sm:$0xff] %v645_v57 }
 0x966   :  { %v668_v61 = vld.sshfl [vmem:[#allocation1] sm:$0xff pattern:$0x73625140] }
 0x967   :  { %669 = vrot.lane.b32.xlu1 %v668_v61, %s1555_s16  ;;  %674 = vst [vmem:[#allocation1] ss:$4 sm:$0xff] %v602_v47 }
 0x96e   :  { %v675_v62 = vld.sshfl [vmem:[#allocation1] sm:$0xff pattern:$0x73625140] }
 0x96f   :  { %676 = vrot.lane.b32.xlu2 %v675_v62, %s1557_s18 }
 0x9c9   :  { %v677_v63 = vpop.permute.xlu2 %676 }
 0x9ca   :  { %v1881_v0 = vsel %vm179_vm8, %v677_v63, %v639_v51 }
 0x9cb   :  { %751 = vrot.lane.b32.xlu2 %v1881_v0, %s1556_s17 }
 0x9d1   :  { %v665_v1 = vpop.permute.xlu0 %664 }
 0x9d9   :  { %v670_v2 = vpop.permute.xlu1 %669 }
 0x9da   :  { %v672_v3 = vsel %vm179_vm8, %v665_v1, %v670_v2 }
 0x9db   :  { %1399 = vmatmul.msk.f32.vlgmr.msra.gmra.mxu0 %vm27_vm9, %v672_v3  ;;  %1400 = vmatmul.msk.f32.vlgmr.msra.gmra.mxu1 %vm27_vm9, %v672_v3 }
 0xa25   :  { %v752_v48 = vpop.permute.xlu2 %751 }
 0xa58   :  { %v700_v7 = vpop.f32.mrf.mxu0  ;;  %v720_v8 = vpop.f32.mrf.mxu1 }
 0xa59   :  { %v724_v9 = vadd.f32 %v1401_v6, %v700_v7  ;;  %v729_v10 = vadd.f32 %v727_v5, %v720_v8 }
 0xa5b   :  { %1490 = vtanh.f32 %v724_v9  ;;  %v1403_v13 = vmul.f32 -1.442695, %v724_v9  ;;  %v1404_v14 = vmul.f32 -1.442695, %v729_v10 }
 0xa5c   :  { %1492 = vtanh.f32 %v729_v10  ;;  %v1408_v10 = vld [vmem:[%s2076_s0 + $0x8] sm:$0xf] }
 0xa5d   :  { %1494 = vpow2.f32 %v1403_v13 }
 0xa5e   :  { %1496 = vpow2.f32 %v1404_v14 }
 0xa61   :  { %v1491_v11 = vpop.eup %1490 }
 0xa62   :  { %v1493_v12 = vpop.eup %1492  ;;  %756 = vrot.lane.b32.xlu0 %v1491_v11, %s1555_s16  ;;  %v889_v11 = vrot.slane %v1408_v10, 2 }
 0xa63   :  { %793 = vrot.lane.b32.xlu1 %v1493_v12, %s1555_s16  ;;  %v1495_v15 = vpop.eup %1494  ;;  %v1407_v12 = vld [vmem:[%s2076_s0 + $0x14] sm:$0xf] }
 0xa64   :  { %v1497_v16 = vpop.eup %1496  ;;  %v733_v17 = vadd.f32 1.0, %v1495_v15 }
 0xa65   :  { %v774_v18 = vadd.f32 1.0, %v1497_v16 }
 0xa66   :  { %1498 = vrcp.f32 %v733_v17  ;;  %v745_v32 = vand.u32 2147483648, %v733_v17  ;;  %vm739_vm6 = vweird.f32 %v733_v17  ;;  %v743_v34 = vand.u32 2147483647, %v733_v17 }
 0xa67   :  { %1500 = vrcp.f32 %v774_v18  ;;  %v786_v33 = vand.u32 2147483648, %v774_v18  ;;  %vm780_vm7 = vweird.f32 %v774_v18  ;;  %v784_v35 = vand.u32 2147483647, %v774_v18 }
 0xa68   :  { %v746_v39 = vor.u32 1.1754944e-38, %v745_v32  ;;  %vm744_vm12 = vcmp.eq.f32.partialorder %v743_v34, 8.507059e+37 }
 0xa69   :  { %v787_v40 = vor.u32 1.1754944e-38, %v786_v33  ;;  %vm785_vm13 = vcmp.eq.f32.partialorder %v784_v35, 8.507059e+37 }
 0xa6c   :  { %v1499_v19 = vpop.eup %1498 }
 0xa6d   :  { %v1501_v22 = vpop.eup %1500  ;;  %v735_v23 = vmul.f32 %v1499_v19, %v733_v17  ;;  %vm740_vm4 = vweird.f32 %v1499_v19 }
 0xa6e   :  { %v776_v24 = vmul.f32 %v1501_v22, %v774_v18  ;;  %vm781_vm5 = vweird.f32 %v1501_v22  ;;  %vm741_vm10 = vmor %vm739_vm6, %vm740_vm4 }
 0xa6f   :  { %v736_v25 = vsub.f32 1.0, %v735_v23  ;;  %vm782_vm11 = vmor %vm780_vm7, %vm781_vm5 }
 0xa70   :  { %v777_v27 = vsub.f32 1.0, %v776_v24 }
 0xa71   :  { %v737_v28 = vmul.f32 %v1499_v19, %v736_v25 }
 0xa72   :  { %v778_v29 = vmul.f32 %v1501_v22, %v777_v27 }
 0xa73   :  { %v738_v30 = vadd.f32 %v1499_v19, %v737_v28 }
 0xa74   :  { %v779_v31 = vadd.f32 %v1501_v22, %v778_v29 }
 0xa75   :  { %v742_v36 = vsel %vm741_vm10, %v1499_v19, %v738_v30 }
 0xa76   :  { %v783_v38 = vsel %vm782_vm11, %v1501_v22, %v779_v31  ;;  %v747_v42 = vsel %vm744_vm12, %v746_v39, %v742_v36 }
 0xa77   :  { %v788_v44 = vsel %vm785_vm13, %v787_v40, %v783_v38  ;;  %v754_v49 = vmul.f32 %v752_v48, %v747_v42 }
 0xa78   :  { %v791_v50 = vmul.f32 %v788_v44, %v1881_v0 }
 0xad4   :  { %v757_v41 = vpop.permute.xlu0 %756 }
 0xad5   :  { %v794_v43 = vpop.permute.xlu1 %793  ;;  %v759_v46 = vmul.f32 %v757_v41, %v747_v42 }
 0xad6   :  { %v796_v47 = vmul.f32 %v794_v43, %v788_v44 }
 0xad7   :  { %761 = vrot.lane.b32.xlu0 %v759_v46, %s1556_s17 }
 0xad8   :  { %798 = vrot.lane.b32.xlu1 %v796_v47, %s1556_s17 }
 0xb49   :  { %v762_v51 = vpop.permute.xlu0 %761 }
 0xb4a   :  { %v799_v52 = vpop.permute.xlu1 %798  ;;  %v764_v53 = vadd.f32 %v762_v51, %v754_v49 }
 0xb4b   :  { %v801_v54 = vadd.f32 %v799_v52, %v791_v50 }
 0xb4c   :  { %1502 = vtanh.f32 %v764_v53 }
 0xb4d   :  { %1504 = vtanh.f32 %v801_v54 }
 0xb52   :  { %v1503_v56 = vpop.eup %1502 }
 0xb53   :  { %v1505_v57 = vpop.eup %1504  ;;  %767 = vrot.lane.b32.xlu2 %v1503_v56, %s1555_s16 }
 0xb54   :  { %804 = vrot.lane.b32.xlu0 %v1505_v57, %s1555_s16 }
 0xbad   :  { %v768_v60 = vpop.permute.xlu2 %767 }
 0xbae   :  { %v770_v61 = vmul.f32 %v768_v60, %v747_v42 }
 0xbb0   :  { %809 = vst [vmem:[#allocation1] ss:$4 sm:$0xff] %v770_v61 }
 0xbb7   :  { %v1901_v1 = vld.sshfl [vmem:[#allocation1] sm:$0xff pattern:$0x73625140] }
 0xbc6   :  { %v805_v62 = vpop.permute.xlu0 %804 }
 0xbc7   :  { %v807_v63 = vmul.f32 %v805_v62, %v788_v44 }
 0xbc9   :  { %817 = vst [vmem:[#allocation1] ss:$4 sm:$0xff] %v807_v63 }
 0xbd0   :  { %v1903_v0 = vld.sshfl [vmem:[#allocation1] sm:$0xff pattern:$0x73625140] }
 0xbd1   :  { %824 = vst [vmem:[#allocation1] ss:$4 sm:$0xff] %v770_v61 }
 0xbd8   :  { %v825_v2 = vld.sshfl [vmem:[#allocation1] sm:$0xff pattern:$0x73625140] }
 0xbd9   :  { %826 = vrot.lane.b32.xlu1 %v825_v2, %s1556_s17  ;;  %829 = vst [vmem:[#allocation1] ss:$4 sm:$0xff] %v807_v63 }
 0xbe0   :  { %v830_v3 = vld.sshfl [vmem:[#allocation1] sm:$0xff pattern:$0x73625140] }
 0xbe1   :  { %831 = vrot.lane.b32.xlu2 %v830_v3, %s1555_s16  ;;  %836 = vst [vmem:[#allocation1] ss:$4 sm:$0xff] %v764_v53 }
 0xbe8   :  { %v837_v4 = vld.sshfl [vmem:[#allocation1] sm:$0xff pattern:$0x73625140] }
 0xbe9   :  { %838 = vrot.lane.b32.xlu0 %v837_v4, %s1557_s18 }
 0xc3b   :  { %v832_v5 = vpop.permute.xlu2 %831 }
 0xc4b   :  { %v827_v6 = vpop.permute.xlu1 %826 }
 0xc4c   :  { %v834_v7 = vsel %vm179_vm8, %v827_v6, %v832_v5 }
 0xc4d   :  { %1405 = vmatmul.msk.f32.vlgmr.msra.gmra.mxu2 %vm27_vm9, %v834_v7  ;;  %1406 = vmatmul.msk.f32.vlgmr.msra.gmra.mxu3 %vm27_vm9, %v834_v7 }
 0xc5b   :  { %v839_v8 = vpop.permute.xlu0 %838 }
 0xc5c   :  { %v841_v9 = vsel %vm179_vm8, %v839_v8, %v801_v54 }
 0xc5d   :  { %913 = vrot.lane.b32.xlu0 %v841_v9, %s1556_s17 }
 0xccf   :  { %v914_v61 = vpop.permute.xlu0 %913 }
 0xcd0   :  { %v862_v13 = vpop.f32.mrf.mxu2  ;;  %v882_v14 = vpop.f32.mrf.mxu3 }
 0xcd1   :  { %v886_v15 = vadd.f32 %v1407_v12, %v862_v13  ;;  %v891_v16 = vadd.f32 %v889_v11, %v882_v14 }
 0xcd3   :  { %1506 = vtanh.f32 %v886_v15  ;;  %v1410_v19 = vmul.f32 -1.442695, %v891_v16  ;;  %v1409_v25 = vmul.f32 -1.442695, %v886_v15 }
 0xcd4   :  { %1508 = vtanh.f32 %v891_v16 }
 0xcd5   :  { %1510 = vpow2.f32 %v1410_v19 }
 0xcd9   :  { %v1507_v17 = vpop.eup %1506 }
 0xcda   :  { %v1509_v18 = vpop.eup %1508  ;;  %918 = vrot.lane.b32.xlu1 %v1507_v17, %s1555_s16 }
 0xcdb   :  { %955 = vrot.lane.b32.xlu2 %v1509_v18, %s1555_s16  ;;  %v1511_v22 = vpop.eup %1510  ;;  %v1414_v18 = vld [vmem:[%s2076_s0 + $0x4] sm:$0xf] }
 0xcdc   :  { %v936_v23 = vadd.f32 1.0, %v1511_v22  ;;  %v1051_v19 = vrot.slane %v1414_v18, 2  ;;  %v1413_v22 = vld [vmem:[%s2076_s0 + $0x18] sm:$0xf] }
 0xcde   :  { %1512 = vrcp.f32 %v936_v23  ;;  %v948_v33 = vand.u32 2147483648, %v936_v23  ;;  %vm942_vm15 = vweird.f32 %v936_v23  ;;  %v946_v34 = vand.u32 2147483647, %v936_v23 }
 0xcdf   :  { %1514 = vpow2.f32 %v1409_v25 }
 0xce0   :  { %v949_v36 = vor.u32 1.1754944e-38, %v948_v33  ;;  %vm947_vm1 = vcmp.eq.f32.partialorder %v946_v34, 8.507059e+37 }
 0xce4   :  { %v1513_v24 = vpop.eup %1512 }
 0xce5   :  { %v938_v27 = vmul.f32 %v1513_v24, %v936_v23  ;;  %v1515_v29 = vpop.eup %1514  ;;  %vm943_vm14 = vweird.f32 %v1513_v24 }
 0xce6   :  { %v895_v31 = vadd.f32 1.0, %v1515_v29  ;;  %vm944_vm0 = vmor %vm942_vm15, %vm943_vm14 }
 0xce7   :  { %v939_v28 = vsub.f32 1.0, %v938_v27 }
 0xce8   :  { %1516 = vrcp.f32 %v895_v31  ;;  %v907_v47 = vand.u32 2147483648, %v895_v31  ;;  %vm901_vm3 = vweird.f32 %v895_v31  ;;  %v905_v48 = vand.u32 2147483647, %v895_v31 }
 0xce9   :  { %v940_v30 = vmul.f32 %v1513_v24, %v939_v28 }
 0xcea   :  { %v908_v50 = vor.u32 1.1754944e-38, %v907_v47  ;;  %vm906_vm5 = vcmp.eq.f32.partialorder %v905_v48, 8.507059e+37 }
 0xceb   :  { %v941_v32 = vadd.f32 %v1513_v24, %v940_v30 }
 0xced   :  { %v945_v35 = vsel %vm944_vm0, %v1513_v24, %v941_v32 }
 0xcee   :  { %v950_v39 = vsel %vm947_vm1, %v949_v36, %v945_v35  ;;  %v1517_v40 = vpop.eup %1516 }
 0xcef   :  { %v897_v42 = vmul.f32 %v1517_v40, %v895_v31  ;;  %vm902_vm2 = vweird.f32 %v1517_v40  ;;  %v953_v54 = vmul.f32 %v950_v39, %v841_v9 }
 0xcf0   :  { %vm903_vm4 = vmor %vm901_vm3, %vm902_vm2 }
 0xcf1   :  { %v898_v43 = vsub.f32 1.0, %v897_v42 }
 0xcf3   :  { %v899_v44 = vmul.f32 %v1517_v40, %v898_v43 }
 0xcf5   :  { %v900_v46 = vadd.f32 %v1517_v40, %v899_v44 }
 0xcf7   :  { %v904_v49 = vsel %vm903_vm4, %v1517_v40, %v900_v46 }
 0xcf8   :  { %v909_v52 = vsel %vm906_vm5, %v908_v50, %v904_v49 }
 0xcf9   :  { %v916_v62 = vmul.f32 %v914_v61, %v909_v52 }
 0xd35   :  { %v956_v38 = vpop.permute.xlu2 %955 }
 0xd36   :  { %v958_v41 = vmul.f32 %v956_v38, %v950_v39 }
 0xd38   :  { %960 = vrot.lane.b32.xlu2 %v958_v41, %s1556_s17 }
 0xd4c   :  { %v919_v51 = vpop.permute.xlu1 %918 }
 0xd4d   :  { %v921_v53 = vmul.f32 %v919_v51, %v909_v52 }
 0xd4f   :  { %923 = vrot.lane.b32.xlu1 %v921_v53, %s1556_s17 }
 0xd92   :  { %v961_v56 = vpop.permute.xlu2 %960 }
 0xd93   :  { %v963_v57 = vadd.f32 %v961_v56, %v953_v54 }
 0xd95   :  { %1518 = vtanh.f32 %v963_v57 }
 0xd9b   :  { %v1519_v60 = vpop.eup %1518 }
 0xd9c   :  { %966 = vrot.lane.b32.xlu1 %v1519_v60, %s1555_s16 }
 0xdc1   :  { %v924_v63 = vpop.permute.xlu1 %923 }
 0xdc2   :  { %v926_v2 = vadd.f32 %v924_v63, %v916_v62 }
 0xdc4   :  { %1520 = vtanh.f32 %v926_v2 }
 0xdca   :  { %v1521_v3 = vpop.eup %1520 }
 0xdcb   :  { %929 = vrot.lane.b32.xlu0 %v1521_v3, %s1555_s16 }
 0xe0e   :  { %v967_v6 = vpop.permute.xlu1 %966 }
 0xe0f   :  { %v969_v7 = vmul.f32 %v967_v6, %v950_v39 }
 0xe3d   :  { %v930_v4 = vpop.permute.xlu0 %929 }
 0xe3e   :  { %v932_v5 = vmul.f32 %v930_v4, %v909_v52 }
 0xe40   :  { %971 = vst [vmem:[#allocation1] ss:$4 sm:$0xff] %v932_v5 }
 0xe47   :  { %v1925_v8 = vld.sshfl [vmem:[#allocation1] sm:$0xff pattern:$0x73625140] }
 0xe48   :  { %979 = vst [vmem:[#allocation1] ss:$4 sm:$0xff] %v969_v7 }
 0xe4f   :  { %v1927_v9 = vld.sshfl [vmem:[#allocation1] sm:$0xff pattern:$0x73625140] }
 0xe50   :  { %986 = vst [vmem:[#allocation1] ss:$4 sm:$0xff] %v932_v5 }
 0xe57   :  { %v987_v10 = vld.sshfl [vmem:[#allocation1] sm:$0xff pattern:$0x73625140] }
 0xe58   :  { %988 = vrot.lane.b32.xlu2 %v987_v10, %s1556_s17  ;;  %991 = vst [vmem:[#allocation1] ss:$4 sm:$0xff] %v969_v7 }
 0xe5f   :  { %v992_v11 = vld.sshfl [vmem:[#allocation1] sm:$0xff pattern:$0x73625140] }
 0xe60   :  { %993 = vrot.lane.b32.xlu0 %v992_v11, %s1555_s16  ;;  %998 = vst [vmem:[#allocation1] ss:$4 sm:$0xff] %v926_v2 }
 0xe67   :  { %v999_v12 = vld.sshfl [vmem:[#allocation1] sm:$0xff pattern:$0x73625140] }
 0xe68   :  { %1000 = vrot.lane.b32.xlu1 %v999_v12, %s1557_s18 }
 0xeb2   :  { %v989_v13 = vpop.permute.xlu2 %988 }
 0xed2   :  { %v994_v14 = vpop.permute.xlu0 %993 }
 0xed3   :  { %v996_v15 = vsel %vm179_vm8, %v989_v13, %v994_v14 }
 0xed4   :  { %1411 = vmatmul.msk.f32.vlgmr.msrb.gmra.mxu0 %vm27_vm9, %v996_v15  ;;  %1412 = vmatmul.msk.f32.vlgmr.msrb.gmra.mxu1 %vm27_vm9, %v996_v15 }
 0xeda   :  { %v1001_v16 = vpop.permute.xlu1 %1000 }
 0xedb   :  { %v1936_v17 = vsel %vm179_vm8, %v1001_v16, %v963_v57 }
 0xedc   :  { %1075 = vrot.lane.b32.xlu1 %v1936_v17, %s1556_s17 }
 0xf4e   :  { %v1076_v3 = vpop.permute.xlu1 %1075 }
 0xf51   :  { %v1024_v23 = vpop.f32.mrf.mxu0  ;;  %v1044_v24 = vpop.f32.mrf.mxu1 }
 0xf52   :  { %v1048_v25 = vadd.f32 %v1413_v22, %v1024_v23  ;;  %v1053_v27 = vadd.f32 %v1051_v19, %v1044_v24 }
 0xf54   :  { %1522 = vtanh.f32 %v1048_v25  ;;  %v1415_v30 = vmul.f32 -1.442695, %v1048_v25  ;;  %v1416_v34 = vmul.f32 -1.442695, %v1053_v27 }
 0xf55   :  { %1524 = vtanh.f32 %v1053_v27 }
 0xf56   :  { %1526 = vpow2.f32 %v1415_v30 }
 0xf5a   :  { %v1523_v28 = vpop.eup %1522 }
 0xf5b   :  { %v1525_v29 = vpop.eup %1524  ;;  %1080 = vrot.lane.b32.xlu2 %v1523_v28, %s1555_s16 }
 0xf5c   :  { %1117 = vrot.lane.b32.xlu0 %v1525_v29, %s1555_s16  ;;  %v1527_v31 = vpop.eup %1526 }
 0xf5d   :  { %v1057_v32 = vadd.f32 1.0, %v1527_v31  ;;  %v1211_v31 = vld [vmem:[%s2076_s0] sm:$0xf] }
 0xf5f   :  { %1528 = vrcp.f32 %v1057_v32  ;;  %v1069_v42 = vand.u32 2147483648, %v1057_v32  ;;  %vm1063_vm7 = vweird.f32 %v1057_v32  ;;  %v1067_v43 = vand.u32 2147483647, %v1057_v32 }
 0xf60   :  { %1530 = vpow2.f32 %v1416_v34 }
 0xf61   :  { %v1070_v46 = vor.u32 1.1754944e-38, %v1069_v42  ;;  %vm1068_vm11 = vcmp.eq.f32.partialorder %v1067_v43, 8.507059e+37 }
 0xf65   :  { %v1529_v33 = vpop.eup %1528 }
 0xf66   :  { %v1059_v35 = vmul.f32 %v1529_v33, %v1057_v32  ;;  %v1531_v39 = vpop.eup %1530  ;;  %vm1064_vm6 = vweird.f32 %v1529_v33  ;;  %v1213_v32 = vrot.slane %v1211_v31, 2 }
 0xf67   :  { %v1098_v40 = vadd.f32 1.0, %v1531_v39  ;;  %vm1065_vm10 = vmor %vm1063_vm7, %vm1064_vm6  ;;  %vm159_vm7 = vcmask 254976  }
 0xf68   :  { %v1060_v36 = vsub.f32 1.0, %v1059_v35 }
 0xf69   :  { %1532 = vrcp.f32 %v1098_v40  ;;  %v1110_v56 = vand.u32 2147483648, %v1098_v40  ;;  %vm1104_vm13 = vweird.f32 %v1098_v40  ;;  %v1108_v57 = vand.u32 2147483647, %v1098_v40 }
 0xf6a   :  { %v1061_v38 = vmul.f32 %v1529_v33, %v1060_v36 }
 0xf6b   :  { %v1111_v61 = vor.u32 1.1754944e-38, %v1110_v56  ;;  %vm1109_vm15 = vcmp.eq.f32.partialorder %v1108_v57, 8.507059e+37 }
 0xf6c   :  { %v1062_v41 = vadd.f32 %v1529_v33, %v1061_v38 }
 0xf6e   :  { %v1066_v44 = vsel %vm1065_vm10, %v1529_v33, %v1062_v41  ;;  %v1419_v33 = vld [vmem:[%s2076_s0 + $0x1c] sm:$0xf]  ;;  %vm1365_vm10 = vcmask 517120  }
 0xf6f   :  { %v1071_v48 = vsel %vm1068_vm11, %v1070_v46, %v1066_v44  ;;  %v1533_v50 = vpop.eup %1532 }
 0xf70   :  { %v1100_v51 = vmul.f32 %v1533_v50, %v1098_v40  ;;  %vm1105_vm12 = vweird.f32 %v1533_v50  ;;  %v1078_v4 = vmul.f32 %v1076_v3, %v1071_v48 }
 0xf71   :  { %vm1106_vm14 = vmor %vm1104_vm13, %vm1105_vm12 }
 0xf72   :  { %v1101_v52 = vsub.f32 1.0, %v1100_v51 }
 0xf74   :  { %v1102_v53 = vmul.f32 %v1533_v50, %v1101_v52 }
 0xf76   :  { %v1103_v54 = vadd.f32 %v1533_v50, %v1102_v53 }
 0xf78   :  { %v1107_v60 = vsel %vm1106_vm14, %v1533_v50, %v1103_v54 }
 0xf79   :  { %v1112_v63 = vsel %vm1109_vm15, %v1111_v61, %v1107_v60 }
 0xf7a   :  { %v1115_v10 = vmul.f32 %v1112_v63, %v1936_v17 }
 0xfb5   :  { %v1081_v47 = vpop.permute.xlu2 %1080 }
 0xfb6   :  { %v1083_v49 = vmul.f32 %v1081_v47, %v1071_v48 }
 0xfb8   :  { %1085 = vrot.lane.b32.xlu2 %v1083_v49, %s1556_s17 }
 0xfce   :  { %v1118_v62 = vpop.permute.xlu0 %1117 }
 0xfcf   :  { %v1120_v2 = vmul.f32 %v1118_v62, %v1112_v63 }
 0xfd1   :  { %1122 = vrot.lane.b32.xlu0 %v1120_v2, %s1556_s17 }
0x1012   :  { %v1086_v5 = vpop.permute.xlu2 %1085 }
0x1013   :  { %v1088_v6 = vadd.f32 %v1086_v5, %v1078_v4 }
0x1015   :  { %1534 = vtanh.f32 %v1088_v6 }
0x101b   :  { %v1535_v7 = vpop.eup %1534 }
0x101c   :  { %1091 = vrot.lane.b32.xlu1 %v1535_v7, %s1555_s16 }
0x1043   :  { %v1123_v11 = vpop.permute.xlu0 %1122 }
0x1044   :  { %v1125_v12 = vadd.f32 %v1123_v11, %v1115_v10 }
0x1046   :  { %1536 = vtanh.f32 %v1125_v12 }
0x104c   :  { %v1537_v13 = vpop.eup %1536 }
0x104d   :  { %1128 = vrot.lane.b32.xlu2 %v1537_v13, %s1555_s16 }
0x108e   :  { %v1092_v14 = vpop.permute.xlu1 %1091 }
0x108f   :  { %v1094_v15 = vmul.f32 %v1092_v14, %v1071_v48 }
0x1091   :  { %1133 = vst [vmem:[#allocation1] ss:$4 sm:$0xff] %v1094_v15 }
0x1098   :  { %v1953_v19 = vld.sshfl [vmem:[#allocation1] sm:$0xff pattern:$0x73625140] }
0x10a7   :  { %v1129_v16 = vpop.permute.xlu2 %1128 }
0x10a8   :  { %v1131_v18 = vmul.f32 %v1129_v16, %v1112_v63 }
0x10aa   :  { %1141 = vst [vmem:[#allocation1] ss:$4 sm:$0xff] %v1131_v18 }
0x10b1   :  { %v1955_v22 = vld.sshfl [vmem:[#allocation1] sm:$0xff pattern:$0x73625140] }
0x10b2   :  { %1148 = vst [vmem:[#allocation1] ss:$4 sm:$0xff] %v1094_v15 }
0x10b9   :  { %v1149_v23 = vld.sshfl [vmem:[#allocation1] sm:$0xff pattern:$0x73625140] }
0x10ba   :  { %1150 = vrot.lane.b32.xlu0 %v1149_v23, %s1556_s17  ;;  %1153 = vst [vmem:[#allocation1] ss:$4 sm:$0xff] %v1131_v18 }
0x10c1   :  { %v1154_v17 = vld.sshfl [vmem:[#allocation1] sm:$0xff pattern:$0x73625140] }
0x10c2   :  { %1155 = vrot.lane.b32.xlu1 %v1154_v17, %s1555_s16  ;;  %1160 = vst [vmem:[#allocation1] ss:$4 sm:$0xff] %v1088_v6 }
0x10c9   :  { %v1161_v24 = vld.sshfl [vmem:[#allocation1] sm:$0xff pattern:$0x73625140] }
0x10ca   :  { %1162 = vrot.lane.b32.xlu2 %v1161_v24, %s1557_s18 }
0x1124   :  { %v1163_v25 = vpop.permute.xlu2 %1162 }
0x1125   :  { %v1961_v27 = vsel %vm179_vm8, %v1163_v25, %v1125_v12 }
0x1126   :  { %1237 = vrot.lane.b32.xlu2 %v1961_v27, %s1556_s17 }
0x112c   :  { %v1151_v28 = vpop.permute.xlu0 %1150 }
0x1134   :  { %v1156_v29 = vpop.permute.xlu1 %1155 }
0x1135   :  { %v1158_v30 = vsel %vm179_vm8, %v1151_v28, %v1156_v29 }
0x1136   :  { %1417 = vmatmul.msk.f32.vlgmr.msrb.gmra.mxu2 %vm27_vm9, %v1158_v30  ;;  %1418 = vmatmul.msk.f32.vlgmr.msrb.gmra.mxu3 %vm27_vm9, %v1158_v30 }
0x1180   :  { %v1238_v15 = vpop.permute.xlu2 %1237 }
0x11b9   :  { %v1186_v34 = vpop.f32.mrf.mxu2  ;;  %v1206_v35 = vpop.f32.mrf.mxu3 }
0x11ba   :  { %v1210_v36 = vadd.f32 %v1419_v33, %v1186_v34  ;;  %v1215_v38 = vadd.f32 %v1213_v32, %v1206_v35 }
0x11bc   :  { %1538 = vtanh.f32 %v1210_v36  ;;  %v1420_v41 = vmul.f32 -1.442695, %v1210_v36  ;;  %v1421_v42 = vmul.f32 -1.442695, %v1215_v38 }
0x11bd   :  { %1540 = vtanh.f32 %v1215_v38 }
0x11be   :  { %1542 = vpow2.f32 %v1420_v41 }
0x11bf   :  { %1544 = vpow2.f32 %v1421_v42 }
0x11c2   :  { %v1539_v39 = vpop.eup %1538 }
0x11c3   :  { %v1541_v40 = vpop.eup %1540  ;;  %1242 = vrot.lane.b32.xlu0 %v1539_v39, %s1555_s16 }
0x11c4   :  { %1279 = vrot.lane.b32.xlu1 %v1541_v40, %s1555_s16  ;;  %v1543_v43 = vpop.eup %1542 }
0x11c5   :  { %v1545_v44 = vpop.eup %1544  ;;  %v1219_v46 = vadd.f32 1.0, %v1543_v43 }
0x11c6   :  { %v1260_v47 = vadd.f32 1.0, %v1545_v44 }
0x11c7   :  { %1546 = vrcp.f32 %v1219_v46  ;;  %v1231_v61 = vand.u32 2147483648, %v1219_v46  ;;  %vm1225_vm1 = vweird.f32 %v1219_v46  ;;  %v1229_v63 = vand.u32 2147483647, %v1219_v46 }
0x11c8   :  { %1548 = vrcp.f32 %v1260_v47  ;;  %v1272_v62 = vand.u32 2147483648, %v1260_v47  ;;  %vm1266_vm2 = vweird.f32 %v1260_v47  ;;  %v1270_v2 = vand.u32 2147483647, %v1260_v47 }
0x11c9   :  { %v1232_v5 = vor.u32 1.1754944e-38, %v1231_v61  ;;  %vm1230_vm5 = vcmp.eq.f32.partialorder %v1229_v63, 8.507059e+37 }
0x11ca   :  { %v1273_v6 = vor.u32 1.1754944e-38, %v1272_v62  ;;  %vm1271_vm6 = vcmp.eq.f32.partialorder %v1270_v2, 8.507059e+37 }
0x11cd   :  { %v1547_v48 = vpop.eup %1546 }
0x11ce   :  { %v1549_v49 = vpop.eup %1548  ;;  %v1221_v50 = vmul.f32 %v1547_v48, %v1219_v46  ;;  %vm1226_vm9 = vweird.f32 %v1547_v48 }
0x11cf   :  { %v1262_v51 = vmul.f32 %v1549_v49, %v1260_v47  ;;  %vm1267_vm0 = vweird.f32 %v1549_v49  ;;  %vm1227_vm3 = vmor %vm1225_vm1, %vm1226_vm9 }
0x11d0   :  { %v1222_v52 = vsub.f32 1.0, %v1221_v50  ;;  %vm1268_vm4 = vmor %vm1266_vm2, %vm1267_vm0 }
0x11d1   :  { %v1263_v53 = vsub.f32 1.0, %v1262_v51 }
0x11d2   :  { %v1223_v54 = vmul.f32 %v1547_v48, %v1222_v52 }
0x11d3   :  { %v1264_v56 = vmul.f32 %v1549_v49, %v1263_v53 }
0x11d4   :  { %v1224_v57 = vadd.f32 %v1547_v48, %v1223_v54 }
0x11d5   :  { %v1265_v60 = vadd.f32 %v1549_v49, %v1264_v56 }
0x11d6   :  { %v1228_v3 = vsel %vm1227_vm3, %v1547_v48, %v1224_v57 }
0x11d7   :  { %v1269_v4 = vsel %vm1268_vm4, %v1549_v49, %v1265_v60  ;;  %v1233_v10 = vsel %vm1230_vm5, %v1232_v5, %v1228_v3 }
0x11d8   :  { %v1274_v12 = vsel %vm1271_vm6, %v1273_v6, %v1269_v4  ;;  %v1240_v16 = vmul.f32 %v1238_v15, %v1233_v10 }
0x11d9   :  { %v1277_v18 = vmul.f32 %v1274_v12, %v1961_v27 }
0x1235   :  { %v1243_v7 = vpop.permute.xlu0 %1242 }
0x1236   :  { %v1280_v11 = vpop.permute.xlu1 %1279  ;;  %v1245_v13 = vmul.f32 %v1243_v7, %v1233_v10 }
0x1237   :  { %v1282_v14 = vmul.f32 %v1280_v11, %v1274_v12 }
0x1238   :  { %1247 = vrot.lane.b32.xlu0 %v1245_v13, %s1556_s17 }
0x1239   :  { %1284 = vrot.lane.b32.xlu1 %v1282_v14, %s1556_s17 }
0x1241   :  { %164 = vrot.lane.b32.xlu1 %v1747_v21, %s1556_s17 }
0x1249   :  { %657 = vrot.lane.b32.xlu1 %v1875_v59, %s1556_s17 }
0x1251   :  { %1143 = vrot.lane.b32.xlu1 %v1955_v22, %s1556_s17 }
0x1259   :  { %321 = vrot.lane.b32.xlu1 %v1789_v37, %s1556_s17 }
0x1261   :  { %811 = vrot.lane.b32.xlu1 %v1901_v1, %s1556_s17 }
0x12aa   :  { %v1248_v23 = vpop.permute.xlu0 %1247 }
0x12ab   :  { %v1285_v17 = vpop.permute.xlu1 %1284  ;;  %v1250_v24 = vadd.f32 %v1248_v23, %v1240_v16 }
0x12ac   :  { %v1287_v21 = vadd.f32 %v1285_v17, %v1277_v18 }
0x12ad   :  { %1550 = vtanh.f32 %v1250_v24 }
0x12ae   :  { %1552 = vtanh.f32 %v1287_v21 }
0x12b3   :  { %v1551_v59 = vpop.eup %1550  ;;  %v165_v25 = vpop.permute.xlu1 %164 }
0x12b4   :  { %v1553_v22 = vpop.eup %1552  ;;  %168 = vst.msk [vmem:[#allocation3 + $0xe] sm:$0x3] %vm159_vm7, %v165_v25  ;;  %1253 = vrot.lane.b32.xlu2 %v1551_v59, %s1555_s16 }
0x12b5   :  { %1290 = vrot.lane.b32.xlu0 %v1553_v22, %s1555_s16 }
0x12bb   :  { %v658_v37 = vpop.permute.xlu1 %657 }
0x12bc   :  { %661 = vst.msk [vmem:[#allocation3 + $0x8] sm:$0x3] %vm159_vm7, %v658_v37  ;;  %329 = vrot.lane.b32.xlu2 %v1791_v26, %s1556_s17 }
0x12bd   :  { %493 = vrot.lane.b32.xlu0 %v1831_v55, %s1556_s17 }
0x12c3   :  { %v1144_v1 = vpop.permute.xlu1 %1143  ;;  %v1321_v55 = vld [vmem:[#allocation3 + $0x8] sm:$0x3] }
0x12c4   :  { %1147 = vst.msk [vmem:[#allocation3 + $0x2] sm:$0x3] %vm159_vm7, %v1144_v1  ;;  %819 = vrot.lane.b32.xlu2 %v1903_v0, %s1556_s17  ;;  %v1324_v0 = vld [vmem:[#allocation3 + $0xe] sm:$0x3] }
0x12c5   :  { %981 = vrot.lane.b32.xlu0 %v1927_v9, %s1556_s17 }
0x12cb   :  { %v322_v27 = vpop.permute.xlu1 %321  ;;  %v1318_v26 = vld [vmem:[#allocation3 + $0x2] sm:$0x3] }
0x12cc   :  { %325 = vst.msk [vmem:[#allocation2 + $0x2] sm:$0x3] %vm159_vm7, %v322_v27 }
0x12cd   :  { %156 = vrot.lane.b32.xlu0 %v1745_v20, %s1556_s17 }
0x12d3   :  { %v812_v28 = vpop.permute.xlu1 %811 }
0x12d4   :  { %815 = vst.msk [vmem:[#allocation2 + $0x8] sm:$0x3] %vm159_vm7, %v812_v28 }
0x12d5   :  { %649 = vrot.lane.b32.xlu0 %v1873_v58, %s1556_s17 }
0x12dd   :  { %1135 = vrot.lane.b32.xlu0 %v1953_v19, %s1556_s17 }
0x12e5   :  { %1335 = vrot.lane.b32.xlu0 %v1318_v26, %s1556_s17 }
0x12ed   :  { %1341 = vrot.lane.b32.xlu0 %v1321_v55, %s1556_s17 }
0x12f5   :  { %1347 = vrot.lane.b32.xlu0 %v1324_v0, %s1556_s17 }
0x130e   :  { %v1254_v9 = vpop.permute.xlu2 %1253 }
0x130f   :  { %v1256_v20 = vmul.f32 %v1254_v9, %v1233_v10 }
0x1311   :  { %1295 = vst [vmem:[#allocation1] ss:$4 sm:$0xff] %v1256_v20 }
0x1316   :  { %v330_v29 = vpop.permute.xlu2 %329 }
0x1317   :  { %333 = vst.msk [vmem:[#allocation3 + $0xc] sm:$0x3] %vm159_vm7, %v330_v29 }
0x1318   :  { %v1296_v30 = vld.sshfl [vmem:[#allocation1] sm:$0xff pattern:$0x73625140] }
0x1319   :  { %1297 = vrot.lane.b32.xlu1 %v1296_v30, %s1556_s17 }
0x131e   :  { %v820_v58 = vpop.permute.xlu2 %819  ;;  %v1323_v56 = vld [vmem:[#allocation3 + $0xc] sm:$0x3] }
0x131f   :  { %823 = vst.msk [vmem:[#allocation3 + $0x6] sm:$0x3] %vm159_vm7, %v820_v58 }
0x1326   :  { %v1320_v40 = vld [vmem:[#allocation3 + $0x6] sm:$0x3] }
0x1327   :  { %v1291_v19 = vpop.permute.xlu0 %1290 }
0x1328   :  { %v1293_v31 = vmul.f32 %v1291_v19, %v1274_v12 }
0x132a   :  { %1303 = vst [vmem:[#allocation1] ss:$4 sm:$0xff] %v1293_v31 }
0x132f   :  { %v494_v32 = vpop.permute.xlu0 %493 }
0x1330   :  { %497 = vst.msk [vmem:[#allocation3 + $0xa] sm:$0x3] %vm159_vm7, %v494_v32 }
0x1331   :  { %v1304_v33 = vld.sshfl [vmem:[#allocation1] sm:$0xff pattern:$0x73625140] }
0x1332   :  { %1305 = vrot.lane.b32.xlu2 %v1304_v33, %s1556_s17 }
0x1337   :  { %v982_v34 = vpop.permute.xlu0 %981  ;;  %v1322_v39 = vld [vmem:[#allocation3 + $0xa] sm:$0x3] }
0x1338   :  { %985 = vst.msk [vmem:[#allocation3 + $0x4] sm:$0x3] %vm159_vm7, %v982_v34 }
0x133a   :  { %485 = vrot.lane.b32.xlu2 %v1829_v45, %s1556_s17  ;;  %v1310_v45 = vld [vmem:[#allocation2 + $0x2] sm:$0x3] }
0x133f   :  { %v157_v35 = vpop.permute.xlu0 %156  ;;  %v1319_v36 = vld [vmem:[#allocation3 + $0x4] sm:$0x3] }
0x1340   :  { %160 = vst.msk [vmem:[#allocation2] sm:$0x3] %vm159_vm7, %v157_v35  ;;  %1337 = vrot.lane.b32.xlu1 %v1319_v36, %s1556_s17 }
0x1342   :  { %973 = vrot.lane.b32.xlu2 %v1925_v8, %s1556_s17  ;;  %v1313_v8 = vld [vmem:[#allocation2 + $0x8] sm:$0x3] }
0x1347   :  { %v650_v38 = vpop.permute.xlu0 %649  ;;  %v1309_v7 = vld [vmem:[#allocation2] sm:$0x3] }
0x1348   :  { %653 = vst.msk [vmem:[#allocation2 + $0x6] sm:$0x3] %vm159_vm7, %v650_v38  ;;  %1343 = vrot.lane.b32.xlu1 %v1322_v39, %s1556_s17 }
0x134a   :  { %1339 = vrot.lane.b32.xlu2 %v1320_v40, %s1556_s17 }
0x134f   :  { %v1136_v41 = vpop.permute.xlu0 %1135  ;;  %v1312_v60 = vld [vmem:[#allocation2 + $0x6] sm:$0x3] }
0x1350   :  { %1139 = vst.msk [vmem:[#allocation2 + $0xc] sm:$0x3] %vm159_vm7, %v1136_v41 }
0x1357   :  { %v1336_v42 = vpop.permute.xlu0 %1335  ;;  %v1315_v12 = vld [vmem:[#allocation2 + $0xc] sm:$0x3] }
0x1358   :  { %v1358_v43 = vsel %vm179_vm8, %v1310_v45, %v1336_v42 }
0x1359   :  { %1367 = vst.msk [vmem:[%s2077_s2 + $0x2] sm:$0x3] %vm1365_vm10, %v1358_v43 }
0x135f   :  { %v1342_v44 = vpop.permute.xlu0 %1341 }
0x1360   :  { %v1361_v46 = vsel %vm179_vm8, %v1313_v8, %v1342_v44 }
0x1361   :  { %1370 = vst.msk [vmem:[%s2077_s2 + $0x8] sm:$0x3] %vm1365_vm10, %v1361_v46 }
0x1367   :  { %v1348_v49 = vpop.permute.xlu0 %1347 }
0x138b   :  { %v1298_v47 = vpop.permute.xlu1 %1297 }
0x138c   :  { %1301 = vst.msk [vmem:[#allocation2 + $0xe] sm:$0x3] %vm159_vm7, %v1298_v47  ;;  %v1306_v48 = vpop.permute.xlu2 %1305 }
0x138d   :  { %1308 = vst.msk [vmem:[#allocation3] sm:$0x3] %vm159_vm7, %v1306_v48 }
0x1393   :  { %v1316_v50 = vld [vmem:[#allocation2 + $0xe] sm:$0x3] }
0x1394   :  { %v1364_v51 = vsel %vm179_vm8, %v1316_v50, %v1348_v49  ;;  %v486_v52 = vpop.permute.xlu2 %485  ;;  %v1317_v53 = vld [vmem:[#allocation3] sm:$0x3] }
0x1395   :  { %1373 = vst.msk [vmem:[%s2077_s2 + $0xe] sm:$0x3] %vm1365_vm10, %v1364_v51  ;;  %1333 = vrot.lane.b32.xlu2 %v1317_v53, %s1556_s17 }
0x1396   :  { %489 = vst.msk [vmem:[#allocation2 + $0x4] sm:$0x3] %vm159_vm7, %v486_v52 }
0x139c   :  { %v974_v54 = vpop.permute.xlu2 %973 }
0x139d   :  { %977 = vst.msk [vmem:[#allocation2 + $0xa] sm:$0x3] %vm159_vm7, %v974_v54  ;;  %1345 = vrot.lane.b32.xlu2 %v1323_v56, %s1556_s17  ;;  %v1311_v62 = vld [vmem:[#allocation2 + $0x4] sm:$0x3] }
0x13a4   :  { %v1340_v57 = vpop.permute.xlu2 %1339  ;;  %v1314_v3 = vld [vmem:[#allocation2 + $0xa] sm:$0x3] }
0x13a5   :  { %v1360_v61 = vsel %vm179_vm8, %v1312_v60, %v1340_v57 }
0x13a6   :  { %1369 = vst.msk [vmem:[%s2077_s2 + $0x6] sm:$0x3] %vm1365_vm10, %v1360_v61 }
0x13b2   :  { %v1338_v63 = vpop.permute.xlu1 %1337 }
0x13b3   :  { %v1359_v2 = vsel %vm179_vm8, %v1311_v62, %v1338_v63 }
0x13b4   :  { %1368 = vst.msk [vmem:[%s2077_s2 + $0x4] sm:$0x3] %vm1365_vm10, %v1359_v2 }
0x13ba   :  { %v1344_v4 = vpop.permute.xlu1 %1343 }
0x13bb   :  { %v1362_v5 = vsel %vm179_vm8, %v1314_v3, %v1344_v4 }
0x13bc   :  { %1371 = vst.msk [vmem:[%s2077_s2 + $0xa] sm:$0x3] %vm1365_vm10, %v1362_v5 }
0x13ef   :  { %v1334_v6 = vpop.permute.xlu2 %1333 }
0x13f0   :  { %v1357_v10 = vsel %vm179_vm8, %v1309_v7, %v1334_v6 }
0x13f1   :  { %1366 = vst.msk [vmem:[%s2077_s2] sm:$0x3] %vm1365_vm10, %v1357_v10 }
0x13f7   :  { %v1346_v11 = vpop.permute.xlu2 %1345 }
0x13f8   :  { %v1363_v13 = vsel %vm179_vm8, %v1315_v12, %v1346_v11 }
0x13f9   :  { %1372 = vst.msk [vmem:[%s2077_s2 + $0xc] sm:$0x3] %vm1365_vm10, %v1363_v13 }

</bundles_post_ra>
